<compile_context>
chip_gen: v5e
topology: v5e:2x2
jax: 0.10.0
libtpu: 0.0.40
codegen_flags: <defaults>
</compile_context>

<pallas_src>
import functools

import jax
import jax.numpy as jnp
from jax import lax
from jax.experimental import pallas as pl
from jax.experimental.pallas import tpu as pltpu

EPS = 1e-5  # torch.nn.LayerNorm default


# --------------------------------- fused kernel --------------------------------
def critic_kernel(md_ref, port_ref, act_ref,
                  we_ref, win_ref, wc_ref, wdt_ref, wout_ref,
                  wp_ref, wa_ref, w1f_ref, w1p_ref, w1a_ref, w2_ref,
                  bias_g_ref, bias_l_ref,
                  o_ref, *, batch, seq_len, hidden, d_inner, d_conv, n_layers):
    f32, bf16 = jnp.float32, jnp.bfloat16
    bs = batch * seq_len
    H2 = 2 * hidden            # both branches packed along the lane axis
    DI2 = 2 * d_inner

    def dot(a, w):             # bf16 MXU matmul, f32 accumulate
        return jnp.dot(a.astype(bf16), w, preferred_element_type=f32)

    def silu(v):
        return v * jax.nn.sigmoid(v)

    # rows move toward higher indices: out[r] = v[r - s] (wrap handled by callers)
    def shift_down(v, s):
        return pltpu.roll(v, s, axis=0)

    # ---- hoisted iotas / masks (shared by all layers) ----
    pos = lax.broadcasted_iota(jnp.int32, (bs, 1), 0) % seq_len
    is_start = pos == 0
    conv_mask = [pos >= s for s in range(1, d_conv)]
    lane = lax.broadcasted_iota(jnp.int32, (1, H2), 1)
    is_left = lane < hidden                       # branch-0 lanes
    leftf = is_left.astype(f32)
    inv_h = 1.0 / hidden

    def ln_pair(y, g, b):
        """LayerNorm over each `hidden`-wide half of the packed lane axis."""
        s_l = jnp.sum(y * leftf, axis=-1, keepdims=True)
        s_a = jnp.sum(y, axis=-1, keepdims=True)
        mu = jnp.where(is_left, s_l, s_a - s_l) * inv_h
        d = y - mu
        d2 = d * d
        v_l = jnp.sum(d2 * leftf, axis=-1, keepdims=True)
        v_a = jnp.sum(d2, axis=-1, keepdims=True)
        var = jnp.where(is_left, v_l, v_a - v_l) * inv_h
        return d * lax.rsqrt(var + EPS) * g + b

    # ---------------- input embedding: Linear -> LayerNorm -> ReLU ----------------
    x = dot(md_ref[...], we_ref[...]) + bias_g_ref[0:1, :]
    x = jnp.maximum(ln_pair(x, bias_g_ref[1:2, :], bias_g_ref[2:3, :]), 0.0)

    # --------------------------------- Mamba blocks -------------------------------
    for l in range(n_layers):
        residual = x

        # packed in_proj -> columns [xs_q1 | xs_q2 | res_q1 | res_q2]
        xz = dot(x, win_ref[l]) + bias_l_ref[l, 0:1, :]
        xs = silu(xz[:, :DI2])
        res = xz[:, DI2:]

        # causal depthwise conv1d:  conv[t] = bias + sum_s wc[K-1-s] * xs[t-s]
        conv = xs * wc_ref[l, d_conv - 1:d_conv, :] + bias_l_ref[l, 1:2, 0:DI2]
        for s in range(1, d_conv):
            tap = wc_ref[l, d_conv - 1 - s:d_conv - s, :]
            conv = conv + jnp.where(conv_mask[s - 1], shift_down(xs, s), 0.0) * tap
        xc = silu(conv)

        # alpha = sigmoid(softplus(dt_proj(xc))) == 1 - 1/(2 + exp(z))
        z = dot(xc, wdt_ref[l]) + bias_l_ref[l, 2:3, 0:DI2]
        carry = pl.reciprocal(2.0 + jnp.exp(z), approx=True)     # = 1 - alpha
        carry = jnp.where(is_start, 0.0, carry)                  # y_0 = x_0

        # first-order recurrence y_t = a_t*xc_t + (1-a_t)*y_{t-1}, log-depth scan.
        # carry == 0 at sequence starts kills any wrapped / cross-sequence read.
        u = (1.0 - carry) * xc
        c = carry
        step = 1
        while step < seq_len:
            u = u + c * shift_down(u, step)
            c = c * shift_down(c, step)
            step *= 2

        y = (u + xc * bias_l_ref[l, 3:4, 0:DI2]) * silu(res)     # + D skip, gated
        out = dot(y, wout_ref[l]) + bias_l_ref[l, 4:5, 0:H2]
        x = ln_pair(out + residual,
                    bias_l_ref[l, 5:6, 0:H2], bias_l_ref[l, 6:7, 0:H2])

    # ----------------- last timestep of every sequence (one-hot matmul) -----------
    row = lax.broadcasted_iota(jnp.int32, (batch, bs), 1)
    want = lax.broadcasted_iota(jnp.int32, (batch, bs), 0) * seq_len + (seq_len - 1)
    feat = dot((row == want).astype(f32), x.astype(bf16))        # (batch, H2)

    # ----------------- portfolio / action embeddings (VPU, K=2 / K=1) -------------
    h4_2 = wp_ref.shape[-1]
    p_emb = bias_g_ref[3:4, 0:h4_2]
    for k in range(port_ref.shape[-1]):
        p_emb = p_emb + port_ref[:, k:k + 1] * wp_ref[k:k + 1, :]
    a_emb = bias_g_ref[4:5, 0:h4_2]
    for k in range(act_ref.shape[-1]):
        a_emb = a_emb + act_ref[:, k:k + 1] * wa_ref[k:k + 1, :]
    p_emb = jnp.maximum(p_emb, 0.0)
    a_emb = jnp.maximum(a_emb, 0.0)

    # ------------------------------------ fusion head -----------------------------
    h = (dot(feat, w1f_ref[...]) + dot(p_emb, w1p_ref[...]) + dot(a_emb, w1a_ref[...])
         + bias_g_ref[5:6, :])
    h = jnp.maximum(ln_pair(h, bias_g_ref[6:7, :], bias_g_ref[7:8, :]), 0.0)
    h = dot(h, w2_ref[...]) + bias_g_ref[8:9, :]
    h = jnp.maximum(ln_pair(h, bias_g_ref[9:10, :], bias_g_ref[10:11, :]), 0.0)

    # Linear(hidden -> 1) per branch on the VPU: multiply + masked lane reductions.
    prod = h * bias_g_ref[11:12, :]
    q1 = jnp.sum(prod * leftf, axis=-1, keepdims=True)
    q2 = jnp.sum(prod, axis=-1, keepdims=True) - q1
    col = lax.broadcasted_iota(jnp.int32, (batch, 2), 1)
    o_ref[...] = jnp.where(col == 0, q1, q2) + bias_g_ref[12:13, 0:2]


# ---------------------------------- full forward --------------------------------
def mamba_critic_forward(packed, market_data, portfolio_state, action):
    B, S, Fdim = market_data.shape
    hidden = packed["we"].shape[1] // 2
    n_layers, d_conv, DI2 = packed["wc"].shape
    d_inner = DI2 // 2

    md2d = market_data.reshape(B * S, Fdim).astype(jnp.bfloat16)
    args = (md2d,
            portfolio_state.astype(jnp.float32),
            action.astype(jnp.float32),
            packed["we"], packed["win"], packed["wc"], packed["wdt"], packed["wout"],
            packed["wp"], packed["wa"], packed["w1f"], packed["w1p"], packed["w1a"],
            packed["w2"], packed["bias_g"], packed["bias_l"])

    kern = functools.partial(critic_kernel, batch=B, seq_len=S, hidden=hidden,
                             d_inner=d_inner, d_conv=d_conv, n_layers=n_layers)

    # Single invocation, no grid: every (tiny, <0.5 MB total) operand stays
    # whole-array resident in VMEM for the full forward.
    # TODO(synk): if hidden_dim / n_layers ever grow, move the layer axis into a
    # grid (or pltpu.emit_pipeline) so per-layer weights stream instead.
    q = pl.pallas_call(
        kern,
        out_shape=jax.ShapeDtypeStruct((B, 2), jnp.float32),
        compiler_params=pltpu.CompilerParams(vmem_limit_bytes=32 * 1024 * 1024),
    )(*args)
    return q[:, 0:1], q[:, 1:2]


# -------------------------------- parameter setup -------------------------------
def _xavier(key, fan_in, fan_out):
    bound = (6.0 / (fan_in + fan_out)) ** 0.5
    # stored as (in, out) so the kernel computes x @ W
    return jax.random.uniform(key, (fan_in, fan_out), jnp.float32, -bound, bound)


def make_branch_params(key, feature_dim, hidden_dim, action_dim, n_layers, d_conv):
    H = hidden_dim
    di = 2 * H                                   # expand_factor * d_model
    h4 = H // 4
    keys = iter(jax.random.split(key, 8 * n_layers + 16))
    nk = lambda: next(keys)
    zeros = lambda *s: jnp.zeros(s, jnp.float32)
    ones = lambda *s: jnp.ones(s, jnp.float32)
    cb = 1.0 / (d_conv ** 0.5)                   # torch Conv1d default bound
    return {
        "we": _xavier(nk(), feature_dim, H), "be": zeros(H), "ge": ones(H), "bee": zeros(H),
        "win": jnp.stack([_xavier(nk(), H, 2 * di) for _ in range(n_layers)]),
        "bin": zeros(n_layers, 2 * di),
        "wc": jnp.stack([jax.random.uniform(nk(), (d_conv, di), jnp.float32, -cb, cb)
                         for _ in range(n_layers)]),
        "bc": jnp.stack([jax.random.uniform(nk(), (di,), jnp.float32, -cb, cb)
                         for _ in range(n_layers)]),
        "wdt": jnp.stack([_xavier(nk(), di, di) for _ in range(n_layers)]),
        "bdt": zeros(n_layers, di),
        "D": ones(n_layers, di),
        "wout": jnp.stack([_xavier(nk(), di, H) for _ in range(n_layers)]),
        "bout": zeros(n_layers, H), "gn": ones(n_layers, H), "bn": zeros(n_layers, H),
        "wp": _xavier(nk(), 2, h4), "bp": zeros(h4),
        "wa": _xavier(nk(), action_dim, h4), "ba": zeros(h4),
        "w1": _xavier(nk(), H + 2 * h4, H), "b1": zeros(H), "g1": ones(H), "be1": zeros(H),
        "w2": _xavier(nk(), H, H), "b2": zeros(H), "g2": ones(H), "be2": zeros(H),
        "w3": _xavier(nk(), H, 1), "b3": zeros(1),
    }


def pack_params(p1, p2):
    """Pack the two Q-branches along the lane axis (block-diagonal weights)."""
    f32, bf16 = jnp.float32, jnp.bfloat16
    H = p1["we"].shape[1]
    di = p1["D"].shape[1]
    n_layers, d_conv, _ = p1["wc"].shape
    h4 = p1["bp"].shape[0]
    H2, DI2 = 2 * H, 2 * di

    def bdiag(a, b):
        r1, c1 = a.shape
        r2, c2 = b.shape
        return (jnp.zeros((r1 + r2, c1 + c2), f32)
                .at[:r1, :c1].set(a).at[r1:, c1:].set(b))

    def row(v, width):
        return jnp.zeros((width,), f32).at[:v.shape[0]].set(v)

    win, wc, wdt, wout, bias_l = [], [], [], [], []
    for l in range(n_layers):
        a, b = p1["win"][l], p2["win"][l]                    # (H, 2*di)
        blk = jnp.zeros((H2, 2 * DI2), f32)
        blk = blk.at[:H, 0:di].set(a[:, :di])                # xs_q1
        blk = blk.at[H:, di:DI2].set(b[:, :di])              # xs_q2
        blk = blk.at[:H, DI2:DI2 + di].set(a[:, di:])        # res_q1
        blk = blk.at[H:, DI2 + di:].set(b[:, di:])           # res_q2
        win.append(blk)
        wc.append(jnp.concatenate([p1["wc"][l], p2["wc"][l]], axis=1))
        wdt.append(bdiag(p1["wdt"][l], p2["wdt"][l]))
        wout.append(bdiag(p1["wout"][l], p2["wout"][l]))
        bin_p = jnp.concatenate([p1["bin"][l][:di], p2["bin"][l][:di],
                                 p1["bin"][l][di:], p2["bin"][l][di:]])
        bias_l.append(jnp.stack([
            row(bin_p, 2 * DI2),
            row(jnp.concatenate([p1["bc"][l], p2["bc"][l]]), 2 * DI2),
            row(jnp.concatenate([p1["bdt"][l], p2["bdt"][l]]), 2 * DI2),
            row(jnp.concatenate([p1["D"][l], p2["D"][l]]), 2 * DI2),
            row(jnp.concatenate([p1["bout"][l], p2["bout"][l]]), 2 * DI2),
            row(jnp.concatenate([p1["gn"][l], p2["gn"][l]]), 2 * DI2),
            row(jnp.concatenate([p1["bn"][l], p2["bn"][l]]), 2 * DI2),
        ]))

    bias_g = jnp.stack([
        row(jnp.concatenate([p1["be"], p2["be"]]), H2),       # 0
        row(jnp.concatenate([p1["ge"], p2["ge"]]), H2),       # 1
        row(jnp.concatenate([p1["bee"], p2["bee"]]), H2),     # 2
        row(jnp.concatenate([p1["bp"], p2["bp"]]), H2),       # 3
        row(jnp.concatenate([p1["ba"], p2["ba"]]), H2),       # 4
        row(jnp.concatenate([p1["b1"], p2["b1"]]), H2),       # 5
        row(jnp.concatenate([p1["g1"], p2["g1"]]), H2),       # 6
        row(jnp.concatenate([p1["be1"], p2["be1"]]), H2),     # 7
        row(jnp.concatenate([p1["b2"], p2["b2"]]), H2),       # 8
        row(jnp.concatenate([p1["g2"], p2["g2"]]), H2),       # 9
        row(jnp.concatenate([p1["be2"], p2["be2"]]), H2),     # 10
        row(jnp.concatenate([p1["w3"][:, 0], p2["w3"][:, 0]]), H2),   # 11
        row(jnp.concatenate([p1["b3"], p2["b3"]]), H2),       # 12
    ])

    return {
        # MXU weights -> bf16; element-wise (VPU) tensors stay f32.
        "we": jnp.concatenate([p1["we"], p2["we"]], axis=1).astype(bf16),
        "win": jnp.stack(win).astype(bf16),
        "wc": jnp.stack(wc),
        "wdt": jnp.stack(wdt).astype(bf16),
        "wout": jnp.stack(wout).astype(bf16),
        "wp": jnp.concatenate([p1["wp"], p2["wp"]], axis=1),
        "wa": jnp.concatenate([p1["wa"], p2["wa"]], axis=1),
        "w1f": bdiag(p1["w1"][:H], p2["w1"][:H]).astype(bf16),
        "w1p": bdiag(p1["w1"][H:H + h4], p2["w1"][H:H + h4]).astype(bf16),
        "w1a": bdiag(p1["w1"][H + h4:], p2["w1"][H + h4:]).astype(bf16),
        "w2": bdiag(p1["w2"], p2["w2"]).astype(bf16),
        "bias_g": bias_g,
        "bias_l": jnp.stack(bias_l),
    }


# --------------------------------------- main -----------------------------------
if __name__ == "__main__":
    BATCH, WINDOW = 2, 8
    FEATURE_DIM, HIDDEN_DIM = 16, 32
    MAMBA_LAYERS, ACTION_DIM, D_CONV = 4, 1, 4

    key = jax.random.PRNGKey(0)
    k_md, k_ps, k_ac, k_q1, k_q2 = jax.random.split(key, 5)

    market_data = jax.random.normal(k_md, (BATCH, WINDOW, FEATURE_DIM), jnp.float32)
    portfolio_state = jax.random.normal(k_ps, (BATCH, 2), jnp.float32)
    action = jax.random.normal(k_ac, (BATCH, ACTION_DIM), jnp.float32)

    packed = pack_params(
        make_branch_params(k_q1, FEATURE_DIM, HIDDEN_DIM, ACTION_DIM, MAMBA_LAYERS, D_CONV),
        make_branch_params(k_q2, FEATURE_DIM, HIDDEN_DIM, ACTION_DIM, MAMBA_LAYERS, D_CONV))

    q1, q2 = jax.jit(mamba_critic_forward)(packed, market_data, portfolio_state, action)
    jax.block_until_ready((q1, q2))
    assert q1.shape == (BATCH, 1) and q2.shape == (BATCH, 1)
    assert bool(jnp.all(jnp.isfinite(q1))) and bool(jnp.all(jnp.isfinite(q2)))
    print("KERNEL_OK")
</pallas_src>

<mosaic_0001>
module attributes {stable_mosaic.version = 11 : i64} {
  func.func @critic_kernel(%arg0: memref<16x16xbf16, #tpu.memory_space<vmem>>, %arg1: memref<2x2xf32, #tpu.memory_space<vmem>>, %arg2: memref<2x1xf32, #tpu.memory_space<vmem>>, %arg3: memref<16x64xbf16, #tpu.memory_space<vmem>>, %arg4: memref<4x64x256xbf16, #tpu.memory_space<vmem>>, %arg5: memref<4x4x128xf32, #tpu.memory_space<vmem>>, %arg6: memref<4x128x128xbf16, #tpu.memory_space<vmem>>, %arg7: memref<4x128x64xbf16, #tpu.memory_space<vmem>>, %arg8: memref<2x16xf32, #tpu.memory_space<vmem>>, %arg9: memref<1x16xf32, #tpu.memory_space<vmem>>, %arg10: memref<64x64xbf16, #tpu.memory_space<vmem>>, %arg11: memref<16x64xbf16, #tpu.memory_space<vmem>>, %arg12: memref<16x64xbf16, #tpu.memory_space<vmem>>, %arg13: memref<64x64xbf16, #tpu.memory_space<vmem>>, %arg14: memref<13x64xf32, #tpu.memory_space<vmem>>, %arg15: memref<4x7x256xf32, #tpu.memory_space<vmem>>, %arg16: memref<2x2xf32, #tpu.memory_space<vmem>>) attributes {dimension_semantics = [], scalar_prefetch = 0 : i64, scratch_operands = 0 : i64, tpu.core_type = #tpu.core_type<tc>} {
    %0 = tpu.iota {dimensions = array<i32: 0>} : vector<16x1xi32>
    %c8_i32 = arith.constant 8 : i32
    %c0_i32 = arith.constant 0 : i32
    %1 = arith.cmpi eq, %c8_i32, %c0_i32 : i32
    %c1_i32 = arith.constant 1 : i32
    %2 = arith.select %1, %c1_i32, %c8_i32 : i32
    %3 = vector.broadcast %2 : i32 to vector<16x1xi32>
    %4 = arith.remsi %0, %3 : vector<16x1xi32>
    %c0_i32_0 = arith.constant 0 : i32
    %5 = vector.broadcast %c0_i32_0 : i32 to vector<16x1xi32>
    %6 = arith.cmpi ne, %4, %5 : vector<16x1xi32>
    %c0_i32_1 = arith.constant 0 : i32
    %7 = vector.broadcast %c0_i32_1 : i32 to vector<16x1xi32>
    %8 = arith.cmpi slt, %4, %7 : vector<16x1xi32>
    %c0_i32_2 = arith.constant 0 : i32
    %9 = arith.cmpi slt, %2, %c0_i32_2 : i32
    %10 = vector.broadcast %9 : i1 to vector<16x1xi1>
    %11 = vector.broadcast %10 : vector<16x1xi1> to vector<16x1xi1>
    %12 = arith.xori %8, %11 : vector<16x1xi1>
    %13 = arith.andi %12, %6 : vector<16x1xi1>
    %14 = vector.broadcast %2 : i32 to vector<16x1xi32>
    %15 = arith.addi %4, %14 : vector<16x1xi32>
    %16 = arith.select %13, %15, %4 : vector<16x1xi1>, vector<16x1xi32>
    %c0_i32_3 = arith.constant 0 : i32
    %17 = vector.broadcast %c0_i32_3 : i32 to vector<16x1xi32>
    %18 = arith.cmpi eq, %16, %17 : vector<16x1xi32>
    %c1_i32_4 = arith.constant 1 : i32
    %19 = vector.broadcast %c1_i32_4 : i32 to vector<16x1xi32>
    %20 = arith.cmpi sge, %16, %19 : vector<16x1xi32>
    %c2_i32 = arith.constant 2 : i32
    %21 = vector.broadcast %c2_i32 : i32 to vector<16x1xi32>
    %22 = arith.cmpi sge, %16, %21 : vector<16x1xi32>
    %c3_i32 = arith.constant 3 : i32
    %23 = vector.broadcast %c3_i32 : i32 to vector<16x1xi32>
    %24 = arith.cmpi sge, %16, %23 : vector<16x1xi32>
    %25 = tpu.iota {dimensions = array<i32: 1>} : vector<1x64xi32>
    %c32_i32 = arith.constant 32 : i32
    %26 = vector.broadcast %c32_i32 : i32 to vector<1x64xi32>
    %27 = arith.cmpi slt, %25, %26 : vector<1x64xi32>
    %28 = arith.extui %27 : vector<1x64xi1> to vector<1x64xi32>
    %29 = arith.sitofp %28 : vector<1x64xi32> to vector<1x64xf32>
    %c0 = arith.constant 0 : index
    %c0_5 = arith.constant 0 : index
    %30 = vector.load %arg0[%c0, %c0_5] : memref<16x16xbf16, #tpu.memory_space<vmem>>, vector<16x16xbf16>
    %c0_6 = arith.constant 0 : index
    %c0_7 = arith.constant 0 : index
    %31 = vector.load %arg3[%c0_6, %c0_7] : memref<16x64xbf16, #tpu.memory_space<vmem>>, vector<16x64xbf16>
    %cst = arith.constant dense<0.000000e+00> : vector<16x64xf32>
    %32 = tpu.matmul %30, %31, %cst {dimension_numbers = #tpu.dot_dimension_numbers<[1], [0], [0], [1], [0, 0, 1, 1], [], []>} : vector<16x16xbf16>, vector<16x64xbf16>, vector<16x64xf32> -> vector<16x64xf32>
    %c0_8 = arith.constant 0 : index
    %c0_9 = arith.constant 0 : index
    %33 = vector.load %arg14[%c0_8, %c0_9] : memref<13x64xf32, #tpu.memory_space<vmem>>, vector<1x64xf32>
    %34 = vector.broadcast %33 : vector<1x64xf32> to vector<16x64xf32>
    %35 = arith.addf %32, %34 : vector<16x64xf32>
    %c1 = arith.constant 1 : index
    %c0_10 = arith.constant 0 : index
    %36 = vector.load %arg14[%c1, %c0_10] : memref<13x64xf32, #tpu.memory_space<vmem>>, vector<1x64xf32>
    %c2 = arith.constant 2 : index
    %c0_11 = arith.constant 0 : index
    %37 = vector.load %arg14[%c2, %c0_11] : memref<13x64xf32, #tpu.memory_space<vmem>>, vector<1x64xf32>
    %38 = vector.broadcast %29 : vector<1x64xf32> to vector<16x64xf32>
    %39 = arith.mulf %35, %38 : vector<16x64xf32>
    %cst_12 = arith.constant dense<0.000000e+00> : vector<16xf32>
    %40 = vector.multi_reduction <add>, %39, %cst_12 [1] : vector<16x64xf32> to vector<16xf32>
    %41 = vector.shape_cast %40 : vector<16xf32> to vector<16x1xf32>
    %cst_13 = arith.constant dense<0.000000e+00> : vector<16xf32>
    %42 = vector.multi_reduction <add>, %35, %cst_13 [1] : vector<16x64xf32> to vector<16xf32>
    %43 = vector.shape_cast %42 : vector<16xf32> to vector<16x1xf32>
    %44 = arith.subf %43, %41 : vector<16x1xf32>
    %45 = vector.shape_cast %27 : vector<1x64xi1> to vector<1x64xi1>
    %46 = vector.broadcast %45 : vector<1x64xi1> to vector<16x64xi1>
    %47 = vector.shape_cast %41 : vector<16x1xf32> to vector<16x1xf32>
    %48 = vector.broadcast %47 : vector<16x1xf32> to vector<16x64xf32>
    %49 = vector.shape_cast %44 : vector<16x1xf32> to vector<16x1xf32>
    %50 = vector.broadcast %49 : vector<16x1xf32> to vector<16x64xf32>
    %51 = arith.select %46, %48, %50 : vector<16x64xi1>, vector<16x64xf32>
    %cst_14 = arith.constant 3.125000e-02 : f32
    %52 = vector.broadcast %cst_14 : f32 to vector<16x64xf32>
    %53 = arith.mulf %51, %52 : vector<16x64xf32>
    %54 = arith.subf %35, %53 : vector<16x64xf32>
    %55 = arith.mulf %54, %54 : vector<16x64xf32>
    %56 = vector.broadcast %29 : vector<1x64xf32> to vector<16x64xf32>
    %57 = arith.mulf %55, %56 : vector<16x64xf32>
    %cst_15 = arith.constant dense<0.000000e+00> : vector<16xf32>
    %58 = vector.multi_reduction <add>, %57, %cst_15 [1] : vector<16x64xf32> to vector<16xf32>
    %59 = vector.shape_cast %58 : vector<16xf32> to vector<16x1xf32>
    %cst_16 = arith.constant dense<0.000000e+00> : vector<16xf32>
    %60 = vector.multi_reduction <add>, %55, %cst_16 [1] : vector<16x64xf32> to vector<16xf32>
    %61 = vector.shape_cast %60 : vector<16xf32> to vector<16x1xf32>
    %62 = arith.subf %61, %59 : vector<16x1xf32>
    %63 = vector.shape_cast %27 : vector<1x64xi1> to vector<1x64xi1>
    %64 = vector.broadcast %63 : vector<1x64xi1> to vector<16x64xi1>
    %65 = vector.shape_cast %59 : vector<16x1xf32> to vector<16x1xf32>
    %66 = vector.broadcast %65 : vector<16x1xf32> to vector<16x64xf32>
    %67 = vector.shape_cast %62 : vector<16x1xf32> to vector<16x1xf32>
    %68 = vector.broadcast %67 : vector<16x1xf32> to vector<16x64xf32>
    %69 = arith.select %64, %66, %68 : vector<16x64xi1>, vector<16x64xf32>
    %cst_17 = arith.constant 3.125000e-02 : f32
    %70 = vector.broadcast %cst_17 : f32 to vector<16x64xf32>
    %71 = arith.mulf %69, %70 : vector<16x64xf32>
    %cst_18 = arith.constant 9.99999974E-6 : f32
    %72 = vector.broadcast %cst_18 : f32 to vector<16x64xf32>
    %73 = arith.addf %71, %72 : vector<16x64xf32>
    %74 = math.rsqrt %73 : vector<16x64xf32>
    %75 = arith.mulf %54, %74 : vector<16x64xf32>
    %76 = vector.broadcast %36 : vector<1x64xf32> to vector<16x64xf32>
    %77 = arith.mulf %75, %76 : vector<16x64xf32>
    %78 = vector.broadcast %37 : vector<1x64xf32> to vector<16x64xf32>
    %79 = arith.addf %77, %78 : vector<16x64xf32>
    %cst_19 = arith.constant 0.000000e+00 : f32
    %80 = vector.broadcast %cst_19 : f32 to vector<16x64xf32>
    %81 = arith.maximumf %79, %80 : vector<16x64xf32>
    %c0_20 = arith.constant 0 : index
    %c0_21 = arith.constant 0 : index
    %c0_22 = arith.constant 0 : index
    %82 = vector.load %arg4[%c0_20, %c0_21, %c0_22] : memref<4x64x256xbf16, #tpu.memory_space<vmem>>, vector<1x64x256xbf16>
    %83 = vector.shape_cast %82 : vector<1x64x256xbf16> to vector<64x256xbf16>
    %84 = arith.truncf %81 : vector<16x64xf32> to vector<16x64xbf16>
    %cst_23 = arith.constant dense<0.000000e+00> : vector<16x256xf32>
    %85 = tpu.matmul %84, %83, %cst_23 {dimension_numbers = #tpu.dot_dimension_numbers<[1], [0], [0], [1], [0, 0, 1, 1], [], []>} : vector<16x64xbf16>, vector<64x256xbf16>, vector<16x256xf32> -> vector<16x256xf32>
    %c0_24 = arith.constant 0 : index
    %c0_25 = arith.constant 0 : index
    %c0_26 = arith.constant 0 : index
    %86 = vector.load %arg15[%c0_24, %c0_25, %c0_26] : memref<4x7x256xf32, #tpu.memory_space<vmem>>, vector<1x1x256xf32>
    %87 = vector.shape_cast %86 : vector<1x1x256xf32> to vector<1x256xf32>
    %88 = vector.broadcast %87 : vector<1x256xf32> to vector<16x256xf32>
    %89 = arith.addf %85, %88 : vector<16x256xf32>
    %90 = vector.extract_strided_slice %89 {offsets = [0, 0], sizes = [16, 128], strides = [1, 1]} : vector<16x256xf32> to vector<16x128xf32>
    %91 = arith.negf %90 : vector<16x128xf32>
    %92 = math.exp %91 : vector<16x128xf32>
    %cst_27 = arith.constant 1.000000e+00 : f32
    %93 = vector.broadcast %cst_27 : f32 to vector<16x128xf32>
    %94 = arith.addf %93, %92 : vector<16x128xf32>
    %95 = arith.divf %93, %94 : vector<16x128xf32>
    %96 = arith.mulf %90, %95 : vector<16x128xf32>
    %97 = vector.extract_strided_slice %89 {offsets = [0, 128], sizes = [16, 128], strides = [1, 1]} : vector<16x256xf32> to vector<16x128xf32>
    %c0_28 = arith.constant 0 : index
    %c3 = arith.constant 3 : index
    %c0_29 = arith.constant 0 : index
    %98 = vector.load %arg5[%c0_28, %c3, %c0_29] : memref<4x4x128xf32, #tpu.memory_space<vmem>>, vector<1x1x128xf32>
    %99 = vector.shape_cast %98 : vector<1x1x128xf32> to vector<1x128xf32>
    %100 = vector.broadcast %99 : vector<1x128xf32> to vector<16x128xf32>
    %101 = arith.mulf %96, %100 : vector<16x128xf32>
    %c0_30 = arith.constant 0 : index
    %c1_31 = arith.constant 1 : index
    %c0_32 = arith.constant 0 : index
    %102 = vector.load %arg15[%c0_30, %c1_31, %c0_32] : memref<4x7x256xf32, #tpu.memory_space<vmem>>, vector<1x1x128xf32>
    %103 = vector.shape_cast %102 : vector<1x1x128xf32> to vector<1x128xf32>
    %104 = vector.broadcast %103 : vector<1x128xf32> to vector<16x128xf32>
    %105 = arith.addf %101, %104 : vector<16x128xf32>
    %c0_33 = arith.constant 0 : index
    %c2_34 = arith.constant 2 : index
    %c0_35 = arith.constant 0 : index
    %106 = vector.load %arg5[%c0_33, %c2_34, %c0_35] : memref<4x4x128xf32, #tpu.memory_space<vmem>>, vector<1x1x128xf32>
    %107 = vector.shape_cast %106 : vector<1x1x128xf32> to vector<1x128xf32>
    %c1_i32_36 = arith.constant 1 : i32
    %108 = tpu.dynamic_rotate %96 by %c1_i32_36 dim 0 : vector<16x128xf32>, i32 -> vector<16x128xf32>
    %cst_37 = arith.constant 0.000000e+00 : f32
    %109 = vector.shape_cast %20 : vector<16x1xi1> to vector<16x1xi1>
    %110 = vector.broadcast %109 : vector<16x1xi1> to vector<16x128xi1>
    %111 = vector.broadcast %cst_37 : f32 to vector<16x128xf32>
    %112 = arith.select %110, %108, %111 : vector<16x128xi1>, vector<16x128xf32>
    %113 = vector.broadcast %107 : vector<1x128xf32> to vector<16x128xf32>
    %114 = arith.mulf %112, %113 : vector<16x128xf32>
    %115 = arith.addf %105, %114 : vector<16x128xf32>
    %c0_38 = arith.constant 0 : index
    %c1_39 = arith.constant 1 : index
    %c0_40 = arith.constant 0 : index
    %116 = vector.load %arg5[%c0_38, %c1_39, %c0_40] : memref<4x4x128xf32, #tpu.memory_space<vmem>>, vector<1x1x128xf32>
    %117 = vector.shape_cast %116 : vector<1x1x128xf32> to vector<1x128xf32>
    %c2_i32_41 = arith.constant 2 : i32
    %118 = tpu.dynamic_rotate %96 by %c2_i32_41 dim 0 : vector<16x128xf32>, i32 -> vector<16x128xf32>
    %cst_42 = arith.constant 0.000000e+00 : f32
    %119 = vector.shape_cast %22 : vector<16x1xi1> to vector<16x1xi1>
    %120 = vector.broadcast %119 : vector<16x1xi1> to vector<16x128xi1>
    %121 = vector.broadcast %cst_42 : f32 to vector<16x128xf32>
    %122 = arith.select %120, %118, %121 : vector<16x128xi1>, vector<16x128xf32>
    %123 = vector.broadcast %117 : vector<1x128xf32> to vector<16x128xf32>
    %124 = arith.mulf %122, %123 : vector<16x128xf32>
    %125 = arith.addf %115, %124 : vector<16x128xf32>
    %c0_43 = arith.constant 0 : index
    %c0_44 = arith.constant 0 : index
    %c0_45 = arith.constant 0 : index
    %126 = vector.load %arg5[%c0_43, %c0_44, %c0_45] : memref<4x4x128xf32, #tpu.memory_space<vmem>>, vector<1x1x128xf32>
    %127 = vector.shape_cast %126 : vector<1x1x128xf32> to vector<1x128xf32>
    %c3_i32_46 = arith.constant 3 : i32
    %128 = tpu.dynamic_rotate %96 by %c3_i32_46 dim 0 : vector<16x128xf32>, i32 -> vector<16x128xf32>
    %cst_47 = arith.constant 0.000000e+00 : f32
    %129 = vector.shape_cast %24 : vector<16x1xi1> to vector<16x1xi1>
    %130 = vector.broadcast %129 : vector<16x1xi1> to vector<16x128xi1>
    %131 = vector.broadcast %cst_47 : f32 to vector<16x128xf32>
    %132 = arith.select %130, %128, %131 : vector<16x128xi1>, vector<16x128xf32>
    %133 = vector.broadcast %127 : vector<1x128xf32> to vector<16x128xf32>
    %134 = arith.mulf %132, %133 : vector<16x128xf32>
    %135 = arith.addf %125, %134 : vector<16x128xf32>
    %136 = arith.negf %135 : vector<16x128xf32>
    %137 = math.exp %136 : vector<16x128xf32>
    %cst_48 = arith.constant 1.000000e+00 : f32
    %138 = vector.broadcast %cst_48 : f32 to vector<16x128xf32>
    %139 = arith.addf %138, %137 : vector<16x128xf32>
    %140 = arith.divf %138, %139 : vector<16x128xf32>
    %141 = arith.mulf %135, %140 : vector<16x128xf32>
    %c0_49 = arith.constant 0 : index
    %c0_50 = arith.constant 0 : index
    %c0_51 = arith.constant 0 : index
    %142 = vector.load %arg6[%c0_49, %c0_50, %c0_51] : memref<4x128x128xbf16, #tpu.memory_space<vmem>>, vector<1x128x128xbf16>
    %143 = vector.shape_cast %142 : vector<1x128x128xbf16> to vector<128x128xbf16>
    %144 = arith.truncf %141 : vector<16x128xf32> to vector<16x128xbf16>
    %cst_52 = arith.constant dense<0.000000e+00> : vector<16x128xf32>
    %145 = tpu.matmul %144, %143, %cst_52 {dimension_numbers = #tpu.dot_dimension_numbers<[1], [0], [0], [1], [0, 0, 1, 1], [], []>} : vector<16x128xbf16>, vector<128x128xbf16>, vector<16x128xf32> -> vector<16x128xf32>
    %c0_53 = arith.constant 0 : index
    %c2_54 = arith.constant 2 : index
    %c0_55 = arith.constant 0 : index
    %146 = vector.load %arg15[%c0_53, %c2_54, %c0_55] : memref<4x7x256xf32, #tpu.memory_space<vmem>>, vector<1x1x128xf32>
    %147 = vector.shape_cast %146 : vector<1x1x128xf32> to vector<1x128xf32>
    %148 = vector.broadcast %147 : vector<1x128xf32> to vector<16x128xf32>
    %149 = arith.addf %145, %148 : vector<16x128xf32>
    %150 = math.exp %149 : vector<16x128xf32>
    %cst_56 = arith.constant 2.000000e+00 : f32
    %151 = vector.broadcast %cst_56 : f32 to vector<16x128xf32>
    %152 = arith.addf %151, %150 : vector<16x128xf32>
    %153 = tpu.reciprocal %152 {approx = true} : vector<16x128xf32> -> vector<16x128xf32>
    %cst_57 = arith.constant 0.000000e+00 : f32
    %154 = vector.shape_cast %18 : vector<16x1xi1> to vector<16x1xi1>
    %155 = vector.broadcast %154 : vector<16x1xi1> to vector<16x128xi1>
    %156 = vector.broadcast %cst_57 : f32 to vector<16x128xf32>
    %157 = arith.select %155, %156, %153 : vector<16x128xi1>, vector<16x128xf32>
    %cst_58 = arith.constant 1.000000e+00 : f32
    %158 = vector.broadcast %cst_58 : f32 to vector<16x128xf32>
    %159 = arith.subf %158, %157 : vector<16x128xf32>
    %160 = arith.mulf %159, %141 : vector<16x128xf32>
    %c1_i32_59 = arith.constant 1 : i32
    %161 = tpu.dynamic_rotate %160 by %c1_i32_59 dim 0 : vector<16x128xf32>, i32 -> vector<16x128xf32>
    %162 = arith.mulf %157, %161 : vector<16x128xf32>
    %163 = arith.addf %160, %162 : vector<16x128xf32>
    %c1_i32_60 = arith.constant 1 : i32
    %164 = tpu.dynamic_rotate %157 by %c1_i32_60 dim 0 : vector<16x128xf32>, i32 -> vector<16x128xf32>
    %165 = arith.mulf %157, %164 : vector<16x128xf32>
    %c2_i32_61 = arith.constant 2 : i32
    %166 = tpu.dynamic_rotate %163 by %c2_i32_61 dim 0 : vector<16x128xf32>, i32 -> vector<16x128xf32>
    %167 = arith.mulf %165, %166 : vector<16x128xf32>
    %168 = arith.addf %163, %167 : vector<16x128xf32>
    %c2_i32_62 = arith.constant 2 : i32
    %169 = tpu.dynamic_rotate %165 by %c2_i32_62 dim 0 : vector<16x128xf32>, i32 -> vector<16x128xf32>
    %170 = arith.mulf %165, %169 : vector<16x128xf32>
    %c4_i32 = arith.constant 4 : i32
    %171 = tpu.dynamic_rotate %168 by %c4_i32 dim 0 : vector<16x128xf32>, i32 -> vector<16x128xf32>
    %172 = arith.mulf %170, %171 : vector<16x128xf32>
    %173 = arith.addf %168, %172 : vector<16x128xf32>
    %c0_63 = arith.constant 0 : index
    %c3_64 = arith.constant 3 : index
    %c0_65 = arith.constant 0 : index
    %174 = vector.load %arg15[%c0_63, %c3_64, %c0_65] : memref<4x7x256xf32, #tpu.memory_space<vmem>>, vector<1x1x128xf32>
    %175 = vector.shape_cast %174 : vector<1x1x128xf32> to vector<1x128xf32>
    %176 = vector.broadcast %175 : vector<1x128xf32> to vector<16x128xf32>
    %177 = arith.mulf %141, %176 : vector<16x128xf32>
    %178 = arith.addf %173, %177 : vector<16x128xf32>
    %179 = arith.negf %97 : vector<16x128xf32>
    %180 = math.exp %179 : vector<16x128xf32>
    %cst_66 = arith.constant 1.000000e+00 : f32
    %181 = vector.broadcast %cst_66 : f32 to vector<16x128xf32>
    %182 = arith.addf %181, %180 : vector<16x128xf32>
    %183 = arith.divf %181, %182 : vector<16x128xf32>
    %184 = arith.mulf %97, %183 : vector<16x128xf32>
    %185 = arith.mulf %178, %184 : vector<16x128xf32>
    %c0_67 = arith.constant 0 : index
    %c0_68 = arith.constant 0 : index
    %c0_69 = arith.constant 0 : index
    %186 = vector.load %arg7[%c0_67, %c0_68, %c0_69] : memref<4x128x64xbf16, #tpu.memory_space<vmem>>, vector<1x128x64xbf16>
    %187 = vector.shape_cast %186 : vector<1x128x64xbf16> to vector<128x64xbf16>
    %188 = arith.truncf %185 : vector<16x128xf32> to vector<16x128xbf16>
    %cst_70 = arith.constant dense<0.000000e+00> : vector<16x64xf32>
    %189 = tpu.matmul %188, %187, %cst_70 {dimension_numbers = #tpu.dot_dimension_numbers<[1], [0], [0], [1], [0, 0, 1, 1], [], []>} : vector<16x128xbf16>, vector<128x64xbf16>, vector<16x64xf32> -> vector<16x64xf32>
    %c0_71 = arith.constant 0 : index
    %c4 = arith.constant 4 : index
    %c0_72 = arith.constant 0 : index
    %190 = vector.load %arg15[%c0_71, %c4, %c0_72] : memref<4x7x256xf32, #tpu.memory_space<vmem>>, vector<1x1x64xf32>
    %191 = vector.shape_cast %190 : vector<1x1x64xf32> to vector<1x64xf32>
    %192 = vector.broadcast %191 : vector<1x64xf32> to vector<16x64xf32>
    %193 = arith.addf %189, %192 : vector<16x64xf32>
    %194 = arith.addf %193, %81 : vector<16x64xf32>
    %c0_73 = arith.constant 0 : index
    %c5 = arith.constant 5 : index
    %c0_74 = arith.constant 0 : index
    %195 = vector.load %arg15[%c0_73, %c5, %c0_74] : memref<4x7x256xf32, #tpu.memory_space<vmem>>, vector<1x1x64xf32>
    %196 = vector.shape_cast %195 : vector<1x1x64xf32> to vector<1x64xf32>
    %c0_75 = arith.constant 0 : index
    %c6 = arith.constant 6 : index
    %c0_76 = arith.constant 0 : index
    %197 = vector.load %arg15[%c0_75, %c6, %c0_76] : memref<4x7x256xf32, #tpu.memory_space<vmem>>, vector<1x1x64xf32>
    %198 = vector.shape_cast %197 : vector<1x1x64xf32> to vector<1x64xf32>
    %199 = vector.broadcast %29 : vector<1x64xf32> to vector<16x64xf32>
    %200 = arith.mulf %194, %199 : vector<16x64xf32>
    %cst_77 = arith.constant dense<0.000000e+00> : vector<16xf32>
    %201 = vector.multi_reduction <add>, %200, %cst_77 [1] : vector<16x64xf32> to vector<16xf32>
    %202 = vector.shape_cast %201 : vector<16xf32> to vector<16x1xf32>
    %cst_78 = arith.constant dense<0.000000e+00> : vector<16xf32>
    %203 = vector.multi_reduction <add>, %194, %cst_78 [1] : vector<16x64xf32> to vector<16xf32>
    %204 = vector.shape_cast %203 : vector<16xf32> to vector<16x1xf32>
    %205 = arith.subf %204, %202 : vector<16x1xf32>
    %206 = vector.shape_cast %27 : vector<1x64xi1> to vector<1x64xi1>
    %207 = vector.broadcast %206 : vector<1x64xi1> to vector<16x64xi1>
    %208 = vector.shape_cast %202 : vector<16x1xf32> to vector<16x1xf32>
    %209 = vector.broadcast %208 : vector<16x1xf32> to vector<16x64xf32>
    %210 = vector.shape_cast %205 : vector<16x1xf32> to vector<16x1xf32>
    %211 = vector.broadcast %210 : vector<16x1xf32> to vector<16x64xf32>
    %212 = arith.select %207, %209, %211 : vector<16x64xi1>, vector<16x64xf32>
    %cst_79 = arith.constant 3.125000e-02 : f32
    %213 = vector.broadcast %cst_79 : f32 to vector<16x64xf32>
    %214 = arith.mulf %212, %213 : vector<16x64xf32>
    %215 = arith.subf %194, %214 : vector<16x64xf32>
    %216 = arith.mulf %215, %215 : vector<16x64xf32>
    %217 = vector.broadcast %29 : vector<1x64xf32> to vector<16x64xf32>
    %218 = arith.mulf %216, %217 : vector<16x64xf32>
    %cst_80 = arith.constant dense<0.000000e+00> : vector<16xf32>
    %219 = vector.multi_reduction <add>, %218, %cst_80 [1] : vector<16x64xf32> to vector<16xf32>
    %220 = vector.shape_cast %219 : vector<16xf32> to vector<16x1xf32>
    %cst_81 = arith.constant dense<0.000000e+00> : vector<16xf32>
    %221 = vector.multi_reduction <add>, %216, %cst_81 [1] : vector<16x64xf32> to vector<16xf32>
    %222 = vector.shape_cast %221 : vector<16xf32> to vector<16x1xf32>
    %223 = arith.subf %222, %220 : vector<16x1xf32>
    %224 = vector.shape_cast %27 : vector<1x64xi1> to vector<1x64xi1>
    %225 = vector.broadcast %224 : vector<1x64xi1> to vector<16x64xi1>
    %226 = vector.shape_cast %220 : vector<16x1xf32> to vector<16x1xf32>
    %227 = vector.broadcast %226 : vector<16x1xf32> to vector<16x64xf32>
    %228 = vector.shape_cast %223 : vector<16x1xf32> to vector<16x1xf32>
    %229 = vector.broadcast %228 : vector<16x1xf32> to vector<16x64xf32>
    %230 = arith.select %225, %227, %229 : vector<16x64xi1>, vector<16x64xf32>
    %cst_82 = arith.constant 3.125000e-02 : f32
    %231 = vector.broadcast %cst_82 : f32 to vector<16x64xf32>
    %232 = arith.mulf %230, %231 : vector<16x64xf32>
    %cst_83 = arith.constant 9.99999974E-6 : f32
    %233 = vector.broadcast %cst_83 : f32 to vector<16x64xf32>
    %234 = arith.addf %232, %233 : vector<16x64xf32>
    %235 = math.rsqrt %234 : vector<16x64xf32>
    %236 = arith.mulf %215, %235 : vector<16x64xf32>
    %237 = vector.broadcast %196 : vector<1x64xf32> to vector<16x64xf32>
    %238 = arith.mulf %236, %237 : vector<16x64xf32>
    %239 = vector.broadcast %198 : vector<1x64xf32> to vector<16x64xf32>
    %240 = arith.addf %238, %239 : vector<16x64xf32>
    %c1_84 = arith.constant 1 : index
    %c0_85 = arith.constant 0 : index
    %c0_86 = arith.constant 0 : index
    %241 = vector.load %arg4[%c1_84, %c0_85, %c0_86] : memref<4x64x256xbf16, #tpu.memory_space<vmem>>, vector<1x64x256xbf16>
    %242 = vector.shape_cast %241 : vector<1x64x256xbf16> to vector<64x256xbf16>
    %243 = arith.truncf %240 : vector<16x64xf32> to vector<16x64xbf16>
    %cst_87 = arith.constant dense<0.000000e+00> : vector<16x256xf32>
    %244 = tpu.matmul %243, %242, %cst_87 {dimension_numbers = #tpu.dot_dimension_numbers<[1], [0], [0], [1], [0, 0, 1, 1], [], []>} : vector<16x64xbf16>, vector<64x256xbf16>, vector<16x256xf32> -> vector<16x256xf32>
    %c1_88 = arith.constant 1 : index
    %c0_89 = arith.constant 0 : index
    %c0_90 = arith.constant 0 : index
    %245 = vector.load %arg15[%c1_88, %c0_89, %c0_90] : memref<4x7x256xf32, #tpu.memory_space<vmem>>, vector<1x1x256xf32>
    %246 = vector.shape_cast %245 : vector<1x1x256xf32> to vector<1x256xf32>
    %247 = vector.broadcast %246 : vector<1x256xf32> to vector<16x256xf32>
    %248 = arith.addf %244, %247 : vector<16x256xf32>
    %249 = vector.extract_strided_slice %248 {offsets = [0, 0], sizes = [16, 128], strides = [1, 1]} : vector<16x256xf32> to vector<16x128xf32>
    %250 = arith.negf %249 : vector<16x128xf32>
    %251 = math.exp %250 : vector<16x128xf32>
    %cst_91 = arith.constant 1.000000e+00 : f32
    %252 = vector.broadcast %cst_91 : f32 to vector<16x128xf32>
    %253 = arith.addf %252, %251 : vector<16x128xf32>
    %254 = arith.divf %252, %253 : vector<16x128xf32>
    %255 = arith.mulf %249, %254 : vector<16x128xf32>
    %256 = vector.extract_strided_slice %248 {offsets = [0, 128], sizes = [16, 128], strides = [1, 1]} : vector<16x256xf32> to vector<16x128xf32>
    %c1_92 = arith.constant 1 : index
    %c3_93 = arith.constant 3 : index
    %c0_94 = arith.constant 0 : index
    %257 = vector.load %arg5[%c1_92, %c3_93, %c0_94] : memref<4x4x128xf32, #tpu.memory_space<vmem>>, vector<1x1x128xf32>
    %258 = vector.shape_cast %257 : vector<1x1x128xf32> to vector<1x128xf32>
    %259 = vector.broadcast %258 : vector<1x128xf32> to vector<16x128xf32>
    %260 = arith.mulf %255, %259 : vector<16x128xf32>
    %c1_95 = arith.constant 1 : index
    %c1_96 = arith.constant 1 : index
    %c0_97 = arith.constant 0 : index
    %261 = vector.load %arg15[%c1_95, %c1_96, %c0_97] : memref<4x7x256xf32, #tpu.memory_space<vmem>>, vector<1x1x128xf32>
    %262 = vector.shape_cast %261 : vector<1x1x128xf32> to vector<1x128xf32>
    %263 = vector.broadcast %262 : vector<1x128xf32> to vector<16x128xf32>
    %264 = arith.addf %260, %263 : vector<16x128xf32>
    %c1_98 = arith.constant 1 : index
    %c2_99 = arith.constant 2 : index
    %c0_100 = arith.constant 0 : index
    %265 = vector.load %arg5[%c1_98, %c2_99, %c0_100] : memref<4x4x128xf32, #tpu.memory_space<vmem>>, vector<1x1x128xf32>
    %266 = vector.shape_cast %265 : vector<1x1x128xf32> to vector<1x128xf32>
    %c1_i32_101 = arith.constant 1 : i32
    %267 = tpu.dynamic_rotate %255 by %c1_i32_101 dim 0 : vector<16x128xf32>, i32 -> vector<16x128xf32>
    %cst_102 = arith.constant 0.000000e+00 : f32
    %268 = vector.shape_cast %20 : vector<16x1xi1> to vector<16x1xi1>
    %269 = vector.broadcast %268 : vector<16x1xi1> to vector<16x128xi1>
    %270 = vector.broadcast %cst_102 : f32 to vector<16x128xf32>
    %271 = arith.select %269, %267, %270 : vector<16x128xi1>, vector<16x128xf32>
    %272 = vector.broadcast %266 : vector<1x128xf32> to vector<16x128xf32>
    %273 = arith.mulf %271, %272 : vector<16x128xf32>
    %274 = arith.addf %264, %273 : vector<16x128xf32>
    %c1_103 = arith.constant 1 : index
    %c1_104 = arith.constant 1 : index
    %c0_105 = arith.constant 0 : index
    %275 = vector.load %arg5[%c1_103, %c1_104, %c0_105] : memref<4x4x128xf32, #tpu.memory_space<vmem>>, vector<1x1x128xf32>
    %276 = vector.shape_cast %275 : vector<1x1x128xf32> to vector<1x128xf32>
    %c2_i32_106 = arith.constant 2 : i32
    %277 = tpu.dynamic_rotate %255 by %c2_i32_106 dim 0 : vector<16x128xf32>, i32 -> vector<16x128xf32>
    %cst_107 = arith.constant 0.000000e+00 : f32
    %278 = vector.shape_cast %22 : vector<16x1xi1> to vector<16x1xi1>
    %279 = vector.broadcast %278 : vector<16x1xi1> to vector<16x128xi1>
    %280 = vector.broadcast %cst_107 : f32 to vector<16x128xf32>
    %281 = arith.select %279, %277, %280 : vector<16x128xi1>, vector<16x128xf32>
    %282 = vector.broadcast %276 : vector<1x128xf32> to vector<16x128xf32>
    %283 = arith.mulf %281, %282 : vector<16x128xf32>
    %284 = arith.addf %274, %283 : vector<16x128xf32>
    %c1_108 = arith.constant 1 : index
    %c0_109 = arith.constant 0 : index
    %c0_110 = arith.constant 0 : index
    %285 = vector.load %arg5[%c1_108, %c0_109, %c0_110] : memref<4x4x128xf32, #tpu.memory_space<vmem>>, vector<1x1x128xf32>
    %286 = vector.shape_cast %285 : vector<1x1x128xf32> to vector<1x128xf32>
    %c3_i32_111 = arith.constant 3 : i32
    %287 = tpu.dynamic_rotate %255 by %c3_i32_111 dim 0 : vector<16x128xf32>, i32 -> vector<16x128xf32>
    %cst_112 = arith.constant 0.000000e+00 : f32
    %288 = vector.shape_cast %24 : vector<16x1xi1> to vector<16x1xi1>
    %289 = vector.broadcast %288 : vector<16x1xi1> to vector<16x128xi1>
    %290 = vector.broadcast %cst_112 : f32 to vector<16x128xf32>
    %291 = arith.select %289, %287, %290 : vector<16x128xi1>, vector<16x128xf32>
    %292 = vector.broadcast %286 : vector<1x128xf32> to vector<16x128xf32>
    %293 = arith.mulf %291, %292 : vector<16x128xf32>
    %294 = arith.addf %284, %293 : vector<16x128xf32>
    %295 = arith.negf %294 : vector<16x128xf32>
    %296 = math.exp %295 : vector<16x128xf32>
    %cst_113 = arith.constant 1.000000e+00 : f32
    %297 = vector.broadcast %cst_113 : f32 to vector<16x128xf32>
    %298 = arith.addf %297, %296 : vector<16x128xf32>
    %299 = arith.divf %297, %298 : vector<16x128xf32>
    %300 = arith.mulf %294, %299 : vector<16x128xf32>
    %c1_114 = arith.constant 1 : index
    %c0_115 = arith.constant 0 : index
    %c0_116 = arith.constant 0 : index
    %301 = vector.load %arg6[%c1_114, %c0_115, %c0_116] : memref<4x128x128xbf16, #tpu.memory_space<vmem>>, vector<1x128x128xbf16>
    %302 = vector.shape_cast %301 : vector<1x128x128xbf16> to vector<128x128xbf16>
    %303 = arith.truncf %300 : vector<16x128xf32> to vector<16x128xbf16>
    %cst_117 = arith.constant dense<0.000000e+00> : vector<16x128xf32>
    %304 = tpu.matmul %303, %302, %cst_117 {dimension_numbers = #tpu.dot_dimension_numbers<[1], [0], [0], [1], [0, 0, 1, 1], [], []>} : vector<16x128xbf16>, vector<128x128xbf16>, vector<16x128xf32> -> vector<16x128xf32>
    %c1_118 = arith.constant 1 : index
    %c2_119 = arith.constant 2 : index
    %c0_120 = arith.constant 0 : index
    %305 = vector.load %arg15[%c1_118, %c2_119, %c0_120] : memref<4x7x256xf32, #tpu.memory_space<vmem>>, vector<1x1x128xf32>
    %306 = vector.shape_cast %305 : vector<1x1x128xf32> to vector<1x128xf32>
    %307 = vector.broadcast %306 : vector<1x128xf32> to vector<16x128xf32>
    %308 = arith.addf %304, %307 : vector<16x128xf32>
    %309 = math.exp %308 : vector<16x128xf32>
    %cst_121 = arith.constant 2.000000e+00 : f32
    %310 = vector.broadcast %cst_121 : f32 to vector<16x128xf32>
    %311 = arith.addf %310, %309 : vector<16x128xf32>
    %312 = tpu.reciprocal %311 {approx = true} : vector<16x128xf32> -> vector<16x128xf32>
    %cst_122 = arith.constant 0.000000e+00 : f32
    %313 = vector.shape_cast %18 : vector<16x1xi1> to vector<16x1xi1>
    %314 = vector.broadcast %313 : vector<16x1xi1> to vector<16x128xi1>
    %315 = vector.broadcast %cst_122 : f32 to vector<16x128xf32>
    %316 = arith.select %314, %315, %312 : vector<16x128xi1>, vector<16x128xf32>
    %cst_123 = arith.constant 1.000000e+00 : f32
    %317 = vector.broadcast %cst_123 : f32 to vector<16x128xf32>
    %318 = arith.subf %317, %316 : vector<16x128xf32>
    %319 = arith.mulf %318, %300 : vector<16x128xf32>
    %c1_i32_124 = arith.constant 1 : i32
    %320 = tpu.dynamic_rotate %319 by %c1_i32_124 dim 0 : vector<16x128xf32>, i32 -> vector<16x128xf32>
    %321 = arith.mulf %316, %320 : vector<16x128xf32>
    %322 = arith.addf %319, %321 : vector<16x128xf32>
    %c1_i32_125 = arith.constant 1 : i32
    %323 = tpu.dynamic_rotate %316 by %c1_i32_125 dim 0 : vector<16x128xf32>, i32 -> vector<16x128xf32>
    %324 = arith.mulf %316, %323 : vector<16x128xf32>
    %c2_i32_126 = arith.constant 2 : i32
    %325 = tpu.dynamic_rotate %322 by %c2_i32_126 dim 0 : vector<16x128xf32>, i32 -> vector<16x128xf32>
    %326 = arith.mulf %324, %325 : vector<16x128xf32>
    %327 = arith.addf %322, %326 : vector<16x128xf32>
    %c2_i32_127 = arith.constant 2 : i32
    %328 = tpu.dynamic_rotate %324 by %c2_i32_127 dim 0 : vector<16x128xf32>, i32 -> vector<16x128xf32>
    %329 = arith.mulf %324, %328 : vector<16x128xf32>
    %c4_i32_128 = arith.constant 4 : i32
    %330 = tpu.dynamic_rotate %327 by %c4_i32_128 dim 0 : vector<16x128xf32>, i32 -> vector<16x128xf32>
    %331 = arith.mulf %329, %330 : vector<16x128xf32>
    %332 = arith.addf %327, %331 : vector<16x128xf32>
    %c1_129 = arith.constant 1 : index
    %c3_130 = arith.constant 3 : index
    %c0_131 = arith.constant 0 : index
    %333 = vector.load %arg15[%c1_129, %c3_130, %c0_131] : memref<4x7x256xf32, #tpu.memory_space<vmem>>, vector<1x1x128xf32>
    %334 = vector.shape_cast %333 : vector<1x1x128xf32> to vector<1x128xf32>
    %335 = vector.broadcast %334 : vector<1x128xf32> to vector<16x128xf32>
    %336 = arith.mulf %300, %335 : vector<16x128xf32>
    %337 = arith.addf %332, %336 : vector<16x128xf32>
    %338 = arith.negf %256 : vector<16x128xf32>
    %339 = math.exp %338 : vector<16x128xf32>
    %cst_132 = arith.constant 1.000000e+00 : f32
    %340 = vector.broadcast %cst_132 : f32 to vector<16x128xf32>
    %341 = arith.addf %340, %339 : vector<16x128xf32>
    %342 = arith.divf %340, %341 : vector<16x128xf32>
    %343 = arith.mulf %256, %342 : vector<16x128xf32>
    %344 = arith.mulf %337, %343 : vector<16x128xf32>
    %c1_133 = arith.constant 1 : index
    %c0_134 = arith.constant 0 : index
    %c0_135 = arith.constant 0 : index
    %345 = vector.load %arg7[%c1_133, %c0_134, %c0_135] : memref<4x128x64xbf16, #tpu.memory_space<vmem>>, vector<1x128x64xbf16>
    %346 = vector.shape_cast %345 : vector<1x128x64xbf16> to vector<128x64xbf16>
    %347 = arith.truncf %344 : vector<16x128xf32> to vector<16x128xbf16>
    %cst_136 = arith.constant dense<0.000000e+00> : vector<16x64xf32>
    %348 = tpu.matmul %347, %346, %cst_136 {dimension_numbers = #tpu.dot_dimension_numbers<[1], [0], [0], [1], [0, 0, 1, 1], [], []>} : vector<16x128xbf16>, vector<128x64xbf16>, vector<16x64xf32> -> vector<16x64xf32>
    %c1_137 = arith.constant 1 : index
    %c4_138 = arith.constant 4 : index
    %c0_139 = arith.constant 0 : index
    %349 = vector.load %arg15[%c1_137, %c4_138, %c0_139] : memref<4x7x256xf32, #tpu.memory_space<vmem>>, vector<1x1x64xf32>
    %350 = vector.shape_cast %349 : vector<1x1x64xf32> to vector<1x64xf32>
    %351 = vector.broadcast %350 : vector<1x64xf32> to vector<16x64xf32>
    %352 = arith.addf %348, %351 : vector<16x64xf32>
    %353 = arith.addf %352, %240 : vector<16x64xf32>
    %c1_140 = arith.constant 1 : index
    %c5_141 = arith.constant 5 : index
    %c0_142 = arith.constant 0 : index
    %354 = vector.load %arg15[%c1_140, %c5_141, %c0_142] : memref<4x7x256xf32, #tpu.memory_space<vmem>>, vector<1x1x64xf32>
    %355 = vector.shape_cast %354 : vector<1x1x64xf32> to vector<1x64xf32>
    %c1_143 = arith.constant 1 : index
    %c6_144 = arith.constant 6 : index
    %c0_145 = arith.constant 0 : index
    %356 = vector.load %arg15[%c1_143, %c6_144, %c0_145] : memref<4x7x256xf32, #tpu.memory_space<vmem>>, vector<1x1x64xf32>
    %357 = vector.shape_cast %356 : vector<1x1x64xf32> to vector<1x64xf32>
    %358 = vector.broadcast %29 : vector<1x64xf32> to vector<16x64xf32>
    %359 = arith.mulf %353, %358 : vector<16x64xf32>
    %cst_146 = arith.constant dense<0.000000e+00> : vector<16xf32>
    %360 = vector.multi_reduction <add>, %359, %cst_146 [1] : vector<16x64xf32> to vector<16xf32>
    %361 = vector.shape_cast %360 : vector<16xf32> to vector<16x1xf32>
    %cst_147 = arith.constant dense<0.000000e+00> : vector<16xf32>
    %362 = vector.multi_reduction <add>, %353, %cst_147 [1] : vector<16x64xf32> to vector<16xf32>
    %363 = vector.shape_cast %362 : vector<16xf32> to vector<16x1xf32>
    %364 = arith.subf %363, %361 : vector<16x1xf32>
    %365 = vector.shape_cast %27 : vector<1x64xi1> to vector<1x64xi1>
    %366 = vector.broadcast %365 : vector<1x64xi1> to vector<16x64xi1>
    %367 = vector.shape_cast %361 : vector<16x1xf32> to vector<16x1xf32>
    %368 = vector.broadcast %367 : vector<16x1xf32> to vector<16x64xf32>
    %369 = vector.shape_cast %364 : vector<16x1xf32> to vector<16x1xf32>
    %370 = vector.broadcast %369 : vector<16x1xf32> to vector<16x64xf32>
    %371 = arith.select %366, %368, %370 : vector<16x64xi1>, vector<16x64xf32>
    %cst_148 = arith.constant 3.125000e-02 : f32
    %372 = vector.broadcast %cst_148 : f32 to vector<16x64xf32>
    %373 = arith.mulf %371, %372 : vector<16x64xf32>
    %374 = arith.subf %353, %373 : vector<16x64xf32>
    %375 = arith.mulf %374, %374 : vector<16x64xf32>
    %376 = vector.broadcast %29 : vector<1x64xf32> to vector<16x64xf32>
    %377 = arith.mulf %375, %376 : vector<16x64xf32>
    %cst_149 = arith.constant dense<0.000000e+00> : vector<16xf32>
    %378 = vector.multi_reduction <add>, %377, %cst_149 [1] : vector<16x64xf32> to vector<16xf32>
    %379 = vector.shape_cast %378 : vector<16xf32> to vector<16x1xf32>
    %cst_150 = arith.constant dense<0.000000e+00> : vector<16xf32>
    %380 = vector.multi_reduction <add>, %375, %cst_150 [1] : vector<16x64xf32> to vector<16xf32>
    %381 = vector.shape_cast %380 : vector<16xf32> to vector<16x1xf32>
    %382 = arith.subf %381, %379 : vector<16x1xf32>
    %383 = vector.shape_cast %27 : vector<1x64xi1> to vector<1x64xi1>
    %384 = vector.broadcast %383 : vector<1x64xi1> to vector<16x64xi1>
    %385 = vector.shape_cast %379 : vector<16x1xf32> to vector<16x1xf32>
    %386 = vector.broadcast %385 : vector<16x1xf32> to vector<16x64xf32>
    %387 = vector.shape_cast %382 : vector<16x1xf32> to vector<16x1xf32>
    %388 = vector.broadcast %387 : vector<16x1xf32> to vector<16x64xf32>
    %389 = arith.select %384, %386, %388 : vector<16x64xi1>, vector<16x64xf32>
    %cst_151 = arith.constant 3.125000e-02 : f32
    %390 = vector.broadcast %cst_151 : f32 to vector<16x64xf32>
    %391 = arith.mulf %389, %390 : vector<16x64xf32>
    %cst_152 = arith.constant 9.99999974E-6 : f32
    %392 = vector.broadcast %cst_152 : f32 to vector<16x64xf32>
    %393 = arith.addf %391, %392 : vector<16x64xf32>
    %394 = math.rsqrt %393 : vector<16x64xf32>
    %395 = arith.mulf %374, %394 : vector<16x64xf32>
    %396 = vector.broadcast %355 : vector<1x64xf32> to vector<16x64xf32>
    %397 = arith.mulf %395, %396 : vector<16x64xf32>
    %398 = vector.broadcast %357 : vector<1x64xf32> to vector<16x64xf32>
    %399 = arith.addf %397, %398 : vector<16x64xf32>
    %c2_153 = arith.constant 2 : index
    %c0_154 = arith.constant 0 : index
    %c0_155 = arith.constant 0 : index
    %400 = vector.load %arg4[%c2_153, %c0_154, %c0_155] : memref<4x64x256xbf16, #tpu.memory_space<vmem>>, vector<1x64x256xbf16>
    %401 = vector.shape_cast %400 : vector<1x64x256xbf16> to vector<64x256xbf16>
    %402 = arith.truncf %399 : vector<16x64xf32> to vector<16x64xbf16>
    %cst_156 = arith.constant dense<0.000000e+00> : vector<16x256xf32>
    %403 = tpu.matmul %402, %401, %cst_156 {dimension_numbers = #tpu.dot_dimension_numbers<[1], [0], [0], [1], [0, 0, 1, 1], [], []>} : vector<16x64xbf16>, vector<64x256xbf16>, vector<16x256xf32> -> vector<16x256xf32>
    %c2_157 = arith.constant 2 : index
    %c0_158 = arith.constant 0 : index
    %c0_159 = arith.constant 0 : index
    %404 = vector.load %arg15[%c2_157, %c0_158, %c0_159] : memref<4x7x256xf32, #tpu.memory_space<vmem>>, vector<1x1x256xf32>
    %405 = vector.shape_cast %404 : vector<1x1x256xf32> to vector<1x256xf32>
    %406 = vector.broadcast %405 : vector<1x256xf32> to vector<16x256xf32>
    %407 = arith.addf %403, %406 : vector<16x256xf32>
    %408 = vector.extract_strided_slice %407 {offsets = [0, 0], sizes = [16, 128], strides = [1, 1]} : vector<16x256xf32> to vector<16x128xf32>
    %409 = arith.negf %408 : vector<16x128xf32>
    %410 = math.exp %409 : vector<16x128xf32>
    %cst_160 = arith.constant 1.000000e+00 : f32
    %411 = vector.broadcast %cst_160 : f32 to vector<16x128xf32>
    %412 = arith.addf %411, %410 : vector<16x128xf32>
    %413 = arith.divf %411, %412 : vector<16x128xf32>
    %414 = arith.mulf %408, %413 : vector<16x128xf32>
    %415 = vector.extract_strided_slice %407 {offsets = [0, 128], sizes = [16, 128], strides = [1, 1]} : vector<16x256xf32> to vector<16x128xf32>
    %c2_161 = arith.constant 2 : index
    %c3_162 = arith.constant 3 : index
    %c0_163 = arith.constant 0 : index
    %416 = vector.load %arg5[%c2_161, %c3_162, %c0_163] : memref<4x4x128xf32, #tpu.memory_space<vmem>>, vector<1x1x128xf32>
    %417 = vector.shape_cast %416 : vector<1x1x128xf32> to vector<1x128xf32>
    %418 = vector.broadcast %417 : vector<1x128xf32> to vector<16x128xf32>
    %419 = arith.mulf %414, %418 : vector<16x128xf32>
    %c2_164 = arith.constant 2 : index
    %c1_165 = arith.constant 1 : index
    %c0_166 = arith.constant 0 : index
    %420 = vector.load %arg15[%c2_164, %c1_165, %c0_166] : memref<4x7x256xf32, #tpu.memory_space<vmem>>, vector<1x1x128xf32>
    %421 = vector.shape_cast %420 : vector<1x1x128xf32> to vector<1x128xf32>
    %422 = vector.broadcast %421 : vector<1x128xf32> to vector<16x128xf32>
    %423 = arith.addf %419, %422 : vector<16x128xf32>
    %c2_167 = arith.constant 2 : index
    %c2_168 = arith.constant 2 : index
    %c0_169 = arith.constant 0 : index
    %424 = vector.load %arg5[%c2_167, %c2_168, %c0_169] : memref<4x4x128xf32, #tpu.memory_space<vmem>>, vector<1x1x128xf32>
    %425 = vector.shape_cast %424 : vector<1x1x128xf32> to vector<1x128xf32>
    %c1_i32_170 = arith.constant 1 : i32
    %426 = tpu.dynamic_rotate %414 by %c1_i32_170 dim 0 : vector<16x128xf32>, i32 -> vector<16x128xf32>
    %cst_171 = arith.constant 0.000000e+00 : f32
    %427 = vector.shape_cast %20 : vector<16x1xi1> to vector<16x1xi1>
    %428 = vector.broadcast %427 : vector<16x1xi1> to vector<16x128xi1>
    %429 = vector.broadcast %cst_171 : f32 to vector<16x128xf32>
    %430 = arith.select %428, %426, %429 : vector<16x128xi1>, vector<16x128xf32>
    %431 = vector.broadcast %425 : vector<1x128xf32> to vector<16x128xf32>
    %432 = arith.mulf %430, %431 : vector<16x128xf32>
    %433 = arith.addf %423, %432 : vector<16x128xf32>
    %c2_172 = arith.constant 2 : index
    %c1_173 = arith.constant 1 : index
    %c0_174 = arith.constant 0 : index
    %434 = vector.load %arg5[%c2_172, %c1_173, %c0_174] : memref<4x4x128xf32, #tpu.memory_space<vmem>>, vector<1x1x128xf32>
    %435 = vector.shape_cast %434 : vector<1x1x128xf32> to vector<1x128xf32>
    %c2_i32_175 = arith.constant 2 : i32
    %436 = tpu.dynamic_rotate %414 by %c2_i32_175 dim 0 : vector<16x128xf32>, i32 -> vector<16x128xf32>
    %cst_176 = arith.constant 0.000000e+00 : f32
    %437 = vector.shape_cast %22 : vector<16x1xi1> to vector<16x1xi1>
    %438 = vector.broadcast %437 : vector<16x1xi1> to vector<16x128xi1>
    %439 = vector.broadcast %cst_176 : f32 to vector<16x128xf32>
    %440 = arith.select %438, %436, %439 : vector<16x128xi1>, vector<16x128xf32>
    %441 = vector.broadcast %435 : vector<1x128xf32> to vector<16x128xf32>
    %442 = arith.mulf %440, %441 : vector<16x128xf32>
    %443 = arith.addf %433, %442 : vector<16x128xf32>
    %c2_177 = arith.constant 2 : index
    %c0_178 = arith.constant 0 : index
    %c0_179 = arith.constant 0 : index
    %444 = vector.load %arg5[%c2_177, %c0_178, %c0_179] : memref<4x4x128xf32, #tpu.memory_space<vmem>>, vector<1x1x128xf32>
    %445 = vector.shape_cast %444 : vector<1x1x128xf32> to vector<1x128xf32>
    %c3_i32_180 = arith.constant 3 : i32
    %446 = tpu.dynamic_rotate %414 by %c3_i32_180 dim 0 : vector<16x128xf32>, i32 -> vector<16x128xf32>
    %cst_181 = arith.constant 0.000000e+00 : f32
    %447 = vector.shape_cast %24 : vector<16x1xi1> to vector<16x1xi1>
    %448 = vector.broadcast %447 : vector<16x1xi1> to vector<16x128xi1>
    %449 = vector.broadcast %cst_181 : f32 to vector<16x128xf32>
    %450 = arith.select %448, %446, %449 : vector<16x128xi1>, vector<16x128xf32>
    %451 = vector.broadcast %445 : vector<1x128xf32> to vector<16x128xf32>
    %452 = arith.mulf %450, %451 : vector<16x128xf32>
    %453 = arith.addf %443, %452 : vector<16x128xf32>
    %454 = arith.negf %453 : vector<16x128xf32>
    %455 = math.exp %454 : vector<16x128xf32>
    %cst_182 = arith.constant 1.000000e+00 : f32
    %456 = vector.broadcast %cst_182 : f32 to vector<16x128xf32>
    %457 = arith.addf %456, %455 : vector<16x128xf32>
    %458 = arith.divf %456, %457 : vector<16x128xf32>
    %459 = arith.mulf %453, %458 : vector<16x128xf32>
    %c2_183 = arith.constant 2 : index
    %c0_184 = arith.constant 0 : index
    %c0_185 = arith.constant 0 : index
    %460 = vector.load %arg6[%c2_183, %c0_184, %c0_185] : memref<4x128x128xbf16, #tpu.memory_space<vmem>>, vector<1x128x128xbf16>
    %461 = vector.shape_cast %460 : vector<1x128x128xbf16> to vector<128x128xbf16>
    %462 = arith.truncf %459 : vector<16x128xf32> to vector<16x128xbf16>
    %cst_186 = arith.constant dense<0.000000e+00> : vector<16x128xf32>
    %463 = tpu.matmul %462, %461, %cst_186 {dimension_numbers = #tpu.dot_dimension_numbers<[1], [0], [0], [1], [0, 0, 1, 1], [], []>} : vector<16x128xbf16>, vector<128x128xbf16>, vector<16x128xf32> -> vector<16x128xf32>
    %c2_187 = arith.constant 2 : index
    %c2_188 = arith.constant 2 : index
    %c0_189 = arith.constant 0 : index
    %464 = vector.load %arg15[%c2_187, %c2_188, %c0_189] : memref<4x7x256xf32, #tpu.memory_space<vmem>>, vector<1x1x128xf32>
    %465 = vector.shape_cast %464 : vector<1x1x128xf32> to vector<1x128xf32>
    %466 = vector.broadcast %465 : vector<1x128xf32> to vector<16x128xf32>
    %467 = arith.addf %463, %466 : vector<16x128xf32>
    %468 = math.exp %467 : vector<16x128xf32>
    %cst_190 = arith.constant 2.000000e+00 : f32
    %469 = vector.broadcast %cst_190 : f32 to vector<16x128xf32>
    %470 = arith.addf %469, %468 : vector<16x128xf32>
    %471 = tpu.reciprocal %470 {approx = true} : vector<16x128xf32> -> vector<16x128xf32>
    %cst_191 = arith.constant 0.000000e+00 : f32
    %472 = vector.shape_cast %18 : vector<16x1xi1> to vector<16x1xi1>
    %473 = vector.broadcast %472 : vector<16x1xi1> to vector<16x128xi1>
    %474 = vector.broadcast %cst_191 : f32 to vector<16x128xf32>
    %475 = arith.select %473, %474, %471 : vector<16x128xi1>, vector<16x128xf32>
    %cst_192 = arith.constant 1.000000e+00 : f32
    %476 = vector.broadcast %cst_192 : f32 to vector<16x128xf32>
    %477 = arith.subf %476, %475 : vector<16x128xf32>
    %478 = arith.mulf %477, %459 : vector<16x128xf32>
    %c1_i32_193 = arith.constant 1 : i32
    %479 = tpu.dynamic_rotate %478 by %c1_i32_193 dim 0 : vector<16x128xf32>, i32 -> vector<16x128xf32>
    %480 = arith.mulf %475, %479 : vector<16x128xf32>
    %481 = arith.addf %478, %480 : vector<16x128xf32>
    %c1_i32_194 = arith.constant 1 : i32
    %482 = tpu.dynamic_rotate %475 by %c1_i32_194 dim 0 : vector<16x128xf32>, i32 -> vector<16x128xf32>
    %483 = arith.mulf %475, %482 : vector<16x128xf32>
    %c2_i32_195 = arith.constant 2 : i32
    %484 = tpu.dynamic_rotate %481 by %c2_i32_195 dim 0 : vector<16x128xf32>, i32 -> vector<16x128xf32>
    %485 = arith.mulf %483, %484 : vector<16x128xf32>
    %486 = arith.addf %481, %485 : vector<16x128xf32>
    %c2_i32_196 = arith.constant 2 : i32
    %487 = tpu.dynamic_rotate %483 by %c2_i32_196 dim 0 : vector<16x128xf32>, i32 -> vector<16x128xf32>
    %488 = arith.mulf %483, %487 : vector<16x128xf32>
    %c4_i32_197 = arith.constant 4 : i32
    %489 = tpu.dynamic_rotate %486 by %c4_i32_197 dim 0 : vector<16x128xf32>, i32 -> vector<16x128xf32>
    %490 = arith.mulf %488, %489 : vector<16x128xf32>
    %491 = arith.addf %486, %490 : vector<16x128xf32>
    %c2_198 = arith.constant 2 : index
    %c3_199 = arith.constant 3 : index
    %c0_200 = arith.constant 0 : index
    %492 = vector.load %arg15[%c2_198, %c3_199, %c0_200] : memref<4x7x256xf32, #tpu.memory_space<vmem>>, vector<1x1x128xf32>
    %493 = vector.shape_cast %492 : vector<1x1x128xf32> to vector<1x128xf32>
    %494 = vector.broadcast %493 : vector<1x128xf32> to vector<16x128xf32>
    %495 = arith.mulf %459, %494 : vector<16x128xf32>
    %496 = arith.addf %491, %495 : vector<16x128xf32>
    %497 = arith.negf %415 : vector<16x128xf32>
    %498 = math.exp %497 : vector<16x128xf32>
    %cst_201 = arith.constant 1.000000e+00 : f32
    %499 = vector.broadcast %cst_201 : f32 to vector<16x128xf32>
    %500 = arith.addf %499, %498 : vector<16x128xf32>
    %501 = arith.divf %499, %500 : vector<16x128xf32>
    %502 = arith.mulf %415, %501 : vector<16x128xf32>
    %503 = arith.mulf %496, %502 : vector<16x128xf32>
    %c2_202 = arith.constant 2 : index
    %c0_203 = arith.constant 0 : index
    %c0_204 = arith.constant 0 : index
    %504 = vector.load %arg7[%c2_202, %c0_203, %c0_204] : memref<4x128x64xbf16, #tpu.memory_space<vmem>>, vector<1x128x64xbf16>
    %505 = vector.shape_cast %504 : vector<1x128x64xbf16> to vector<128x64xbf16>
    %506 = arith.truncf %503 : vector<16x128xf32> to vector<16x128xbf16>
    %cst_205 = arith.constant dense<0.000000e+00> : vector<16x64xf32>
    %507 = tpu.matmul %506, %505, %cst_205 {dimension_numbers = #tpu.dot_dimension_numbers<[1], [0], [0], [1], [0, 0, 1, 1], [], []>} : vector<16x128xbf16>, vector<128x64xbf16>, vector<16x64xf32> -> vector<16x64xf32>
    %c2_206 = arith.constant 2 : index
    %c4_207 = arith.constant 4 : index
    %c0_208 = arith.constant 0 : index
    %508 = vector.load %arg15[%c2_206, %c4_207, %c0_208] : memref<4x7x256xf32, #tpu.memory_space<vmem>>, vector<1x1x64xf32>
    %509 = vector.shape_cast %508 : vector<1x1x64xf32> to vector<1x64xf32>
    %510 = vector.broadcast %509 : vector<1x64xf32> to vector<16x64xf32>
    %511 = arith.addf %507, %510 : vector<16x64xf32>
    %512 = arith.addf %511, %399 : vector<16x64xf32>
    %c2_209 = arith.constant 2 : index
    %c5_210 = arith.constant 5 : index
    %c0_211 = arith.constant 0 : index
    %513 = vector.load %arg15[%c2_209, %c5_210, %c0_211] : memref<4x7x256xf32, #tpu.memory_space<vmem>>, vector<1x1x64xf32>
    %514 = vector.shape_cast %513 : vector<1x1x64xf32> to vector<1x64xf32>
    %c2_212 = arith.constant 2 : index
    %c6_213 = arith.constant 6 : index
    %c0_214 = arith.constant 0 : index
    %515 = vector.load %arg15[%c2_212, %c6_213, %c0_214] : memref<4x7x256xf32, #tpu.memory_space<vmem>>, vector<1x1x64xf32>
    %516 = vector.shape_cast %515 : vector<1x1x64xf32> to vector<1x64xf32>
    %517 = vector.broadcast %29 : vector<1x64xf32> to vector<16x64xf32>
    %518 = arith.mulf %512, %517 : vector<16x64xf32>
    %cst_215 = arith.constant dense<0.000000e+00> : vector<16xf32>
    %519 = vector.multi_reduction <add>, %518, %cst_215 [1] : vector<16x64xf32> to vector<16xf32>
    %520 = vector.shape_cast %519 : vector<16xf32> to vector<16x1xf32>
    %cst_216 = arith.constant dense<0.000000e+00> : vector<16xf32>
    %521 = vector.multi_reduction <add>, %512, %cst_216 [1] : vector<16x64xf32> to vector<16xf32>
    %522 = vector.shape_cast %521 : vector<16xf32> to vector<16x1xf32>
    %523 = arith.subf %522, %520 : vector<16x1xf32>
    %524 = vector.shape_cast %27 : vector<1x64xi1> to vector<1x64xi1>
    %525 = vector.broadcast %524 : vector<1x64xi1> to vector<16x64xi1>
    %526 = vector.shape_cast %520 : vector<16x1xf32> to vector<16x1xf32>
    %527 = vector.broadcast %526 : vector<16x1xf32> to vector<16x64xf32>
    %528 = vector.shape_cast %523 : vector<16x1xf32> to vector<16x1xf32>
    %529 = vector.broadcast %528 : vector<16x1xf32> to vector<16x64xf32>
    %530 = arith.select %525, %527, %529 : vector<16x64xi1>, vector<16x64xf32>
    %cst_217 = arith.constant 3.125000e-02 : f32
    %531 = vector.broadcast %cst_217 : f32 to vector<16x64xf32>
    %532 = arith.mulf %530, %531 : vector<16x64xf32>
    %533 = arith.subf %512, %532 : vector<16x64xf32>
    %534 = arith.mulf %533, %533 : vector<16x64xf32>
    %535 = vector.broadcast %29 : vector<1x64xf32> to vector<16x64xf32>
    %536 = arith.mulf %534, %535 : vector<16x64xf32>
    %cst_218 = arith.constant dense<0.000000e+00> : vector<16xf32>
    %537 = vector.multi_reduction <add>, %536, %cst_218 [1] : vector<16x64xf32> to vector<16xf32>
    %538 = vector.shape_cast %537 : vector<16xf32> to vector<16x1xf32>
    %cst_219 = arith.constant dense<0.000000e+00> : vector<16xf32>
    %539 = vector.multi_reduction <add>, %534, %cst_219 [1] : vector<16x64xf32> to vector<16xf32>
    %540 = vector.shape_cast %539 : vector<16xf32> to vector<16x1xf32>
    %541 = arith.subf %540, %538 : vector<16x1xf32>
    %542 = vector.shape_cast %27 : vector<1x64xi1> to vector<1x64xi1>
    %543 = vector.broadcast %542 : vector<1x64xi1> to vector<16x64xi1>
    %544 = vector.shape_cast %538 : vector<16x1xf32> to vector<16x1xf32>
    %545 = vector.broadcast %544 : vector<16x1xf32> to vector<16x64xf32>
    %546 = vector.shape_cast %541 : vector<16x1xf32> to vector<16x1xf32>
    %547 = vector.broadcast %546 : vector<16x1xf32> to vector<16x64xf32>
    %548 = arith.select %543, %545, %547 : vector<16x64xi1>, vector<16x64xf32>
    %cst_220 = arith.constant 3.125000e-02 : f32
    %549 = vector.broadcast %cst_220 : f32 to vector<16x64xf32>
    %550 = arith.mulf %548, %549 : vector<16x64xf32>
    %cst_221 = arith.constant 9.99999974E-6 : f32
    %551 = vector.broadcast %cst_221 : f32 to vector<16x64xf32>
    %552 = arith.addf %550, %551 : vector<16x64xf32>
    %553 = math.rsqrt %552 : vector<16x64xf32>
    %554 = arith.mulf %533, %553 : vector<16x64xf32>
    %555 = vector.broadcast %514 : vector<1x64xf32> to vector<16x64xf32>
    %556 = arith.mulf %554, %555 : vector<16x64xf32>
    %557 = vector.broadcast %516 : vector<1x64xf32> to vector<16x64xf32>
    %558 = arith.addf %556, %557 : vector<16x64xf32>
    %c3_222 = arith.constant 3 : index
    %c0_223 = arith.constant 0 : index
    %c0_224 = arith.constant 0 : index
    %559 = vector.load %arg4[%c3_222, %c0_223, %c0_224] : memref<4x64x256xbf16, #tpu.memory_space<vmem>>, vector<1x64x256xbf16>
    %560 = vector.shape_cast %559 : vector<1x64x256xbf16> to vector<64x256xbf16>
    %561 = arith.truncf %558 : vector<16x64xf32> to vector<16x64xbf16>
    %cst_225 = arith.constant dense<0.000000e+00> : vector<16x256xf32>
    %562 = tpu.matmul %561, %560, %cst_225 {dimension_numbers = #tpu.dot_dimension_numbers<[1], [0], [0], [1], [0, 0, 1, 1], [], []>} : vector<16x64xbf16>, vector<64x256xbf16>, vector<16x256xf32> -> vector<16x256xf32>
    %c3_226 = arith.constant 3 : index
    %c0_227 = arith.constant 0 : index
    %c0_228 = arith.constant 0 : index
    %563 = vector.load %arg15[%c3_226, %c0_227, %c0_228] : memref<4x7x256xf32, #tpu.memory_space<vmem>>, vector<1x1x256xf32>
    %564 = vector.shape_cast %563 : vector<1x1x256xf32> to vector<1x256xf32>
    %565 = vector.broadcast %564 : vector<1x256xf32> to vector<16x256xf32>
    %566 = arith.addf %562, %565 : vector<16x256xf32>
    %567 = vector.extract_strided_slice %566 {offsets = [0, 0], sizes = [16, 128], strides = [1, 1]} : vector<16x256xf32> to vector<16x128xf32>
    %568 = arith.negf %567 : vector<16x128xf32>
    %569 = math.exp %568 : vector<16x128xf32>
    %cst_229 = arith.constant 1.000000e+00 : f32
    %570 = vector.broadcast %cst_229 : f32 to vector<16x128xf32>
    %571 = arith.addf %570, %569 : vector<16x128xf32>
    %572 = arith.divf %570, %571 : vector<16x128xf32>
    %573 = arith.mulf %567, %572 : vector<16x128xf32>
    %574 = vector.extract_strided_slice %566 {offsets = [0, 128], sizes = [16, 128], strides = [1, 1]} : vector<16x256xf32> to vector<16x128xf32>
    %c3_230 = arith.constant 3 : index
    %c3_231 = arith.constant 3 : index
    %c0_232 = arith.constant 0 : index
    %575 = vector.load %arg5[%c3_230, %c3_231, %c0_232] : memref<4x4x128xf32, #tpu.memory_space<vmem>>, vector<1x1x128xf32>
    %576 = vector.shape_cast %575 : vector<1x1x128xf32> to vector<1x128xf32>
    %577 = vector.broadcast %576 : vector<1x128xf32> to vector<16x128xf32>
    %578 = arith.mulf %573, %577 : vector<16x128xf32>
    %c3_233 = arith.constant 3 : index
    %c1_234 = arith.constant 1 : index
    %c0_235 = arith.constant 0 : index
    %579 = vector.load %arg15[%c3_233, %c1_234, %c0_235] : memref<4x7x256xf32, #tpu.memory_space<vmem>>, vector<1x1x128xf32>
    %580 = vector.shape_cast %579 : vector<1x1x128xf32> to vector<1x128xf32>
    %581 = vector.broadcast %580 : vector<1x128xf32> to vector<16x128xf32>
    %582 = arith.addf %578, %581 : vector<16x128xf32>
    %c3_236 = arith.constant 3 : index
    %c2_237 = arith.constant 2 : index
    %c0_238 = arith.constant 0 : index
    %583 = vector.load %arg5[%c3_236, %c2_237, %c0_238] : memref<4x4x128xf32, #tpu.memory_space<vmem>>, vector<1x1x128xf32>
    %584 = vector.shape_cast %583 : vector<1x1x128xf32> to vector<1x128xf32>
    %c1_i32_239 = arith.constant 1 : i32
    %585 = tpu.dynamic_rotate %573 by %c1_i32_239 dim 0 : vector<16x128xf32>, i32 -> vector<16x128xf32>
    %cst_240 = arith.constant 0.000000e+00 : f32
    %586 = vector.shape_cast %20 : vector<16x1xi1> to vector<16x1xi1>
    %587 = vector.broadcast %586 : vector<16x1xi1> to vector<16x128xi1>
    %588 = vector.broadcast %cst_240 : f32 to vector<16x128xf32>
    %589 = arith.select %587, %585, %588 : vector<16x128xi1>, vector<16x128xf32>
    %590 = vector.broadcast %584 : vector<1x128xf32> to vector<16x128xf32>
    %591 = arith.mulf %589, %590 : vector<16x128xf32>
    %592 = arith.addf %582, %591 : vector<16x128xf32>
    %c3_241 = arith.constant 3 : index
    %c1_242 = arith.constant 1 : index
    %c0_243 = arith.constant 0 : index
    %593 = vector.load %arg5[%c3_241, %c1_242, %c0_243] : memref<4x4x128xf32, #tpu.memory_space<vmem>>, vector<1x1x128xf32>
    %594 = vector.shape_cast %593 : vector<1x1x128xf32> to vector<1x128xf32>
    %c2_i32_244 = arith.constant 2 : i32
    %595 = tpu.dynamic_rotate %573 by %c2_i32_244 dim 0 : vector<16x128xf32>, i32 -> vector<16x128xf32>
    %cst_245 = arith.constant 0.000000e+00 : f32
    %596 = vector.shape_cast %22 : vector<16x1xi1> to vector<16x1xi1>
    %597 = vector.broadcast %596 : vector<16x1xi1> to vector<16x128xi1>
    %598 = vector.broadcast %cst_245 : f32 to vector<16x128xf32>
    %599 = arith.select %597, %595, %598 : vector<16x128xi1>, vector<16x128xf32>
    %600 = vector.broadcast %594 : vector<1x128xf32> to vector<16x128xf32>
    %601 = arith.mulf %599, %600 : vector<16x128xf32>
    %602 = arith.addf %592, %601 : vector<16x128xf32>
    %c3_246 = arith.constant 3 : index
    %c0_247 = arith.constant 0 : index
    %c0_248 = arith.constant 0 : index
    %603 = vector.load %arg5[%c3_246, %c0_247, %c0_248] : memref<4x4x128xf32, #tpu.memory_space<vmem>>, vector<1x1x128xf32>
    %604 = vector.shape_cast %603 : vector<1x1x128xf32> to vector<1x128xf32>
    %c3_i32_249 = arith.constant 3 : i32
    %605 = tpu.dynamic_rotate %573 by %c3_i32_249 dim 0 : vector<16x128xf32>, i32 -> vector<16x128xf32>
    %cst_250 = arith.constant 0.000000e+00 : f32
    %606 = vector.shape_cast %24 : vector<16x1xi1> to vector<16x1xi1>
    %607 = vector.broadcast %606 : vector<16x1xi1> to vector<16x128xi1>
    %608 = vector.broadcast %cst_250 : f32 to vector<16x128xf32>
    %609 = arith.select %607, %605, %608 : vector<16x128xi1>, vector<16x128xf32>
    %610 = vector.broadcast %604 : vector<1x128xf32> to vector<16x128xf32>
    %611 = arith.mulf %609, %610 : vector<16x128xf32>
    %612 = arith.addf %602, %611 : vector<16x128xf32>
    %613 = arith.negf %612 : vector<16x128xf32>
    %614 = math.exp %613 : vector<16x128xf32>
    %cst_251 = arith.constant 1.000000e+00 : f32
    %615 = vector.broadcast %cst_251 : f32 to vector<16x128xf32>
    %616 = arith.addf %615, %614 : vector<16x128xf32>
    %617 = arith.divf %615, %616 : vector<16x128xf32>
    %618 = arith.mulf %612, %617 : vector<16x128xf32>
    %c3_252 = arith.constant 3 : index
    %c0_253 = arith.constant 0 : index
    %c0_254 = arith.constant 0 : index
    %619 = vector.load %arg6[%c3_252, %c0_253, %c0_254] : memref<4x128x128xbf16, #tpu.memory_space<vmem>>, vector<1x128x128xbf16>
    %620 = vector.shape_cast %619 : vector<1x128x128xbf16> to vector<128x128xbf16>
    %621 = arith.truncf %618 : vector<16x128xf32> to vector<16x128xbf16>
    %cst_255 = arith.constant dense<0.000000e+00> : vector<16x128xf32>
    %622 = tpu.matmul %621, %620, %cst_255 {dimension_numbers = #tpu.dot_dimension_numbers<[1], [0], [0], [1], [0, 0, 1, 1], [], []>} : vector<16x128xbf16>, vector<128x128xbf16>, vector<16x128xf32> -> vector<16x128xf32>
    %c3_256 = arith.constant 3 : index
    %c2_257 = arith.constant 2 : index
    %c0_258 = arith.constant 0 : index
    %623 = vector.load %arg15[%c3_256, %c2_257, %c0_258] : memref<4x7x256xf32, #tpu.memory_space<vmem>>, vector<1x1x128xf32>
    %624 = vector.shape_cast %623 : vector<1x1x128xf32> to vector<1x128xf32>
    %625 = vector.broadcast %624 : vector<1x128xf32> to vector<16x128xf32>
    %626 = arith.addf %622, %625 : vector<16x128xf32>
    %627 = math.exp %626 : vector<16x128xf32>
    %cst_259 = arith.constant 2.000000e+00 : f32
    %628 = vector.broadcast %cst_259 : f32 to vector<16x128xf32>
    %629 = arith.addf %628, %627 : vector<16x128xf32>
    %630 = tpu.reciprocal %629 {approx = true} : vector<16x128xf32> -> vector<16x128xf32>
    %cst_260 = arith.constant 0.000000e+00 : f32
    %631 = vector.shape_cast %18 : vector<16x1xi1> to vector<16x1xi1>
    %632 = vector.broadcast %631 : vector<16x1xi1> to vector<16x128xi1>
    %633 = vector.broadcast %cst_260 : f32 to vector<16x128xf32>
    %634 = arith.select %632, %633, %630 : vector<16x128xi1>, vector<16x128xf32>
    %cst_261 = arith.constant 1.000000e+00 : f32
    %635 = vector.broadcast %cst_261 : f32 to vector<16x128xf32>
    %636 = arith.subf %635, %634 : vector<16x128xf32>
    %637 = arith.mulf %636, %618 : vector<16x128xf32>
    %c1_i32_262 = arith.constant 1 : i32
    %638 = tpu.dynamic_rotate %637 by %c1_i32_262 dim 0 : vector<16x128xf32>, i32 -> vector<16x128xf32>
    %639 = arith.mulf %634, %638 : vector<16x128xf32>
    %640 = arith.addf %637, %639 : vector<16x128xf32>
    %c1_i32_263 = arith.constant 1 : i32
    %641 = tpu.dynamic_rotate %634 by %c1_i32_263 dim 0 : vector<16x128xf32>, i32 -> vector<16x128xf32>
    %642 = arith.mulf %634, %641 : vector<16x128xf32>
    %c2_i32_264 = arith.constant 2 : i32
    %643 = tpu.dynamic_rotate %640 by %c2_i32_264 dim 0 : vector<16x128xf32>, i32 -> vector<16x128xf32>
    %644 = arith.mulf %642, %643 : vector<16x128xf32>
    %645 = arith.addf %640, %644 : vector<16x128xf32>
    %c2_i32_265 = arith.constant 2 : i32
    %646 = tpu.dynamic_rotate %642 by %c2_i32_265 dim 0 : vector<16x128xf32>, i32 -> vector<16x128xf32>
    %647 = arith.mulf %642, %646 : vector<16x128xf32>
    %c4_i32_266 = arith.constant 4 : i32
    %648 = tpu.dynamic_rotate %645 by %c4_i32_266 dim 0 : vector<16x128xf32>, i32 -> vector<16x128xf32>
    %649 = arith.mulf %647, %648 : vector<16x128xf32>
    %650 = arith.addf %645, %649 : vector<16x128xf32>
    %c3_267 = arith.constant 3 : index
    %c3_268 = arith.constant 3 : index
    %c0_269 = arith.constant 0 : index
    %651 = vector.load %arg15[%c3_267, %c3_268, %c0_269] : memref<4x7x256xf32, #tpu.memory_space<vmem>>, vector<1x1x128xf32>
    %652 = vector.shape_cast %651 : vector<1x1x128xf32> to vector<1x128xf32>
    %653 = vector.broadcast %652 : vector<1x128xf32> to vector<16x128xf32>
    %654 = arith.mulf %618, %653 : vector<16x128xf32>
    %655 = arith.addf %650, %654 : vector<16x128xf32>
    %656 = arith.negf %574 : vector<16x128xf32>
    %657 = math.exp %656 : vector<16x128xf32>
    %cst_270 = arith.constant 1.000000e+00 : f32
    %658 = vector.broadcast %cst_270 : f32 to vector<16x128xf32>
    %659 = arith.addf %658, %657 : vector<16x128xf32>
    %660 = arith.divf %658, %659 : vector<16x128xf32>
    %661 = arith.mulf %574, %660 : vector<16x128xf32>
    %662 = arith.mulf %655, %661 : vector<16x128xf32>
    %c3_271 = arith.constant 3 : index
    %c0_272 = arith.constant 0 : index
    %c0_273 = arith.constant 0 : index
    %663 = vector.load %arg7[%c3_271, %c0_272, %c0_273] : memref<4x128x64xbf16, #tpu.memory_space<vmem>>, vector<1x128x64xbf16>
    %664 = vector.shape_cast %663 : vector<1x128x64xbf16> to vector<128x64xbf16>
    %665 = arith.truncf %662 : vector<16x128xf32> to vector<16x128xbf16>
    %cst_274 = arith.constant dense<0.000000e+00> : vector<16x64xf32>
    %666 = tpu.matmul %665, %664, %cst_274 {dimension_numbers = #tpu.dot_dimension_numbers<[1], [0], [0], [1], [0, 0, 1, 1], [], []>} : vector<16x128xbf16>, vector<128x64xbf16>, vector<16x64xf32> -> vector<16x64xf32>
    %c3_275 = arith.constant 3 : index
    %c4_276 = arith.constant 4 : index
    %c0_277 = arith.constant 0 : index
    %667 = vector.load %arg15[%c3_275, %c4_276, %c0_277] : memref<4x7x256xf32, #tpu.memory_space<vmem>>, vector<1x1x64xf32>
    %668 = vector.shape_cast %667 : vector<1x1x64xf32> to vector<1x64xf32>
    %669 = vector.broadcast %668 : vector<1x64xf32> to vector<16x64xf32>
    %670 = arith.addf %666, %669 : vector<16x64xf32>
    %671 = arith.addf %670, %558 : vector<16x64xf32>
    %c3_278 = arith.constant 3 : index
    %c5_279 = arith.constant 5 : index
    %c0_280 = arith.constant 0 : index
    %672 = vector.load %arg15[%c3_278, %c5_279, %c0_280] : memref<4x7x256xf32, #tpu.memory_space<vmem>>, vector<1x1x64xf32>
    %673 = vector.shape_cast %672 : vector<1x1x64xf32> to vector<1x64xf32>
    %c3_281 = arith.constant 3 : index
    %c6_282 = arith.constant 6 : index
    %c0_283 = arith.constant 0 : index
    %674 = vector.load %arg15[%c3_281, %c6_282, %c0_283] : memref<4x7x256xf32, #tpu.memory_space<vmem>>, vector<1x1x64xf32>
    %675 = vector.shape_cast %674 : vector<1x1x64xf32> to vector<1x64xf32>
    %676 = vector.broadcast %29 : vector<1x64xf32> to vector<16x64xf32>
    %677 = arith.mulf %671, %676 : vector<16x64xf32>
    %cst_284 = arith.constant dense<0.000000e+00> : vector<16xf32>
    %678 = vector.multi_reduction <add>, %677, %cst_284 [1] : vector<16x64xf32> to vector<16xf32>
    %679 = vector.shape_cast %678 : vector<16xf32> to vector<16x1xf32>
    %cst_285 = arith.constant dense<0.000000e+00> : vector<16xf32>
    %680 = vector.multi_reduction <add>, %671, %cst_285 [1] : vector<16x64xf32> to vector<16xf32>
    %681 = vector.shape_cast %680 : vector<16xf32> to vector<16x1xf32>
    %682 = arith.subf %681, %679 : vector<16x1xf32>
    %683 = vector.shape_cast %27 : vector<1x64xi1> to vector<1x64xi1>
    %684 = vector.broadcast %683 : vector<1x64xi1> to vector<16x64xi1>
    %685 = vector.shape_cast %679 : vector<16x1xf32> to vector<16x1xf32>
    %686 = vector.broadcast %685 : vector<16x1xf32> to vector<16x64xf32>
    %687 = vector.shape_cast %682 : vector<16x1xf32> to vector<16x1xf32>
    %688 = vector.broadcast %687 : vector<16x1xf32> to vector<16x64xf32>
    %689 = arith.select %684, %686, %688 : vector<16x64xi1>, vector<16x64xf32>
    %cst_286 = arith.constant 3.125000e-02 : f32
    %690 = vector.broadcast %cst_286 : f32 to vector<16x64xf32>
    %691 = arith.mulf %689, %690 : vector<16x64xf32>
    %692 = arith.subf %671, %691 : vector<16x64xf32>
    %693 = arith.mulf %692, %692 : vector<16x64xf32>
    %694 = vector.broadcast %29 : vector<1x64xf32> to vector<16x64xf32>
    %695 = arith.mulf %693, %694 : vector<16x64xf32>
    %cst_287 = arith.constant dense<0.000000e+00> : vector<16xf32>
    %696 = vector.multi_reduction <add>, %695, %cst_287 [1] : vector<16x64xf32> to vector<16xf32>
    %697 = vector.shape_cast %696 : vector<16xf32> to vector<16x1xf32>
    %cst_288 = arith.constant dense<0.000000e+00> : vector<16xf32>
    %698 = vector.multi_reduction <add>, %693, %cst_288 [1] : vector<16x64xf32> to vector<16xf32>
    %699 = vector.shape_cast %698 : vector<16xf32> to vector<16x1xf32>
    %700 = arith.subf %699, %697 : vector<16x1xf32>
    %701 = vector.shape_cast %27 : vector<1x64xi1> to vector<1x64xi1>
    %702 = vector.broadcast %701 : vector<1x64xi1> to vector<16x64xi1>
    %703 = vector.shape_cast %697 : vector<16x1xf32> to vector<16x1xf32>
    %704 = vector.broadcast %703 : vector<16x1xf32> to vector<16x64xf32>
    %705 = vector.shape_cast %700 : vector<16x1xf32> to vector<16x1xf32>
    %706 = vector.broadcast %705 : vector<16x1xf32> to vector<16x64xf32>
    %707 = arith.select %702, %704, %706 : vector<16x64xi1>, vector<16x64xf32>
    %cst_289 = arith.constant 3.125000e-02 : f32
    %708 = vector.broadcast %cst_289 : f32 to vector<16x64xf32>
    %709 = arith.mulf %707, %708 : vector<16x64xf32>
    %cst_290 = arith.constant 9.99999974E-6 : f32
    %710 = vector.broadcast %cst_290 : f32 to vector<16x64xf32>
    %711 = arith.addf %709, %710 : vector<16x64xf32>
    %712 = math.rsqrt %711 : vector<16x64xf32>
    %713 = arith.mulf %692, %712 : vector<16x64xf32>
    %714 = vector.broadcast %673 : vector<1x64xf32> to vector<16x64xf32>
    %715 = arith.mulf %713, %714 : vector<16x64xf32>
    %716 = vector.broadcast %675 : vector<1x64xf32> to vector<16x64xf32>
    %717 = arith.addf %715, %716 : vector<16x64xf32>
    %718 = tpu.iota {dimensions = array<i32: 1>} : vector<2x16xi32>
    %719 = tpu.iota {dimensions = array<i32: 0>} : vector<2x16xi32>
    %c8_i32_291 = arith.constant 8 : i32
    %720 = vector.broadcast %c8_i32_291 : i32 to vector<2x16xi32>
    %721 = arith.muli %719, %720 : vector<2x16xi32>
    %c7_i32 = arith.constant 7 : i32
    %722 = vector.broadcast %c7_i32 : i32 to vector<2x16xi32>
    %723 = arith.addi %721, %722 : vector<2x16xi32>
    %724 = arith.cmpi eq, %718, %723 : vector<2x16xi32>
    %725 = arith.extui %724 : vector<2x16xi1> to vector<2x16xi32>
    %726 = arith.sitofp %725 : vector<2x16xi32> to vector<2x16xf32>
    %727 = arith.truncf %717 : vector<16x64xf32> to vector<16x64xbf16>
    %728 = arith.truncf %726 : vector<2x16xf32> to vector<2x16xbf16>
    %cst_292 = arith.constant dense<0.000000e+00> : vector<2x64xf32>
    %729 = tpu.matmul %728, %727, %cst_292 {dimension_numbers = #tpu.dot_dimension_numbers<[1], [0], [0], [1], [0, 0, 1, 1], [], []>} : vector<2x16xbf16>, vector<16x64xbf16>, vector<2x64xf32> -> vector<2x64xf32>
    %c3_293 = arith.constant 3 : index
    %c0_294 = arith.constant 0 : index
    %730 = vector.load %arg14[%c3_293, %c0_294] : memref<13x64xf32, #tpu.memory_space<vmem>>, vector<1x16xf32>
    %c0_295 = arith.constant 0 : index
    %c0_296 = arith.constant 0 : index
    %731 = vector.load %arg1[%c0_295, %c0_296] : memref<2x2xf32, #tpu.memory_space<vmem>>, vector<2x1xf32>
    %c0_297 = arith.constant 0 : index
    %c0_298 = arith.constant 0 : index
    %732 = vector.load %arg8[%c0_297, %c0_298] : memref<2x16xf32, #tpu.memory_space<vmem>>, vector<1x16xf32>
    %733 = vector.broadcast %731 : vector<2x1xf32> to vector<2x16xf32>
    %734 = vector.broadcast %732 : vector<1x16xf32> to vector<2x16xf32>
    %735 = arith.mulf %733, %734 : vector<2x16xf32>
    %736 = vector.broadcast %730 : vector<1x16xf32> to vector<2x16xf32>
    %737 = arith.addf %736, %735 : vector<2x16xf32>
    %c0_299 = arith.constant 0 : index
    %c1_300 = arith.constant 1 : index
    %738 = vector.load %arg1[%c0_299, %c1_300] : memref<2x2xf32, #tpu.memory_space<vmem>>, vector<2x1xf32>
    %c1_301 = arith.constant 1 : index
    %c0_302 = arith.constant 0 : index
    %739 = vector.load %arg8[%c1_301, %c0_302] : memref<2x16xf32, #tpu.memory_space<vmem>>, vector<1x16xf32>
    %740 = vector.broadcast %738 : vector<2x1xf32> to vector<2x16xf32>
    %741 = vector.broadcast %739 : vector<1x16xf32> to vector<2x16xf32>
    %742 = arith.mulf %740, %741 : vector<2x16xf32>
    %743 = arith.addf %737, %742 : vector<2x16xf32>
    %c4_303 = arith.constant 4 : index
    %c0_304 = arith.constant 0 : index
    %744 = vector.load %arg14[%c4_303, %c0_304] : memref<13x64xf32, #tpu.memory_space<vmem>>, vector<1x16xf32>
    %c0_305 = arith.constant 0 : index
    %c0_306 = arith.constant 0 : index
    %745 = vector.load %arg2[%c0_305, %c0_306] : memref<2x1xf32, #tpu.memory_space<vmem>>, vector<2x1xf32>
    %c0_307 = arith.constant 0 : index
    %c0_308 = arith.constant 0 : index
    %746 = vector.load %arg9[%c0_307, %c0_308] : memref<1x16xf32, #tpu.memory_space<vmem>>, vector<1x16xf32>
    %747 = vector.broadcast %745 : vector<2x1xf32> to vector<2x16xf32>
    %748 = vector.broadcast %746 : vector<1x16xf32> to vector<2x16xf32>
    %749 = arith.mulf %747, %748 : vector<2x16xf32>
    %750 = vector.broadcast %744 : vector<1x16xf32> to vector<2x16xf32>
    %751 = arith.addf %750, %749 : vector<2x16xf32>
    %cst_309 = arith.constant 0.000000e+00 : f32
    %752 = vector.broadcast %cst_309 : f32 to vector<2x16xf32>
    %753 = arith.maximumf %743, %752 : vector<2x16xf32>
    %cst_310 = arith.constant 0.000000e+00 : f32
    %754 = vector.broadcast %cst_310 : f32 to vector<2x16xf32>
    %755 = arith.maximumf %751, %754 : vector<2x16xf32>
    %c0_311 = arith.constant 0 : index
    %c0_312 = arith.constant 0 : index
    %756 = vector.load %arg10[%c0_311, %c0_312] : memref<64x64xbf16, #tpu.memory_space<vmem>>, vector<64x64xbf16>
    %757 = arith.truncf %729 : vector<2x64xf32> to vector<2x64xbf16>
    %cst_313 = arith.constant dense<0.000000e+00> : vector<2x64xf32>
    %758 = tpu.matmul %757, %756, %cst_313 {dimension_numbers = #tpu.dot_dimension_numbers<[1], [0], [0], [1], [0, 0, 1, 1], [], []>} : vector<2x64xbf16>, vector<64x64xbf16>, vector<2x64xf32> -> vector<2x64xf32>
    %c0_314 = arith.constant 0 : index
    %c0_315 = arith.constant 0 : index
    %759 = vector.load %arg11[%c0_314, %c0_315] : memref<16x64xbf16, #tpu.memory_space<vmem>>, vector<16x64xbf16>
    %760 = arith.truncf %753 : vector<2x16xf32> to vector<2x16xbf16>
    %cst_316 = arith.constant dense<0.000000e+00> : vector<2x64xf32>
    %761 = tpu.matmul %760, %759, %cst_316 {dimension_numbers = #tpu.dot_dimension_numbers<[1], [0], [0], [1], [0, 0, 1, 1], [], []>} : vector<2x16xbf16>, vector<16x64xbf16>, vector<2x64xf32> -> vector<2x64xf32>
    %762 = arith.addf %758, %761 : vector<2x64xf32>
    %c0_317 = arith.constant 0 : index
    %c0_318 = arith.constant 0 : index
    %763 = vector.load %arg12[%c0_317, %c0_318] : memref<16x64xbf16, #tpu.memory_space<vmem>>, vector<16x64xbf16>
    %764 = arith.truncf %755 : vector<2x16xf32> to vector<2x16xbf16>
    %cst_319 = arith.constant dense<0.000000e+00> : vector<2x64xf32>
    %765 = tpu.matmul %764, %763, %cst_319 {dimension_numbers = #tpu.dot_dimension_numbers<[1], [0], [0], [1], [0, 0, 1, 1], [], []>} : vector<2x16xbf16>, vector<16x64xbf16>, vector<2x64xf32> -> vector<2x64xf32>
    %766 = arith.addf %762, %765 : vector<2x64xf32>
    %c5_320 = arith.constant 5 : index
    %c0_321 = arith.constant 0 : index
    %767 = vector.load %arg14[%c5_320, %c0_321] : memref<13x64xf32, #tpu.memory_space<vmem>>, vector<1x64xf32>
    %768 = vector.broadcast %767 : vector<1x64xf32> to vector<2x64xf32>
    %769 = arith.addf %766, %768 : vector<2x64xf32>
    %c6_322 = arith.constant 6 : index
    %c0_323 = arith.constant 0 : index
    %770 = vector.load %arg14[%c6_322, %c0_323] : memref<13x64xf32, #tpu.memory_space<vmem>>, vector<1x64xf32>
    %c7 = arith.constant 7 : index
    %c0_324 = arith.constant 0 : index
    %771 = vector.load %arg14[%c7, %c0_324] : memref<13x64xf32, #tpu.memory_space<vmem>>, vector<1x64xf32>
    %772 = vector.broadcast %29 : vector<1x64xf32> to vector<2x64xf32>
    %773 = arith.mulf %769, %772 : vector<2x64xf32>
    %cst_325 = arith.constant dense<0.000000e+00> : vector<2xf32>
    %774 = vector.multi_reduction <add>, %773, %cst_325 [1] : vector<2x64xf32> to vector<2xf32>
    %775 = vector.shape_cast %774 : vector<2xf32> to vector<2x1xf32>
    %cst_326 = arith.constant dense<0.000000e+00> : vector<2xf32>
    %776 = vector.multi_reduction <add>, %769, %cst_326 [1] : vector<2x64xf32> to vector<2xf32>
    %777 = vector.shape_cast %776 : vector<2xf32> to vector<2x1xf32>
    %778 = arith.subf %777, %775 : vector<2x1xf32>
    %779 = vector.shape_cast %27 : vector<1x64xi1> to vector<1x64xi1>
    %780 = vector.broadcast %779 : vector<1x64xi1> to vector<2x64xi1>
    %781 = vector.shape_cast %775 : vector<2x1xf32> to vector<2x1xf32>
    %782 = vector.broadcast %781 : vector<2x1xf32> to vector<2x64xf32>
    %783 = vector.shape_cast %778 : vector<2x1xf32> to vector<2x1xf32>
    %784 = vector.broadcast %783 : vector<2x1xf32> to vector<2x64xf32>
    %785 = arith.select %780, %782, %784 : vector<2x64xi1>, vector<2x64xf32>
    %cst_327 = arith.constant 3.125000e-02 : f32
    %786 = vector.broadcast %cst_327 : f32 to vector<2x64xf32>
    %787 = arith.mulf %785, %786 : vector<2x64xf32>
    %788 = arith.subf %769, %787 : vector<2x64xf32>
    %789 = arith.mulf %788, %788 : vector<2x64xf32>
    %790 = vector.broadcast %29 : vector<1x64xf32> to vector<2x64xf32>
    %791 = arith.mulf %789, %790 : vector<2x64xf32>
    %cst_328 = arith.constant dense<0.000000e+00> : vector<2xf32>
    %792 = vector.multi_reduction <add>, %791, %cst_328 [1] : vector<2x64xf32> to vector<2xf32>
    %793 = vector.shape_cast %792 : vector<2xf32> to vector<2x1xf32>
    %cst_329 = arith.constant dense<0.000000e+00> : vector<2xf32>
    %794 = vector.multi_reduction <add>, %789, %cst_329 [1] : vector<2x64xf32> to vector<2xf32>
    %795 = vector.shape_cast %794 : vector<2xf32> to vector<2x1xf32>
    %796 = arith.subf %795, %793 : vector<2x1xf32>
    %797 = vector.shape_cast %27 : vector<1x64xi1> to vector<1x64xi1>
    %798 = vector.broadcast %797 : vector<1x64xi1> to vector<2x64xi1>
    %799 = vector.shape_cast %793 : vector<2x1xf32> to vector<2x1xf32>
    %800 = vector.broadcast %799 : vector<2x1xf32> to vector<2x64xf32>
    %801 = vector.shape_cast %796 : vector<2x1xf32> to vector<2x1xf32>
    %802 = vector.broadcast %801 : vector<2x1xf32> to vector<2x64xf32>
    %803 = arith.select %798, %800, %802 : vector<2x64xi1>, vector<2x64xf32>
    %cst_330 = arith.constant 3.125000e-02 : f32
    %804 = vector.broadcast %cst_330 : f32 to vector<2x64xf32>
    %805 = arith.mulf %803, %804 : vector<2x64xf32>
    %cst_331 = arith.constant 9.99999974E-6 : f32
    %806 = vector.broadcast %cst_331 : f32 to vector<2x64xf32>
    %807 = arith.addf %805, %806 : vector<2x64xf32>
    %808 = math.rsqrt %807 : vector<2x64xf32>
    %809 = arith.mulf %788, %808 : vector<2x64xf32>
    %810 = vector.broadcast %770 : vector<1x64xf32> to vector<2x64xf32>
    %811 = arith.mulf %809, %810 : vector<2x64xf32>
    %812 = vector.broadcast %771 : vector<1x64xf32> to vector<2x64xf32>
    %813 = arith.addf %811, %812 : vector<2x64xf32>
    %cst_332 = arith.constant 0.000000e+00 : f32
    %814 = vector.broadcast %cst_332 : f32 to vector<2x64xf32>
    %815 = arith.maximumf %813, %814 : vector<2x64xf32>
    %c0_333 = arith.constant 0 : index
    %c0_334 = arith.constant 0 : index
    %816 = vector.load %arg13[%c0_333, %c0_334] : memref<64x64xbf16, #tpu.memory_space<vmem>>, vector<64x64xbf16>
    %817 = arith.truncf %815 : vector<2x64xf32> to vector<2x64xbf16>
    %cst_335 = arith.constant dense<0.000000e+00> : vector<2x64xf32>
    %818 = tpu.matmul %817, %816, %cst_335 {dimension_numbers = #tpu.dot_dimension_numbers<[1], [0], [0], [1], [0, 0, 1, 1], [], []>} : vector<2x64xbf16>, vector<64x64xbf16>, vector<2x64xf32> -> vector<2x64xf32>
    %c8 = arith.constant 8 : index
    %c0_336 = arith.constant 0 : index
    %819 = vector.load %arg14[%c8, %c0_336] : memref<13x64xf32, #tpu.memory_space<vmem>>, vector<1x64xf32>
    %820 = vector.broadcast %819 : vector<1x64xf32> to vector<2x64xf32>
    %821 = arith.addf %818, %820 : vector<2x64xf32>
    %c9 = arith.constant 9 : index
    %c0_337 = arith.constant 0 : index
    %822 = vector.load %arg14[%c9, %c0_337] : memref<13x64xf32, #tpu.memory_space<vmem>>, vector<1x64xf32>
    %c10 = arith.constant 10 : index
    %c0_338 = arith.constant 0 : index
    %823 = vector.load %arg14[%c10, %c0_338] : memref<13x64xf32, #tpu.memory_space<vmem>>, vector<1x64xf32>
    %824 = vector.broadcast %29 : vector<1x64xf32> to vector<2x64xf32>
    %825 = arith.mulf %821, %824 : vector<2x64xf32>
    %cst_339 = arith.constant dense<0.000000e+00> : vector<2xf32>
    %826 = vector.multi_reduction <add>, %825, %cst_339 [1] : vector<2x64xf32> to vector<2xf32>
    %827 = vector.shape_cast %826 : vector<2xf32> to vector<2x1xf32>
    %cst_340 = arith.constant dense<0.000000e+00> : vector<2xf32>
    %828 = vector.multi_reduction <add>, %821, %cst_340 [1] : vector<2x64xf32> to vector<2xf32>
    %829 = vector.shape_cast %828 : vector<2xf32> to vector<2x1xf32>
    %830 = arith.subf %829, %827 : vector<2x1xf32>
    %831 = vector.shape_cast %27 : vector<1x64xi1> to vector<1x64xi1>
    %832 = vector.broadcast %831 : vector<1x64xi1> to vector<2x64xi1>
    %833 = vector.shape_cast %827 : vector<2x1xf32> to vector<2x1xf32>
    %834 = vector.broadcast %833 : vector<2x1xf32> to vector<2x64xf32>
    %835 = vector.shape_cast %830 : vector<2x1xf32> to vector<2x1xf32>
    %836 = vector.broadcast %835 : vector<2x1xf32> to vector<2x64xf32>
    %837 = arith.select %832, %834, %836 : vector<2x64xi1>, vector<2x64xf32>
    %cst_341 = arith.constant 3.125000e-02 : f32
    %838 = vector.broadcast %cst_341 : f32 to vector<2x64xf32>
    %839 = arith.mulf %837, %838 : vector<2x64xf32>
    %840 = arith.subf %821, %839 : vector<2x64xf32>
    %841 = arith.mulf %840, %840 : vector<2x64xf32>
    %842 = vector.broadcast %29 : vector<1x64xf32> to vector<2x64xf32>
    %843 = arith.mulf %841, %842 : vector<2x64xf32>
    %cst_342 = arith.constant dense<0.000000e+00> : vector<2xf32>
    %844 = vector.multi_reduction <add>, %843, %cst_342 [1] : vector<2x64xf32> to vector<2xf32>
    %845 = vector.shape_cast %844 : vector<2xf32> to vector<2x1xf32>
    %cst_343 = arith.constant dense<0.000000e+00> : vector<2xf32>
    %846 = vector.multi_reduction <add>, %841, %cst_343 [1] : vector<2x64xf32> to vector<2xf32>
    %847 = vector.shape_cast %846 : vector<2xf32> to vector<2x1xf32>
    %848 = arith.subf %847, %845 : vector<2x1xf32>
    %849 = vector.shape_cast %27 : vector<1x64xi1> to vector<1x64xi1>
    %850 = vector.broadcast %849 : vector<1x64xi1> to vector<2x64xi1>
    %851 = vector.shape_cast %845 : vector<2x1xf32> to vector<2x1xf32>
    %852 = vector.broadcast %851 : vector<2x1xf32> to vector<2x64xf32>
    %853 = vector.shape_cast %848 : vector<2x1xf32> to vector<2x1xf32>
    %854 = vector.broadcast %853 : vector<2x1xf32> to vector<2x64xf32>
    %855 = arith.select %850, %852, %854 : vector<2x64xi1>, vector<2x64xf32>
    %cst_344 = arith.constant 3.125000e-02 : f32
    %856 = vector.broadcast %cst_344 : f32 to vector<2x64xf32>
    %857 = arith.mulf %855, %856 : vector<2x64xf32>
    %cst_345 = arith.constant 9.99999974E-6 : f32
    %858 = vector.broadcast %cst_345 : f32 to vector<2x64xf32>
    %859 = arith.addf %857, %858 : vector<2x64xf32>
    %860 = math.rsqrt %859 : vector<2x64xf32>
    %861 = arith.mulf %840, %860 : vector<2x64xf32>
    %862 = vector.broadcast %822 : vector<1x64xf32> to vector<2x64xf32>
    %863 = arith.mulf %861, %862 : vector<2x64xf32>
    %864 = vector.broadcast %823 : vector<1x64xf32> to vector<2x64xf32>
    %865 = arith.addf %863, %864 : vector<2x64xf32>
    %cst_346 = arith.constant 0.000000e+00 : f32
    %866 = vector.broadcast %cst_346 : f32 to vector<2x64xf32>
    %867 = arith.maximumf %865, %866 : vector<2x64xf32>
    %c11 = arith.constant 11 : index
    %c0_347 = arith.constant 0 : index
    %868 = vector.load %arg14[%c11, %c0_347] : memref<13x64xf32, #tpu.memory_space<vmem>>, vector<1x64xf32>
    %869 = vector.broadcast %868 : vector<1x64xf32> to vector<2x64xf32>
    %870 = arith.mulf %867, %869 : vector<2x64xf32>
    %871 = vector.broadcast %29 : vector<1x64xf32> to vector<2x64xf32>
    %872 = arith.mulf %870, %871 : vector<2x64xf32>
    %cst_348 = arith.constant dense<0.000000e+00> : vector<2xf32>
    %873 = vector.multi_reduction <add>, %872, %cst_348 [1] : vector<2x64xf32> to vector<2xf32>
    %874 = vector.shape_cast %873 : vector<2xf32> to vector<2x1xf32>
    %cst_349 = arith.constant dense<0.000000e+00> : vector<2xf32>
    %875 = vector.multi_reduction <add>, %870, %cst_349 [1] : vector<2x64xf32> to vector<2xf32>
    %876 = vector.shape_cast %875 : vector<2xf32> to vector<2x1xf32>
    %877 = arith.subf %876, %874 : vector<2x1xf32>
    %878 = tpu.iota {dimensions = array<i32: 1>} : vector<2x2xi32>
    %c0_i32_350 = arith.constant 0 : i32
    %879 = vector.broadcast %c0_i32_350 : i32 to vector<2x2xi32>
    %880 = arith.cmpi eq, %878, %879 : vector<2x2xi32>
    %881 = vector.shape_cast %874 : vector<2x1xf32> to vector<2x1xf32>
    %882 = vector.broadcast %881 : vector<2x1xf32> to vector<2x2xf32>
    %883 = vector.shape_cast %877 : vector<2x1xf32> to vector<2x1xf32>
    %884 = vector.broadcast %883 : vector<2x1xf32> to vector<2x2xf32>
    %885 = arith.select %880, %882, %884 : vector<2x2xi1>, vector<2x2xf32>
    %c12 = arith.constant 12 : index
    %c0_351 = arith.constant 0 : index
    %886 = vector.load %arg14[%c12, %c0_351] : memref<13x64xf32, #tpu.memory_space<vmem>>, vector<1x2xf32>
    %887 = vector.broadcast %886 : vector<1x2xf32> to vector<2x2xf32>
    %888 = arith.addf %885, %887 : vector<2x2xf32>
    %c0_352 = arith.constant 0 : index
    %c0_353 = arith.constant 0 : index
    %889 = vector.load %arg16[%c0_352, %c0_353] : memref<2x2xf32, #tpu.memory_space<vmem>>, vector<2x2xf32>
    tpu.vector_store %arg16[%c0_352, %c0_353], %888 {strides = array<i32>} : memref<2x2xf32, #tpu.memory_space<vmem>>, vector<2x2xf32>,
    return
  }
}

</mosaic_0001>

<bundles_post_ra>
// kernel: mamba_critic_forward.1
= control target key start
LH: loop header
LB: loop body
LE: loop exit
PB: predicated region body
PF: predicated region fallthrough
CT: control target
= control target key end

     0   :  { %s4955_s0 = inlined_call_operand.vmem [shape: bf16[16,16], index: 0, kind: input, shape index: {}]   ;;  %s4956_s1 = inlined_call_operand.vmem [shape: f32[2,2], index: 1, kind: input, shape index: {}]   ;;  %s4957_s2 = inlined_call_operand.vmem [shape: f32[2,1], index: 2, kind: input, shape index: {}]   ;;  %s4958_s3 = inlined_call_operand.vmem [shape: bf16[16,64], index: 3, kind: input, shape index: {}]   ;;  %s4959_s4 = inlined_call_operand.vmem [shape: bf16[4,64,256], index: 4, kind: input, shape index: {}]   ;;  %s4960_s5 = inlined_call_operand.vmem [shape: f32[4,4,128], index: 5, kind: input, shape index: {}]   ;;  %s4961_s6 = inlined_call_operand.hbm [shape: bf16[4,128,128], index: 6, kind: input, shape index: {}]   ;;  %s4962_s7 = inlined_call_operand.vmem [shape: bf16[4,128,64], index: 7, kind: input, shape index: {}]   ;;  %s4963_s8 = inlined_call_operand.vmem [shape: f32[2,16], index: 8, kind: input, shape index: {}]   ;;  %s4964_s9 = inlined_call_operand.vmem [shape: f32[1,16], index: 9, kind: input, shape index: {}]   ;;  %s4965_s10 = inlined_call_operand.vmem [shape: bf16[64,64], index: 10, kind: input, shape index: {}]   ;;  %s4966_s11 = inlined_call_operand.vmem [shape: bf16[16,64], index: 11, kind: input, shape index: {}]   ;;  %s4967_s12 = inlined_call_operand.vmem [shape: bf16[16,64], index: 12, kind: input, shape index: {}]   ;;  %s4968_s13 = inlined_call_operand.vmem [shape: bf16[64,64], index: 13, kind: input, shape index: {}]   ;;  %s4969_s14 = inlined_call_operand.vmem [shape: f32[13,64], index: 14, kind: input, shape index: {}]   ;;  %s4970_s15 = inlined_call_operand.vmem [shape: f32[4,7,256], index: 15, kind: input, shape index: {}]   ;;  %s4971_s16 = inlined_call_operand.vmem [shape: f32[2,2], index: 16, kind: output, shape index: {}]  }
   0x1   :  { %4979 = sst [smem:[#allocation5_spill]] %s4955_s0 }
   0x2   :  { %21 = vsyncpa [#allocation3], 0  ;;  %s38_s23 = sshll.u32 %s4961_s6, 4  ;;  %s3651_s24 = smov [#allocation2]   ;;  %s39_s23 = int_to_ptr.hbm [resolvable:$true] %s38_s23 }
   0x3   :  { %s40_s25 = sshll.u32 %s3651_s24, 4  ;;  %s3652_s26 = smov 64   ;;  %s41_s25 = int_to_ptr.vmem [resolvable:$true] %s40_s25 }
   0x4   :  { %s3653_s27 = smov 4  }
   0x5   :  { %46 = dma.hbm_to_vmem [thread:$0]  %s39_s23, 4096, %s41_s25, [#allocation3], %s3652_s26, %s3652_s26, %s3653_s27  }
   0x6   :  { %3649 = dma.done.wait [#allocation3], 4096  }
   0x7   :  { %3650 = vsyncadd [#allocation3], 4294963200  ;;  %v3325_v0 = vld [vmem:[%s4958_s3] sm:$0xff]  ;;  %s4980_s17 = sld [smem:[#allocation5_spill]]  ;;  %vm4972_vm0 = vcmask 130048   ;;  %v70_v2 = vlaneseq  ;;  %vm149_vm2 = vcmask 523264  }
   0x8   :  { %138 = vmatpush.bf16.msra.mxu0 %v3325_v0  ;;  %v3441_v4 = vld [vmem:[%s4969_s14] ss:$0 sm:$0xff]  ;;  %v3654_v6 = vmov 0.0   ;;  %v2783_v37 = vld [vmem:[%s4959_s4 + $0x30] sm:$0xf] }
   0x9   :  { %v3753_v3 = vand.u32 127, %v70_v2  ;;  %v3333_v38 = vld [vmem:[%s4959_s4 + $0x34] sm:$0xf0]  ;;  %v3332_v39 = vld [vmem:[%s4959_s4 + $0x34] sm:$0xf] }
   0xa   :  { %v2784_v40 = vor.u32 %v3333_v38, %v2783_v37  ;;  %v2785_v41 = vld [vmem:[%s4959_s4 + $0x38] sm:$0xf0]  ;;  %v2775_v43 = vld [vmem:[%s4959_s4 + $0x20] sm:$0xf]  ;;  %v3331_v44 = vld [vmem:[%s4959_s4 + $0x24] sm:$0xf0] }
   0xb   :  { %vm4977_vm1 = vcmp.lt.s32.totalorder %v3753_v3, 32  ;;  %v2788_v42 = vor.u32 %v3332_v39, %v2785_v41  ;;  %v3330_v45 = vld [vmem:[%s4959_s4 + $0x24] sm:$0xf]  ;;  %v2776_v46 = vor.u32 %v3331_v44, %v2775_v43  ;;  %v2777_v47 = vld [vmem:[%s4959_s4 + $0x28] sm:$0xf0] }
   0xc   :  { %v3762_v7 = vsel %vm4977_vm1, 1.0, %v3654_v6  ;;  %287 = vmatpush.bf16.msra.mxu1 %v2784_v40  ;;  %v2780_v50 = vor.u32 %v3330_v45, %v2777_v47  ;;  %v2767_v52 = vld [vmem:[%s4959_s4 + $0x10] sm:$0xf]  ;;  %v3329_v53 = vld [vmem:[%s4959_s4 + $0x14] sm:$0xf0] }
   0xd   :  { %v3324_v1 = vld [vmem:[%s4980_s17] sm:$0xff]  ;;  %301 = vmatpush.bf16.msra.mxu2 %v2788_v42  ;;  %v3328_v54 = vld [vmem:[%s4959_s4 + $0x14] sm:$0xf]  ;;  %v2768_v55 = vor.u32 %v3329_v53, %v2767_v52  ;;  %v2769_v56 = vld [vmem:[%s4959_s4 + $0x18] sm:$0xf0] }
   0xe   :  { %2756 = vmatmul.msk.bf16.vlgmr.msra.gmra.mxu0 %vm4972_vm0, %v3324_v1  ;;  %v2759_v57 = vld [vmem:[%s4959_s4] sm:$0xf]  ;;  %v3327_v58 = vld [vmem:[%s4959_s4 + $0x4] sm:$0xf0]  ;;  %v2772_v60 = vor.u32 %v3328_v54, %v2769_v56  ;;  %v3326_v61 = vld [vmem:[%s4959_s4 + $0x4] sm:$0xf] }
   0xf   :  { %v2761_v62 = vld [vmem:[%s4959_s4 + $0x8] sm:$0xf0]  ;;  %v2760_v0 = vor.u32 %v3327_v58, %v2759_v57  ;;  %v3338_v56 = vld [vmem:[#allocation2 + $0x20] sm:$0xff] }
  0x10   :  { %288 = vmatpush.bf16.msra.mxu1 %v2776_v46 }
  0x11   :  { %302 = vmatpush.bf16.msra.mxu2 %v2780_v50 }
  0x14   :  { %289 = vmatpush.bf16.msra.mxu1 %v2768_v55 }
  0x15   :  { %303 = vmatpush.bf16.msra.mxu2 %v2772_v60  ;;  %v3337_v60 = vld [vmem:[#allocation2 + $0x18] sm:$0xff] }
  0x18   :  { %290 = vmatpush.bf16.msra.mxu1 %v2760_v0 }
  0x8b   :  { %v140_v5 = vpop.f32.mrf.mxu0 }
  0x8c   :  { %v141_v8 = vadd.f32 %v3441_v4, %v140_v5 }
  0x8e   :  { %v156_v9 = vsel %vm149_vm2, %v141_v8, 0.0  ;;  %v147_v10 = vmul.f32 %v3762_v7, %v141_v8 }
  0x8f   :  { %157 = vadd.xlane.f32.xlu1 %v156_v9 }
  0x90   :  { %v150_v11 = vsel %vm149_vm2, %v147_v10, 0.0 }
  0x91   :  { %151 = vadd.xlane.f32.xlu0 %v150_v11 }
  0x93   :  { %v142_v12 = vpop.f32.mrf.mxu0 }
  0x94   :  { %v143_v13 = vadd.f32 %v3441_v4, %v142_v12  ;;  %v2764_v4 = vor.u32 %v3326_v61, %v2761_v62 }
  0x96   :  { %v159_v14 = vsel %vm149_vm2, %v143_v13, 0.0  ;;  %v148_v15 = vmul.f32 %v3762_v7, %v143_v13  ;;  %304 = vmatpush.bf16.msra.mxu2 %v2764_v4 }
  0x97   :  { %160 = vadd.xlane.f32.xlu1 %v159_v14 }
  0x98   :  { %v153_v16 = vsel %vm149_vm2, %v148_v15, 0.0 }
  0x99   :  { %154 = vadd.xlane.f32.xlu0 %v153_v16 }
 0x102   :  { %v158_v17 = vpop.xlane.xlu1 %157 }
 0x104   :  { %v152_v18 = vpop.xlane.xlu0 %151 }
 0x105   :  { %v162_v19 = vsub.f32 %v158_v17, %v152_v18 }
 0x107   :  { %v165_v20 = vsel %vm4977_vm1, %v152_v18, %v162_v19 }
 0x108   :  { %v167_v21 = vmul.f32 0.03125, %v165_v20 }
 0x10a   :  { %v3772_v22 = vsub.f32 %v141_v8, %v167_v21  ;;  %v161_v23 = vpop.xlane.xlu1 %160 }
 0x10c   :  { %v155_v24 = vpop.xlane.xlu0 %154  ;;  %v171_v25 = vmul.f32 %v3772_v22, %v3772_v22 }
 0x10d   :  { %v163_v26 = vsub.f32 %v161_v23, %v155_v24 }
 0x10e   :  { %v181_v27 = vsel %vm149_vm2, %v171_v25, 0.0  ;;  %v173_v28 = vmul.f32 %v3762_v7, %v171_v25 }
 0x10f   :  { %v166_v29 = vsel %vm4977_vm1, %v155_v24, %v163_v26  ;;  %182 = vadd.xlane.f32.xlu0 %v181_v27  ;;  %v3442_v26 = vld [vmem:[%s4969_s14 + $0x1] ss:$0 sm:$0xff] }
 0x110   :  { %v168_v30 = vmul.f32 0.03125, %v166_v29  ;;  %v175_v31 = vsel %vm149_vm2, %v173_v28, 0.0 }
 0x111   :  { %176 = vadd.xlane.f32.xlu2 %v175_v31 }
 0x112   :  { %v3781_v32 = vsub.f32 %v143_v13, %v168_v30  ;;  %v3443_v30 = vld [vmem:[%s4969_s14 + $0x2] ss:$0 sm:$0xff] }
 0x114   :  { %v172_v33 = vmul.f32 %v3781_v32, %v3781_v32 }
 0x116   :  { %v184_v34 = vsel %vm149_vm2, %v172_v33, 0.0  ;;  %v174_v35 = vmul.f32 %v3762_v7, %v172_v33 }
 0x117   :  { %185 = vadd.xlane.f32.xlu1 %v184_v34 }
 0x118   :  { %v178_v36 = vsel %vm149_vm2, %v174_v35, 0.0 }
 0x119   :  { %179 = vadd.xlane.f32.xlu2 %v178_v36 }
 0x182   :  { %v183_v48 = vpop.xlane.xlu0 %182 }
 0x184   :  { %v177_v49 = vpop.xlane.xlu2 %176 }
 0x185   :  { %v187_v51 = vsub.f32 %v183_v48, %v177_v49  ;;  %v3341_v48 = vld [vmem:[#allocation2 + $0x38] sm:$0xff] }
 0x186   :  { %515 = vmatpush.bf16.msra.mxu3 %v3341_v48 }
 0x187   :  { %v189_v59 = vsel %vm4977_vm1, %v177_v49, %v187_v51  ;;  %v3340_v49 = vld [vmem:[#allocation2 + $0x30] sm:$0xff]  ;;  %v3339_v51 = vld [vmem:[#allocation2 + $0x28] sm:$0xff] }
 0x188   :  { %v191_v63 = vmul.f32 0.03125, %v189_v59 }
 0x18a   :  { %v193_v1 = vadd.f32 1e-05, %v191_v63  ;;  %v186_v5 = vpop.xlane.xlu1 %185  ;;  %516 = vmatpush.bf16.msra.mxu3 %v3340_v49  ;;  %v3867_v63 = vshrl.u32 %v70_v2, 7  ;;  %v3444_v2 = vld [vmem:[%s4960_s5 + $0x3] ss:$0 sm:$0xff] }
 0x18c   :  { %3473 = vrsqrt.f32 %v193_v1  ;;  %v180_v8 = vpop.xlane.xlu2 %179  ;;  %vm201_vm4 = vweird.f32 %v193_v1 }
 0x18d   :  { %v188_v9 = vsub.f32 %v186_v5, %v180_v8  ;;  %v3336_v5 = vld [vmem:[#allocation2 + $0x10] sm:$0xff] }
 0x18e   :  { %517 = vmatpush.bf16.msra.mxu3 %v3339_v51  ;;  %v3447_v51 = vld [vmem:[%s4960_s5] ss:$0 sm:$0xff] }
 0x18f   :  { %v190_v10 = vsel %vm4977_vm1, %v180_v8, %v188_v9 }
 0x190   :  { %v192_v11 = vmul.f32 0.03125, %v190_v10 }
 0x192   :  { %v3474_v12 = vpop.eup %3473  ;;  %v194_v13 = vadd.f32 1e-05, %v192_v11  ;;  %518 = vmatpush.bf16.msra.mxu3 %v3338_v56  ;;  %v72_v11 = vadd.s32 8, %v3867_v63 }
 0x193   :  { %v196_v14 = vmul.f32 %v3474_v12, %v193_v1  ;;  %vm202_vm3 = vweird.f32 %v3474_v12 }
 0x194   :  { %3475 = vrsqrt.f32 %v194_v13  ;;  %vm203_vm5 = vmor %vm201_vm4, %vm202_vm3  ;;  %vm211_vm7 = vweird.f32 %v194_v13  ;;  %vm361_vm4 = vcmp.lt.s32.totalorder %v3867_v63, 1 }
 0x195   :  { %v197_v15 = vmul.f32 %v3474_v12, %v196_v14  ;;  %v3335_v14 = vld [vmem:[#allocation2 + $0x8] sm:$0xff] }
 0x196   :  { %519 = vmatpush.bf16.msra.mxu3 %v3337_v60 }
 0x197   :  { %v198_v16 = vmul.f32 0.5, %v197_v15 }
 0x199   :  { %v199_v17 = vsub.f32 1.5, %v198_v16 }
 0x19a   :  { %v3476_v18 = vpop.eup %3475  ;;  %520 = vmatpush.bf16.msra.mxu3 %v3336_v5 }
 0x19b   :  { %v200_v19 = vmul.f32 %v3474_v12, %v199_v17  ;;  %v206_v20 = vmul.f32 %v3476_v18, %v194_v13  ;;  %vm212_vm6 = vweird.f32 %v3476_v18  ;;  %v3874_v17 = vand.u32 7, %v3867_v63 }
 0x19c   :  { %vm213_vm8 = vmor %vm211_vm7, %vm212_vm6  ;;  %vm378_vm6 = vcmp.lt.s32.totalorder %v3867_v63, 2 }
 0x19d   :  { %v204_v21 = vsel %vm203_vm5, %v3474_v12, %v200_v19  ;;  %v207_v23 = vmul.f32 %v3476_v18, %v206_v20  ;;  %v3876_v19 = vand.u32 7, %v72_v11  ;;  %vm99_vm5 = vcmp.ge.s32.totalorder %v3874_v17, 1 }
 0x19e   :  { %v215_v25 = vmul.f32 %v204_v21, %v3772_v22  ;;  %521 = vmatpush.bf16.msra.mxu3 %v3335_v14 }
 0x19f   :  { %v208_v24 = vmul.f32 0.5, %v207_v23  ;;  %v3334_v23 = vld [vmem:[#allocation2] sm:$0xff]  ;;  %vm100_vm7 = vcmp.ge.s32.totalorder %v3876_v19, 1 }
 0x1a0   :  { %v218_v29 = vmul.f32 %v3442_v26, %v215_v25 }
 0x1a1   :  { %v209_v27 = vsub.f32 1.5, %v208_v24 }
 0x1a2   :  { %v3848_v35 = vadd.f32 %v3443_v30, %v218_v29  ;;  %522 = vmatpush.bf16.msra.mxu3 %v3334_v23 }
 0x1a3   :  { %v210_v28 = vmul.f32 %v3476_v18, %v209_v27 }
 0x1a4   :  { %v223_v36 = vmax.f32 %v3848_v35, 0.0 }
 0x1a5   :  { %v214_v31 = vsel %vm213_vm8, %v3476_v18, %v210_v28  ;;  %vm4978_vm8 = vcmp.ge.s32.totalorder %v3874_v17, 2 }
 0x1a6   :  { %v216_v33 = vmul.f32 %v214_v31, %v3781_v32  ;;  %v3863_v32 = vld [vmem:[%s4970_s15] ss:$8 sm:$0x3]  ;;  %v3445_v31 = vld [vmem:[%s4960_s5 + $0x2] ss:$0 sm:$0xff] }
 0x1a7   :  { %v236_v39 = vperm.slane %v3863_v32, 0 }
 0x1a8   :  { %v219_v34 = vmul.f32 %v3442_v26, %v216_v33  ;;  %v355_v26 = vld [vmem:[%s4970_s15 + $0x1] ss:$0 sm:$0xff] }
 0x1aa   :  { %v3850_v22 = vadd.f32 %v3443_v30, %v219_v34 }
 0x1ac   :  { %v224_v37 = vmax.f32 %v3850_v22, 0.0 }
 0x1ae   :  { %v233_v38 = vpack.c.bf16 %v224_v37, %v223_v36 }
 0x1b0   :  { %2789 = vmatmul.msk.bf16.vlgmr.msra.gmra.mxu1 %vm149_vm2, %v233_v38  ;;  %2790 = vmatmul.msk.bf16.vlgmr.msra.gmra.mxu2 %vm149_vm2, %v233_v38  ;;  %v3446_v38 = vld [vmem:[%s4960_s5 + $0x1] ss:$0 sm:$0xff] }
 0x22d   :  { %v292_v40 = vpop.f32.mrf.mxu1 }
 0x22e   :  { %v293_v41 = vadd.f32 %v292_v40, %v236_v39 }
 0x230   :  { %v2791_v42 = vmul.f32 -1.442695, %v293_v41 }
 0x232   :  { %3477 = vpow2.f32 %v2791_v42 }
 0x235   :  { %v294_v43 = vpop.f32.mrf.mxu1 }
 0x236   :  { %v295_v44 = vadd.f32 %v294_v43, %v236_v39 }
 0x238   :  { %v3478_v45 = vpop.eup %3477  ;;  %v2792_v46 = vmul.f32 -1.442695, %v295_v44 }
 0x239   :  { %v317_v47 = vadd.f32 1.0, %v3478_v45 }
 0x23a   :  { %3479 = vpow2.f32 %v2792_v46 }
 0x23b   :  { %3481 = vrcp.f32 %v317_v47  ;;  %v330_v59 = vand.u32 2147483648, %v317_v47  ;;  %vm324_vm10 = vweird.f32 %v317_v47  ;;  %v328_v61 = vand.u32 2147483647, %v317_v47 }
 0x23d   :  { %v331_v4 = vor.u32 1.1754944e-38, %v330_v59  ;;  %vm329_vm12 = vcmp.eq.f32.partialorder %v328_v61, 8.507059e+37 }
 0x240   :  { %v3480_v50 = vpop.eup %3479 }
 0x241   :  { %v3482_v52 = vpop.eup %3481  ;;  %v318_v54 = vadd.f32 1.0, %v3480_v50 }
 0x242   :  { %v320_v53 = vmul.f32 %v3482_v52, %v317_v47  ;;  %vm325_vm9 = vweird.f32 %v3482_v52 }
 0x243   :  { %3483 = vrcp.f32 %v318_v54  ;;  %vm326_vm11 = vmor %vm324_vm10, %vm325_vm9  ;;  %v345_v10 = vand.u32 2147483648, %v318_v54  ;;  %v343_v13 = vand.u32 2147483647, %v318_v54  ;;  %vm339_vm14 = vweird.f32 %v318_v54 }
 0x244   :  { %v321_v55 = vsub.f32 1.0, %v320_v53  ;;  %vm102_vm9 = vcmp.ge.s32.totalorder %v3876_v19, 2  ;;  %vm4974_vm10 = vcmp.ge.s32.totalorder %v3874_v17, 3 }
 0x245   :  { %v346_v18 = vor.u32 1.1754944e-38, %v345_v10  ;;  %vm344_vm3 = vcmp.eq.f32.partialorder %v343_v13, 8.507059e+37 }
 0x246   :  { %v322_v57 = vmul.f32 %v3482_v52, %v321_v55 }
 0x248   :  { %v323_v58 = vadd.f32 %v3482_v52, %v322_v57 }
 0x249   :  { %v3484_v62 = vpop.eup %3483 }
 0x24a   :  { %v327_v0 = vsel %vm326_vm11, %v3482_v52, %v323_v58  ;;  %v335_v1 = vmul.f32 %v3484_v62, %v318_v54  ;;  %vm340_vm13 = vweird.f32 %v3484_v62  ;;  %vm4973_vm11 = vcmp.ge.s32.totalorder %v3876_v19, 3 }
 0x24b   :  { %v332_v9 = vsel %vm329_vm12, %v331_v4, %v327_v0  ;;  %vm341_vm15 = vmor %vm339_vm14, %vm340_vm13  ;;  %vm4975_vm12 = vcmp.lt.s32.totalorder %v3867_v63, 3 }
 0x24c   :  { %v336_v8 = vsub.f32 1.0, %v335_v1  ;;  %v349_v15 = vmul.f32 %v332_v9, %v293_v41 }
 0x24e   :  { %v337_v12 = vmul.f32 %v3484_v62, %v336_v8  ;;  %v353_v24 = vmul.f32 %v3444_v2, %v349_v15  ;;  %v359_v27 = vrot.slane %v349_v15, 7  ;;  %v376_v33 = vrot.slane %v349_v15, 6 }
 0x24f   :  { %v393_v40 = vrot.slane %v349_v15, 5 }
 0x250   :  { %v338_v16 = vadd.f32 %v3484_v62, %v337_v12  ;;  %v356_v39 = vadd.f32 %v355_v26, %v353_v24 }
 0x252   :  { %v342_v20 = vsel %vm341_vm15, %v3484_v62, %v338_v16 }
 0x253   :  { %v347_v21 = vsel %vm344_vm3, %v346_v18, %v342_v20 }
 0x254   :  { %v350_v25 = vmul.f32 %v347_v21, %v295_v44 }
 0x256   :  { %v354_v28 = vmul.f32 %v3444_v2, %v350_v25  ;;  %v360_v29 = vrot.slane %v350_v25, 7  ;;  %v377_v30 = vrot.slane %v350_v25, 6  ;;  %v394_v34 = vrot.slane %v350_v25, 5 }
 0x258   :  { %v362_v41 = vsel %vm361_vm4, %v359_v27, %v360_v29  ;;  %v363_v42 = vsel %vm361_vm4, %v360_v29, %v359_v27  ;;  %v357_v43 = vadd.f32 %v355_v26, %v354_v28  ;;  %v379_v46 = vsel %vm378_vm6, %v376_v33, %v377_v30 }
 0x259   :  { %v368_v44 = vsel %vm99_vm5, %v363_v42, 0.0  ;;  %v369_v45 = vsel %vm100_vm7, %v362_v41, 0.0  ;;  %v380_v49 = vsel %vm378_vm6, %v377_v30, %v376_v33  ;;  %v386_v50 = vsel %vm102_vm9, %v379_v46, 0.0  ;;  %v3349_v46 = vld [vmem:[%s4962_s7 + $0x38] sm:$0xff] }
 0x25a   :  { %v371_v47 = vmul.f32 %v3445_v31, %v368_v44  ;;  %v372_v48 = vmul.f32 %v3445_v31, %v369_v45  ;;  %v385_v52 = vsel %vm4978_vm8, %v380_v49, 0.0  ;;  %v389_v53 = vmul.f32 %v3446_v38, %v386_v50  ;;  %v466_v45 = vld [vmem:[%s4970_s15 + $0x2] ss:$0 sm:$0xff]  ;;  %697 = vmatpush.bf16.msrb.mxu0 %v3349_v46 }
 0x25b   :  { %v396_v54 = vsel %vm4975_vm12, %v393_v40, %v394_v34  ;;  %v397_v55 = vsel %vm4975_vm12, %v394_v34, %v393_v40  ;;  %v388_v58 = vmul.f32 %v3446_v38, %v385_v52  ;;  %v237_v44 = vperm.slane %v3863_v32, 1  ;;  %v3348_v32 = vld [vmem:[%s4962_s7 + $0x30] sm:$0xff] }
 0x25c   :  { %v373_v56 = vadd.f32 %v371_v47, %v356_v39  ;;  %v374_v57 = vadd.f32 %v372_v48, %v357_v43  ;;  %v402_v59 = vsel %vm4974_vm10, %v397_v55, 0.0  ;;  %v403_v60 = vsel %vm4973_vm11, %v396_v54, 0.0  ;;  %v306_v43 = vpop.f32.mrf.mxu2 }
 0x25d   :  { %v405_v0 = vmul.f32 %v3447_v51, %v402_v59  ;;  %v406_v1 = vmul.f32 %v3447_v51, %v403_v60  ;;  %v3936_v50 = vadd.f32 %v306_v43, %v237_v44 }
 0x25e   :  { %v390_v61 = vadd.f32 %v388_v58, %v373_v56  ;;  %v391_v62 = vadd.f32 %v389_v53, %v374_v57  ;;  %698 = vmatpush.bf16.msrb.mxu0 %v3348_v32  ;;  %v3347_v53 = vld [vmem:[%s4962_s7 + $0x28] sm:$0xff]  ;;  %v3346_v58 = vld [vmem:[%s4962_s7 + $0x20] sm:$0xff] }
 0x25f   :  { %v2827_v54 = vmul.f32 -1.442695, %v3936_v50 }
 0x260   :  { %v407_v4 = vadd.f32 %v405_v0, %v390_v61  ;;  %v408_v5 = vadd.f32 %v406_v1, %v391_v62  ;;  %v3345_v62 = vld [vmem:[%s4962_s7 + $0x18] sm:$0xff] }
 0x262   :  { %v2793_v8 = vmul.f32 -1.442695, %v407_v4  ;;  %v2794_v9 = vmul.f32 -1.442695, %v408_v5  ;;  %699 = vmatpush.bf16.msrb.mxu0 %v3347_v53 }
 0x264   :  { %3485 = vpow2.f32 %v2793_v8  ;;  %v308_v47 = vpop.f32.mrf.mxu2 }
 0x265   :  { %3487 = vpow2.f32 %v2794_v9  ;;  %v3938_v51 = vadd.f32 %v308_v47, %v237_v44 }
 0x266   :  { %700 = vmatpush.bf16.msrb.mxu0 %v3346_v58 }
 0x267   :  { %v2828_v55 = vmul.f32 -1.442695, %v3938_v51 }
 0x26a   :  { %v3486_v10 = vpop.eup %3485  ;;  %701 = vmatpush.bf16.msrb.mxu0 %v3345_v62 }
 0x26b   :  { %v3488_v11 = vpop.eup %3487  ;;  %v415_v12 = vadd.f32 1.0, %v3486_v10 }
 0x26c   :  { %v416_v13 = vadd.f32 1.0, %v3488_v11 }
 0x26d   :  { %3489 = vrcp.f32 %v415_v12  ;;  %v428_v20 = vand.u32 2147483648, %v415_v12  ;;  %v426_v24 = vand.u32 2147483647, %v415_v12  ;;  %vm422_vm15 = vweird.f32 %v415_v12 }
 0x26e   :  { %3491 = vrcp.f32 %v416_v13  ;;  %v443_v25 = vand.u32 2147483648, %v416_v13  ;;  %v441_v27 = vand.u32 2147483647, %v416_v13  ;;  %vm437_vm0 = vweird.f32 %v416_v13 }
 0x26f   :  { %v429_v29 = vor.u32 1.1754944e-38, %v428_v20  ;;  %vm427_vm11 = vcmp.eq.f32.partialorder %v426_v24, 8.507059e+37 }
 0x270   :  { %v444_v33 = vor.u32 1.1754944e-38, %v443_v25  ;;  %vm442_vm12 = vcmp.eq.f32.partialorder %v441_v27, 8.507059e+37 }
 0x273   :  { %v3490_v14 = vpop.eup %3489 }
 0x274   :  { %v3492_v15 = vpop.eup %3491  ;;  %v418_v2 = vmul.f32 %v3490_v14, %v415_v12  ;;  %vm423_vm13 = vweird.f32 %v3490_v14  ;;  %v3343_v12 = vld [vmem:[%s4962_s7 + $0x8] sm:$0xff] }
 0x275   :  { %v433_v16 = vmul.f32 %v3492_v15, %v416_v13  ;;  %vm438_vm14 = vweird.f32 %v3492_v15  ;;  %vm424_vm3 = vmor %vm422_vm15, %vm423_vm13 }
 0x276   :  { %v419_v18 = vsub.f32 1.0, %v418_v2  ;;  %vm439_vm10 = vmor %vm437_vm0, %vm438_vm14  ;;  %vm97_vm0 = vcmp.eq.s32.totalorder %v3874_v17, 0 }
 0x277   :  { %v434_v21 = vsub.f32 1.0, %v433_v16 }
 0x278   :  { %v420_v23 = vmul.f32 %v3490_v14, %v419_v18 }
 0x279   :  { %v435_v26 = vmul.f32 %v3492_v15, %v434_v21 }
 0x27a   :  { %v421_v28 = vadd.f32 %v3490_v14, %v420_v23 }
 0x27b   :  { %v436_v30 = vadd.f32 %v3492_v15, %v435_v26 }
 0x27c   :  { %v425_v31 = vsel %vm424_vm3, %v3490_v14, %v421_v28  ;;  %v3342_v14 = vld [vmem:[%s4962_s7] sm:$0xff]  ;;  %vm577_vm3 = vcmp.lt.s32.totalorder %v3867_v63, 4 }
 0x27d   :  { %v430_v34 = vsel %vm427_vm11, %v429_v29, %v425_v31  ;;  %v440_v38 = vsel %vm439_vm10, %v3492_v15, %v436_v30  ;;  %vm4976_vm10 = vcmp.eq.s32.totalorder %v3876_v19, 0 }
 0x27e   :  { %v445_v39 = vsel %vm442_vm12, %v444_v33, %v440_v38  ;;  %v3923_v40 = vmul.f32 %v430_v34, %v407_v4  ;;  %v3344_v4 = vld [vmem:[%s4962_s7 + $0x10] sm:$0xff] }
 0x27f   :  { %v3925_v41 = vmul.f32 %v445_v39, %v408_v5  ;;  %702 = vmatpush.bf16.msrb.mxu0 %v3344_v4 }
 0x281   :  { %v465_v42 = vpack.c.bf16 %v3925_v41, %v3923_v40 }
 0x283   :  { %523 = vmatmul.bf16.vlgmr.msra.gmra.mxu3 %v465_v42  ;;  %703 = vmatpush.bf16.msrb.mxu0 %v3343_v12 }
 0x287   :  { %704 = vmatpush.bf16.msrb.mxu0 %v3342_v14 }
 0x306   :  { %v524_v48 = vpop.f32.mrf.mxu3 }
 0x307   :  { %v525_v49 = vadd.f32 %v524_v48, %v466_v45 }
 0x309   :  { %v529_v52 = vmul.f32 1.442695, %v525_v49 }
 0x30b   :  { %3493 = vpow2.f32 %v529_v52 }
 0x30c   :  { %3495 = vpow2.f32 %v2827_v54 }
 0x30d   :  { %3497 = vpow2.f32 %v2828_v55 }
 0x30e   :  { %v526_v56 = vpop.f32.mrf.mxu3 }
 0x30f   :  { %v527_v57 = vadd.f32 %v526_v56, %v466_v45 }
 0x311   :  { %v3494_v59 = vpop.eup %3493  ;;  %v531_v60 = vmul.f32 1.442695, %v527_v57 }
 0x312   :  { %v533_v61 = vadd.f32 2.0, %v3494_v59  ;;  %v3496_v0 = vpop.eup %3495 }
 0x313   :  { %3499 = vpow2.f32 %v531_v60  ;;  %v3498_v1 = vpop.eup %3497  ;;  %v3957_v8 = vadd.f32 1.0, %v3496_v0 }
 0x314   :  { %3501 = vrcp.f32 %v533_v61  ;;  %v3959_v10 = vadd.f32 1.0, %v3498_v1 }
 0x315   :  { %vm602_vm11 = vweird.f32 %v3957_v8  ;;  %v608_v58 = vand.u32 2147483648, %v3957_v8  ;;  %v606_v12 = vand.u32 2147483647, %v3957_v8 }
 0x316   :  { %v623_v0 = vand.u32 2147483648, %v3959_v10  ;;  %vm617_vm15 = vweird.f32 %v3959_v10 }
 0x319   :  { %v3500_v5 = vpop.eup %3499 }
 0x31a   :  { %v3502_v9 = vpop.eup %3501  ;;  %v534_v11 = vadd.f32 2.0, %v3500_v5 }
 0x31b   :  { %v541_v13 = vsel %vm97_vm0, 0.0, %v3502_v9 }
 0x31c   :  { %3503 = vrcp.f32 %v534_v11  ;;  %v543_v15 = vsub.f32 1.0, %v541_v13  ;;  %v555_v28 = vrot.slane %v541_v13, 7 }
 0x31d   :  { %3505 = vrcp.f32 %v3957_v8 }
 0x31e   :  { %3507 = vrcp.f32 %v3959_v10  ;;  %v545_v21 = vmul.f32 %v543_v15, %v3923_v40 }
 0x320   :  { %v547_v29 = vrot.slane %v545_v21, 7 }
 0x322   :  { %v3504_v2 = vpop.eup %3503 }
 0x323   :  { %v3973_v16 = vpop.eup %3505  ;;  %v542_v18 = vsel %vm4976_vm10, 0.0, %v3504_v2 }
 0x324   :  { %v3977_v20 = vpop.eup %3507  ;;  %v544_v23 = vsub.f32 1.0, %v542_v18  ;;  %v556_v24 = vrot.slane %v542_v18, 7  ;;  %v598_v26 = vmul.f32 %v3973_v16, %v3957_v8  ;;  %vm603_vm12 = vweird.f32 %v3973_v16 }
 0x325   :  { %v613_v27 = vmul.f32 %v3977_v20, %v3959_v10  ;;  %vm618_vm13 = vweird.f32 %v3977_v20  ;;  %vm4012_vm14 = vmor %vm602_vm11, %vm603_vm12  ;;  %vm607_vm11 = vcmp.eq.f32.partialorder %v606_v12, 8.507059e+37 }
 0x326   :  { %v546_v25 = vmul.f32 %v544_v23, %v3925_v41  ;;  %v557_v31 = vsel %vm361_vm4, %v555_v28, %v556_v24  ;;  %v558_v33 = vsel %vm361_vm4, %v556_v24, %v555_v28  ;;  %v599_v39 = vsub.f32 1.0, %v598_v26  ;;  %vm4020_vm10 = vmor %vm617_vm15, %vm618_vm13 }
 0x327   :  { %v614_v42 = vsub.f32 1.0, %v613_v27  ;;  %v560_v45 = vmul.f32 %v557_v31, %v542_v18  ;;  %v559_v46 = vmul.f32 %v558_v33, %v541_v13  ;;  %v609_v24 = vor.u32 1.1754944e-38, %v608_v58  ;;  %v584_v27 = vld [vmem:[%s4970_s15 + $0x3] ss:$0 sm:$0xff] }
 0x328   :  { %v548_v30 = vrot.slane %v546_v25, 7  ;;  %v600_v49 = vmul.f32 %v3973_v16, %v599_v39  ;;  %v585_v33 = vmul.f32 %v584_v27, %v3923_v40 }
 0x329   :  { %v615_v52 = vmul.f32 %v3977_v20, %v614_v42  ;;  %v570_v54 = vrot.slane %v560_v45, 6  ;;  %v569_v55 = vrot.slane %v559_v46, 6 }
 0x32a   :  { %v549_v34 = vsel %vm361_vm4, %v547_v29, %v548_v30  ;;  %v550_v38 = vsel %vm361_vm4, %v548_v30, %v547_v29  ;;  %v601_v61 = vadd.f32 %v3973_v16, %v600_v49 }
 0x32b   :  { %v552_v43 = vmul.f32 %v549_v34, %v542_v18  ;;  %v551_v44 = vmul.f32 %v550_v38, %v541_v13  ;;  %v616_v62 = vadd.f32 %v3977_v20, %v615_v52  ;;  %v571_v5 = vsel %vm378_vm6, %v569_v55, %v570_v54 }
 0x32c   :  { %v572_v9 = vsel %vm378_vm6, %v570_v54, %v569_v55  ;;  %v621_v13 = vand.u32 2147483647, %v3959_v10  ;;  %v605_v18 = vsel %vm4012_vm14, %v3973_v16, %v601_v61  ;;  %v574_v23 = vmul.f32 %v571_v5, %v560_v45 }
 0x32d   :  { %v553_v47 = vadd.f32 %v551_v44, %v545_v21  ;;  %v554_v48 = vadd.f32 %v552_v43, %v546_v25  ;;  %v620_v8 = vsel %vm4020_vm10, %v3977_v20, %v616_v62  ;;  %v573_v21 = vmul.f32 %v572_v9, %v559_v46 }
 0x32e   :  { %v624_v10 = vor.u32 1.1754944e-38, %v623_v0  ;;  %vm622_vm12 = vcmp.eq.f32.partialorder %v621_v13, 8.507059e+37  ;;  %v610_v29 = vsel %vm607_vm11, %v609_v24, %v605_v18  ;;  %v586_v34 = vmul.f32 %v584_v27, %v3925_v41  ;;  %v3357_v18 = vld [vmem:[%s4959_s4 + $0x74] sm:$0xf0] }
 0x32f   :  { %v561_v32 = vrot.slane %v553_v47, 6  ;;  %v562_v53 = vrot.slane %v554_v48, 6  ;;  %v627_v38 = vmul.f32 %v610_v29, %v3936_v50  ;;  %v2890_v29 = vld [vmem:[%s4959_s4 + $0x68] sm:$0xf0] }
 0x330   :  { %v625_v20 = vsel %vm622_vm12, %v624_v10, %v620_v8  ;;  %v3356_v8 = vld [vmem:[%s4959_s4 + $0x74] sm:$0xf]  ;;  %v2888_v10 = vld [vmem:[%s4959_s4 + $0x60] sm:$0xf] }
 0x331   :  { %v563_v56 = vsel %vm378_vm6, %v561_v32, %v562_v53  ;;  %v564_v57 = vsel %vm378_vm6, %v562_v53, %v561_v32  ;;  %v628_v39 = vmul.f32 %v625_v20, %v3938_v51 }
 0x332   :  { %v565_v59 = vmul.f32 %v564_v57, %v559_v46  ;;  %v566_v60 = vmul.f32 %v563_v56, %v560_v45 }
 0x334   :  { %v567_v1 = vadd.f32 %v565_v59, %v553_v47  ;;  %v568_v4 = vadd.f32 %v566_v60, %v554_v48  ;;  %v648_v47 = vld [vmem:[%s4970_s15 + $0x4] ss:$0 sm:$0xff] }
 0x336   :  { %v575_v15 = vrot.slane %v567_v1, 4  ;;  %v576_v2 = vrot.slane %v568_v4, 4 }
 0x338   :  { %v578_v25 = vsel %vm577_vm3, %v575_v15, %v576_v2  ;;  %v579_v26 = vsel %vm577_vm3, %v576_v2, %v575_v15  ;;  %v2896_v2 = vld [vmem:[%s4959_s4 + $0x70] sm:$0xf] }
 0x339   :  { %v580_v16 = vmul.f32 %v579_v26, %v573_v21  ;;  %v581_v28 = vmul.f32 %v578_v25, %v574_v23  ;;  %v2897_v21 = vor.u32 %v3357_v18, %v2896_v2  ;;  %v2898_v23 = vld [vmem:[%s4959_s4 + $0x78] sm:$0xf0]  ;;  %v3355_v25 = vld [vmem:[%s4959_s4 + $0x64] sm:$0xf0]  ;;  %v3354_v26 = vld [vmem:[%s4959_s4 + $0x64] sm:$0xf] }
 0x33a   :  { %v2901_v24 = vor.u32 %v3356_v8, %v2898_v23 }
 0x33b   :  { %v582_v30 = vadd.f32 %v580_v16, %v567_v1  ;;  %v583_v31 = vadd.f32 %v581_v28, %v568_v4  ;;  %851 = vmatpush.bf16.msrb.mxu1 %v2897_v21  ;;  %v2889_v28 = vor.u32 %v3355_v25, %v2888_v10 }
 0x33c   :  { %865 = vmatpush.bf16.msrb.mxu2 %v2901_v24 }
 0x33d   :  { %v587_v42 = vadd.f32 %v585_v33, %v582_v30  ;;  %v588_v43 = vadd.f32 %v586_v34, %v583_v31  ;;  %v2893_v30 = vor.u32 %v3354_v26, %v2890_v29  ;;  %v2880_v31 = vld [vmem:[%s4959_s4 + $0x50] sm:$0xf]  ;;  %v3353_v33 = vld [vmem:[%s4959_s4 + $0x54] sm:$0xf0]  ;;  %v3352_v34 = vld [vmem:[%s4959_s4 + $0x54] sm:$0xf] }
 0x33e   :  { %v3364_v29 = vld [vmem:[#allocation2 + $0x70] sm:$0xff] }
 0x33f   :  { %v629_v44 = vmul.f32 %v627_v38, %v587_v42  ;;  %v630_v45 = vmul.f32 %v628_v39, %v588_v43  ;;  %852 = vmatpush.bf16.msrb.mxu1 %v2889_v28  ;;  %v2881_v39 = vor.u32 %v3353_v33, %v2880_v31  ;;  %v2882_v42 = vld [vmem:[%s4959_s4 + $0x58] sm:$0xf0]  ;;  %v2872_v43 = vld [vmem:[%s4959_s4 + $0x40] sm:$0xf] }
 0x340   :  { %866 = vmatpush.bf16.msrb.mxu2 %v2893_v30  ;;  %v3365_v28 = vld [vmem:[#allocation2 + $0x78] sm:$0xff] }
 0x341   :  { %v647_v46 = vpack.c.bf16 %v630_v45, %v629_v44  ;;  %v3351_v44 = vld [vmem:[%s4959_s4 + $0x44] sm:$0xf0] }
 0x343   :  { %705 = vmatmul.bf16.vlgmr.msrb.gmra.mxu0 %v647_v46  ;;  %v2885_v46 = vor.u32 %v3352_v34, %v2882_v42  ;;  %853 = vmatpush.bf16.msrb.mxu1 %v2881_v39  ;;  %v3363_v34 = vld [vmem:[#allocation2 + $0x68] sm:$0xff]  ;;  %v3362_v42 = vld [vmem:[#allocation2 + $0x60] sm:$0xff] }
 0x345   :  { %867 = vmatpush.bf16.msrb.mxu2 %v2885_v46 }
 0x3c0   :  { %v706_v48 = vpop.f32.mrf.mxu0 }
 0x3c1   :  { %v707_v49 = vadd.f32 %v706_v48, %v648_v47  ;;  %v2874_v48 = vld [vmem:[%s4959_s4 + $0x48] sm:$0xf0] }
 0x3c3   :  { %v711_v40 = vadd.f32 %v707_v49, %v223_v36 }
 0x3c5   :  { %v723_v41 = vsel %vm149_vm2, %v711_v40, 0.0  ;;  %v715_v50 = vmul.f32 %v3762_v7, %v711_v40 }
 0x3c6   :  { %724 = vadd.xlane.f32.xlu1 %v723_v41 }
 0x3c7   :  { %v717_v51 = vsel %vm149_vm2, %v715_v50, 0.0 }
 0x3c8   :  { %v708_v52 = vpop.f32.mrf.mxu0  ;;  %718 = vadd.xlane.f32.xlu2 %v717_v51 }
 0x3c9   :  { %v709_v32 = vadd.f32 %v708_v52, %v648_v47  ;;  %v3350_v47 = vld [vmem:[%s4959_s4 + $0x44] sm:$0xf] }
 0x3ca   :  { %v2877_v41 = vor.u32 %v3350_v47, %v2874_v48  ;;  %v3361_v48 = vld [vmem:[#allocation2 + $0x58] sm:$0xff] }
 0x3cb   :  { %v712_v53 = vadd.f32 %v709_v32, %v224_v37 }
 0x3cc   :  { %868 = vmatpush.bf16.msrb.mxu2 %v2877_v41 }
 0x3cd   :  { %v716_v54 = vmul.f32 %v3762_v7, %v712_v53  ;;  %v726_v35 = vsel %vm149_vm2, %v712_v53, 0.0 }
 0x3cf   :  { %v720_v55 = vsel %vm149_vm2, %v716_v54, 0.0 }
 0x3d0   :  { %721 = vadd.xlane.f32.xlu0 %v720_v55  ;;  %727 = vadd.xlane.f32.xlu2 %v726_v35 }
 0x439   :  { %v725_v36 = vpop.xlane.xlu1 %724 }
 0x43b   :  { %v719_v56 = vpop.xlane.xlu2 %718 }
 0x43c   :  { %v729_v57 = vsub.f32 %v725_v36, %v719_v56 }
 0x43e   :  { %v731_v58 = vsel %vm4977_vm1, %v719_v56, %v729_v57 }
 0x43f   :  { %v733_v59 = vmul.f32 0.03125, %v731_v58 }
 0x441   :  { %v4056_v60 = vsub.f32 %v711_v40, %v733_v59  ;;  %v2873_v40 = vor.u32 %v3351_v44, %v2872_v43 }
 0x443   :  { %v722_v61 = vpop.xlane.xlu0 %721  ;;  %v728_v22 = vpop.xlane.xlu2 %727  ;;  %v737_v37 = vmul.f32 %v4056_v60, %v4056_v60  ;;  %854 = vmatpush.bf16.msrb.mxu1 %v2873_v40 }
 0x444   :  { %v730_v62 = vsub.f32 %v728_v22, %v722_v61 }
 0x445   :  { %v747_v0 = vsel %vm149_vm2, %v737_v37, 0.0  ;;  %v739_v1 = vmul.f32 %v3762_v7, %v737_v37 }
 0x446   :  { %v732_v4 = vsel %vm4977_vm1, %v722_v61, %v730_v62  ;;  %748 = vadd.xlane.f32.xlu2 %v747_v0 }
 0x447   :  { %v734_v5 = vmul.f32 0.03125, %v732_v4  ;;  %v741_v9 = vsel %vm149_vm2, %v739_v1, 0.0  ;;  %1066 = vmatpush.bf16.msra.mxu1 %v3365_v28  ;;  %v3451_v28 = vld [vmem:[%s4960_s5 + $0x4] ss:$0 sm:$0xff] }
 0x448   :  { %742 = vadd.xlane.f32.xlu0 %v741_v9 }
 0x449   :  { %v4065_v11 = vsub.f32 %v712_v53, %v734_v5  ;;  %v713_v5 = vld [vmem:[%s4970_s15 + $0x5] ss:$0 sm:$0xff] }
 0x44b   :  { %v738_v12 = vmul.f32 %v4065_v11, %v4065_v11  ;;  %1067 = vmatpush.bf16.msra.mxu1 %v3364_v29 }
 0x44d   :  { %v740_v13 = vmul.f32 %v3762_v7, %v738_v12  ;;  %v750_v14 = vsel %vm149_vm2, %v738_v12, 0.0 }
 0x44f   :  { %v744_v15 = vsel %vm149_vm2, %v740_v13, 0.0  ;;  %1068 = vmatpush.bf16.msra.mxu1 %v3363_v34 }
 0x450   :  { %751 = vadd.xlane.f32.xlu0 %v750_v14  ;;  %745 = vadd.xlane.f32.xlu1 %v744_v15  ;;  %v714_v14 = vld [vmem:[%s4970_s15 + $0x6] ss:$0 sm:$0xff] }
 0x453   :  { %1069 = vmatpush.bf16.msra.mxu1 %v3362_v42 }
 0x457   :  { %1070 = vmatpush.bf16.msra.mxu1 %v3361_v48 }
 0x4b9   :  { %v749_v27 = vpop.xlane.xlu2 %748 }
 0x4bb   :  { %v743_v16 = vpop.xlane.xlu0 %742 }
 0x4bc   :  { %v753_v20 = vsub.f32 %v749_v27, %v743_v16 }
 0x4be   :  { %v755_v38 = vsel %vm4977_vm1, %v743_v16, %v753_v20 }
 0x4bf   :  { %v757_v45 = vmul.f32 0.03125, %v755_v38 }
 0x4c1   :  { %v759_v49 = vadd.f32 1e-05, %v757_v45 }
 0x4c3   :  { %3509 = vrsqrt.f32 %v759_v49  ;;  %v752_v50 = vpop.xlane.xlu0 %751  ;;  %v746_v51 = vpop.xlane.xlu1 %745  ;;  %vm767_vm13 = vweird.f32 %v759_v49 }
 0x4c4   :  { %v754_v52 = vsub.f32 %v752_v50, %v746_v51 }
 0x4c6   :  { %v756_v32 = vsel %vm4977_vm1, %v746_v51, %v754_v52 }
 0x4c7   :  { %v758_v53 = vmul.f32 0.03125, %v756_v32 }
 0x4c9   :  { %v3510_v54 = vpop.eup %3509  ;;  %v760_v55 = vadd.f32 1e-05, %v758_v53  ;;  %v3360_v53 = vld [vmem:[#allocation2 + $0x50] sm:$0xff] }
 0x4ca   :  { %v762_v35 = vmul.f32 %v3510_v54, %v759_v49  ;;  %vm768_vm10 = vweird.f32 %v3510_v54  ;;  %1071 = vmatpush.bf16.msra.mxu1 %v3360_v53 }
 0x4cb   :  { %3511 = vrsqrt.f32 %v760_v55  ;;  %vm769_vm14 = vmor %vm767_vm13, %vm768_vm10  ;;  %vm777_vm11 = vweird.f32 %v760_v55 }
 0x4cc   :  { %v763_v36 = vmul.f32 %v3510_v54, %v762_v35 }
 0x4ce   :  { %v764_v56 = vmul.f32 0.5, %v763_v36 }
 0x4d0   :  { %v765_v57 = vsub.f32 1.5, %v764_v56  ;;  %v3359_v56 = vld [vmem:[#allocation2 + $0x48] sm:$0xff] }
 0x4d1   :  { %v3512_v58 = vpop.eup %3511  ;;  %1072 = vmatpush.bf16.msra.mxu1 %v3359_v56 }
 0x4d2   :  { %v766_v59 = vmul.f32 %v3510_v54, %v765_v57  ;;  %v772_v61 = vmul.f32 %v3512_v58, %v760_v55  ;;  %vm778_vm15 = vweird.f32 %v3512_v58  ;;  %v3448_v57 = vld [vmem:[%s4960_s5 + $0x7] ss:$0 sm:$0xff] }
 0x4d3   :  { %vm779_vm12 = vmor %vm777_vm11, %vm778_vm15 }
 0x4d4   :  { %v773_v22 = vmul.f32 %v3512_v58, %v772_v61  ;;  %v770_v37 = vsel %vm769_vm14, %v3510_v54, %v766_v59 }
 0x4d5   :  { %v781_v1 = vmul.f32 %v770_v37, %v4056_v60 }
 0x4d6   :  { %v774_v62 = vmul.f32 0.5, %v773_v22 }
 0x4d7   :  { %v783_v13 = vmul.f32 %v781_v1, %v713_v5 }
 0x4d8   :  { %v775_v0 = vsub.f32 1.5, %v774_v62 }
 0x4d9   :  { %v4132_v2 = vadd.f32 %v783_v13, %v714_v14 }
 0x4da   :  { %v776_v4 = vmul.f32 %v3512_v58, %v775_v0  ;;  %v3449_v0 = vld [vmem:[%s4960_s5 + $0x6] ss:$0 sm:$0xff] }
 0x4dc   :  { %v780_v9 = vsel %vm779_vm12, %v3512_v58, %v776_v4  ;;  %v3358_v4 = vld [vmem:[#allocation2 + $0x40] sm:$0xff] }
 0x4dd   :  { %v782_v12 = vmul.f32 %v780_v9, %v4065_v11  ;;  %v4143_v11 = vld [vmem:[%s4970_s15 + $0x10] ss:$8 sm:$0x3]  ;;  %1073 = vmatpush.bf16.msra.mxu1 %v3358_v4 }
 0x4de   :  { %v800_v8 = vperm.slane %v4143_v11, 0 }
 0x4df   :  { %v784_v15 = vmul.f32 %v782_v12, %v713_v5  ;;  %v2907_v12 = vld [vmem:[%s4970_s15 + $0x11] ss:$0 sm:$0xff] }
 0x4e1   :  { %v4134_v18 = vadd.f32 %v784_v15, %v714_v14 }
 0x4e3   :  { %v796_v60 = vpack.c.bf16 %v4134_v18, %v4132_v2 }
 0x4e5   :  { %2902 = vmatmul.msk.bf16.vlgmr.msrb.gmra.mxu1 %vm149_vm2, %v796_v60  ;;  %2903 = vmatmul.msk.bf16.vlgmr.msrb.gmra.mxu2 %vm149_vm2, %v796_v60 }
 0x562   :  { %v856_v21 = vpop.f32.mrf.mxu1 }
 0x563   :  { %v857_v23 = vadd.f32 %v856_v21, %v800_v8 }
 0x565   :  { %v2904_v24 = vmul.f32 -1.442695, %v857_v23 }
 0x567   :  { %3513 = vpow2.f32 %v2904_v24 }
 0x56a   :  { %v858_v10 = vpop.f32.mrf.mxu1 }
 0x56b   :  { %v859_v25 = vadd.f32 %v858_v10, %v800_v8  ;;  %v3450_v8 = vld [vmem:[%s4960_s5 + $0x5] ss:$0 sm:$0xff] }
 0x56d   :  { %v3514_v26 = vpop.eup %3513  ;;  %v2905_v27 = vmul.f32 -1.442695, %v859_v25 }
 0x56e   :  { %v881_v16 = vadd.f32 1.0, %v3514_v26 }
 0x56f   :  { %3515 = vpow2.f32 %v2905_v27 }
 0x570   :  { %3517 = vrcp.f32 %v881_v16  ;;  %v894_v44 = vand.u32 2147483648, %v881_v16  ;;  %vm888_vm13 = vweird.f32 %v881_v16  ;;  %v892_v46 = vand.u32 2147483647, %v881_v16 }
 0x572   :  { %v895_v40 = vor.u32 1.1754944e-38, %v894_v44  ;;  %vm893_vm15 = vcmp.eq.f32.partialorder %v892_v46, 8.507059e+37 }
 0x575   :  { %v3516_v20 = vpop.eup %3515 }
 0x576   :  { %v3518_v30 = vpop.eup %3517  ;;  %v882_v33 = vadd.f32 1.0, %v3516_v20 }
 0x577   :  { %v884_v31 = vmul.f32 %v3518_v30, %v881_v16  ;;  %vm889_vm10 = vweird.f32 %v3518_v30 }
 0x578   :  { %3519 = vrcp.f32 %v882_v33  ;;  %vm890_vm14 = vmor %vm888_vm13, %vm889_vm10  ;;  %v909_v50 = vand.u32 2147483648, %v882_v33  ;;  %v907_v32 = vand.u32 2147483647, %v882_v33  ;;  %vm903_vm12 = vweird.f32 %v882_v33 }
 0x579   :  { %v885_v38 = vsub.f32 1.0, %v884_v31 }
 0x57a   :  { %v910_v35 = vor.u32 1.1754944e-38, %v909_v50  ;;  %vm908_vm10 = vcmp.eq.f32.partialorder %v907_v32, 8.507059e+37 }
 0x57b   :  { %v886_v39 = vmul.f32 %v3518_v30, %v885_v38 }
 0x57d   :  { %v887_v43 = vadd.f32 %v3518_v30, %v886_v39 }
 0x57e   :  { %v3520_v45 = vpop.eup %3519 }
 0x57f   :  { %v899_v47 = vmul.f32 %v3520_v45, %v882_v33  ;;  %v891_v49 = vsel %vm890_vm14, %v3518_v30, %v887_v43  ;;  %vm904_vm11 = vweird.f32 %v3520_v45  ;;  %vm4987_vm14 = vcmp.ge.s32.totalorder %v3874_v17, 3 }
 0x580   :  { %v896_v51 = vsel %vm893_vm15, %v895_v40, %v891_v49  ;;  %vm905_vm1 = vmor %vm903_vm12, %vm904_vm11  ;;  %vm4988_vm15 = vcmp.ge.s32.totalorder %v3876_v19, 3 }
 0x581   :  { %v900_v41 = vsub.f32 1.0, %v899_v47  ;;  %v913_v55 = vmul.f32 %v896_v51, %v857_v23 }
 0x583   :  { %v901_v52 = vmul.f32 %v3520_v45, %v900_v41  ;;  %v924_v61 = vrot.slane %v913_v55, 7  ;;  %v936_v22 = vrot.slane %v913_v55, 6  ;;  %v918_v5 = vmul.f32 %v3448_v57, %v913_v55 }
 0x584   :  { %v948_v13 = vrot.slane %v913_v55, 5 }
 0x585   :  { %v902_v54 = vadd.f32 %v3520_v45, %v901_v52  ;;  %v921_v29 = vadd.f32 %v2907_v12, %v918_v5 }
 0x587   :  { %v906_v36 = vsel %vm905_vm1, %v3520_v45, %v902_v54  ;;  %vm4985_vm1 = vcmp.lt.s32.totalorder %v3867_v63, 3 }
 0x588   :  { %v911_v58 = vsel %vm908_vm10, %v910_v35, %v906_v36  ;;  %vm4986_vm13 = vmmov %vm4985_vm1 }
 0x589   :  { %v914_v59 = vmul.f32 %v911_v58, %v859_v25 }
 0x58b   :  { %v919_v37 = vmul.f32 %v3448_v57, %v914_v59  ;;  %v925_v62 = vrot.slane %v914_v59, 7  ;;  %v937_v1 = vrot.slane %v914_v59, 6  ;;  %v949_v9 = vrot.slane %v914_v59, 5 }
 0x58d   :  { %v926_v14 = vsel %vm361_vm4, %v924_v61, %v925_v62  ;;  %v927_v15 = vsel %vm361_vm4, %v925_v62, %v924_v61  ;;  %v938_v60 = vsel %vm378_vm6, %v936_v22, %v937_v1  ;;  %v939_v24 = vsel %vm378_vm6, %v937_v1, %v936_v22 }
 0x58e   :  { %v928_v21 = vsel %vm99_vm5, %v927_v15, 0.0  ;;  %v929_v23 = vsel %vm100_vm7, %v926_v14, 0.0  ;;  %v941_v10 = vsel %vm102_vm9, %v938_v60, 0.0  ;;  %v922_v25 = vadd.f32 %v2907_v12, %v919_v37  ;;  %v870_v60 = vpop.f32.mrf.mxu2 }
 0x58f   :  { %v931_v26 = vmul.f32 %v3449_v0, %v928_v21  ;;  %v932_v27 = vmul.f32 %v3449_v0, %v929_v23  ;;  %v940_v16 = vsel %vm4978_vm8, %v939_v24, 0.0  ;;  %v950_v20 = vsel %vm4985_vm1, %v948_v13, %v949_v9  ;;  %v2913_v21 = vld [vmem:[%s4970_s15 + $0x12] ss:$0 sm:$0xff]  ;;  %v3373_v23 = vld [vmem:[%s4962_s7 + $0x78] sm:$0xff] }
 0x590   :  { %v951_v30 = vsel %vm4986_vm13, %v949_v9, %v948_v13  ;;  %v944_v33 = vmul.f32 %v3450_v8, %v941_v10  ;;  %v953_v38 = vsel %vm4988_vm15, %v950_v20, 0.0  ;;  %v943_v39 = vmul.f32 %v3450_v8, %v940_v16  ;;  %1244 = vmatpush.bf16.msra.mxu2 %v3373_v23 }
 0x591   :  { %v934_v31 = vadd.f32 %v932_v27, %v922_v25  ;;  %v952_v34 = vsel %vm4987_vm14, %v951_v30, 0.0  ;;  %v933_v42 = vadd.f32 %v931_v26, %v921_v29  ;;  %v956_v44 = vmul.f32 %v3451_v28, %v953_v38  ;;  %v3372_v27 = vld [vmem:[%s4962_s7 + $0x70] sm:$0xff]  ;;  %v3371_v29 = vld [vmem:[%s4962_s7 + $0x68] sm:$0xff] }
 0x592   :  { %v955_v46 = vmul.f32 %v3451_v28, %v952_v34  ;;  %v801_v8 = vperm.slane %v4143_v11, 1 }
 0x593   :  { %v946_v43 = vadd.f32 %v944_v33, %v934_v31  ;;  %v945_v45 = vadd.f32 %v943_v39, %v933_v42  ;;  %v3370_v33 = vld [vmem:[%s4962_s7 + $0x60] sm:$0xff]  ;;  %v3369_v42 = vld [vmem:[%s4962_s7 + $0x58] sm:$0xff] }
 0x594   :  { %v4198_v26 = vadd.f32 %v870_v60, %v801_v8  ;;  %1245 = vmatpush.bf16.msra.mxu2 %v3372_v27 }
 0x595   :  { %v958_v47 = vadd.f32 %v956_v44, %v946_v43  ;;  %v957_v48 = vadd.f32 %v955_v46, %v945_v45  ;;  %v3368_v44 = vld [vmem:[%s4962_s7 + $0x50] sm:$0xff] }
 0x596   :  { %v872_v24 = vpop.f32.mrf.mxu2  ;;  %v2947_v28 = vmul.f32 -1.442695, %v4198_v26 }
 0x597   :  { %v2912_v49 = vmul.f32 -1.442695, %v958_v47  ;;  %v2911_v40 = vmul.f32 -1.442695, %v957_v48  ;;  %v4203_v16 = vadd.f32 %v872_v24, %v801_v8 }
 0x598   :  { %1246 = vmatpush.bf16.msra.mxu2 %v3371_v29 }
 0x599   :  { %3521 = vpow2.f32 %v2912_v49  ;;  %v2948_v20 = vmul.f32 -1.442695, %v4203_v16 }
 0x59a   :  { %3523 = vpow2.f32 %v2911_v40 }
 0x59c   :  { %1247 = vmatpush.bf16.msra.mxu2 %v3370_v33 }
 0x59f   :  { %v3522_v41 = vpop.eup %3521 }
 0x5a0   :  { %v3524_v50 = vpop.eup %3523  ;;  %v966_v51 = vadd.f32 1.0, %v3522_v41  ;;  %1248 = vmatpush.bf16.msra.mxu2 %v3369_v42  ;;  %v3367_v41 = vld [vmem:[%s4962_s7 + $0x48] sm:$0xff] }
 0x5a1   :  { %v965_v52 = vadd.f32 1.0, %v3524_v50 }
 0x5a2   :  { %3525 = vrcp.f32 %v966_v51  ;;  %v993_v56 = vand.u32 2147483648, %v966_v51  ;;  %v991_v59 = vand.u32 2147483647, %v966_v51  ;;  %vm987_vm10 = vweird.f32 %v966_v51 }
 0x5a3   :  { %3527 = vrcp.f32 %v965_v52  ;;  %v978_v57 = vand.u32 2147483648, %v965_v52  ;;  %v976_v22 = vand.u32 2147483647, %v965_v52  ;;  %vm972_vm1 = vweird.f32 %v965_v52 }
 0x5a4   :  { %v994_v0 = vor.u32 1.1754944e-38, %v993_v56  ;;  %vm992_vm15 = vcmp.eq.f32.partialorder %v991_v59, 8.507059e+37  ;;  %1249 = vmatpush.bf16.msra.mxu2 %v3368_v44 }
 0x5a5   :  { %v979_v1 = vor.u32 1.1754944e-38, %v978_v57  ;;  %vm977_vm8 = vcmp.eq.f32.partialorder %v976_v22, 8.507059e+37 }
 0x5a8   :  { %v3526_v32 = vpop.eup %3525  ;;  %1250 = vmatpush.bf16.msra.mxu2 %v3367_v41 }
 0x5a9   :  { %v3528_v53 = vpop.eup %3527  ;;  %v983_v54 = vmul.f32 %v3526_v32, %v966_v51  ;;  %vm988_vm11 = vweird.f32 %v3526_v32  ;;  %v3366_v51 = vld [vmem:[%s4962_s7 + $0x40] sm:$0xff] }
 0x5aa   :  { %v968_v55 = vmul.f32 %v3528_v53, %v965_v52  ;;  %vm973_vm12 = vweird.f32 %v3528_v53  ;;  %vm989_vm13 = vmor %vm987_vm10, %vm988_vm11 }
 0x5ab   :  { %v984_v35 = vsub.f32 1.0, %v983_v54  ;;  %vm974_vm14 = vmor %vm972_vm1, %vm973_vm12 }
 0x5ac   :  { %v969_v36 = vsub.f32 1.0, %v968_v55  ;;  %1251 = vmatpush.bf16.msra.mxu2 %v3366_v51 }
 0x5ad   :  { %v985_v58 = vmul.f32 %v3526_v32, %v984_v35 }
 0x5ae   :  { %v970_v61 = vmul.f32 %v3528_v53, %v969_v36 }
 0x5af   :  { %v986_v37 = vadd.f32 %v3526_v32, %v985_v58 }
 0x5b0   :  { %v971_v62 = vadd.f32 %v3528_v53, %v970_v61 }
 0x5b1   :  { %v990_v4 = vsel %vm989_vm13, %v3526_v32, %v986_v37 }
 0x5b2   :  { %v975_v5 = vsel %vm974_vm14, %v3528_v53, %v971_v62  ;;  %v995_v9 = vsel %vm992_vm15, %v994_v0, %v990_v4 }
 0x5b3   :  { %v980_v12 = vsel %vm977_vm8, %v979_v1, %v975_v5  ;;  %v4185_v13 = vmul.f32 %v995_v9, %v958_v47  ;;  %vm4989_vm8 = vcmp.eq.s32.totalorder %v3876_v19, 0 }
 0x5b4   :  { %v4187_v14 = vmul.f32 %v980_v12, %v957_v48 }
 0x5b6   :  { %v1016_v15 = vpack.c.bf16 %v4185_v13, %v4187_v14 }
 0x5b8   :  { %1074 = vmatmul.bf16.vlgmr.msra.gmra.mxu1 %v1016_v15 }
 0x635   :  { %v1075_v10 = vpop.f32.mrf.mxu1 }
 0x636   :  { %v1076_v25 = vadd.f32 %v2913_v21, %v1075_v10 }
 0x638   :  { %v1080_v11 = vmul.f32 1.442695, %v1076_v25 }
 0x63a   :  { %3529 = vpow2.f32 %v1080_v11 }
 0x63b   :  { %3531 = vpow2.f32 %v2947_v28 }
 0x63c   :  { %3533 = vpow2.f32 %v2948_v20 }
 0x63d   :  { %v1077_v30 = vpop.f32.mrf.mxu1 }
 0x63e   :  { %v1078_v31 = vadd.f32 %v2913_v21, %v1077_v30 }
 0x640   :  { %v3530_v34 = vpop.eup %3529  ;;  %v1082_v38 = vmul.f32 1.442695, %v1078_v31 }
 0x641   :  { %v1084_v39 = vadd.f32 2.0, %v3530_v34  ;;  %v3532_v43 = vpop.eup %3531 }
 0x642   :  { %3535 = vpow2.f32 %v1082_v38  ;;  %v3534_v45 = vpop.eup %3533  ;;  %v4219_v47 = vadd.f32 1.0, %v3532_v43 }
 0x643   :  { %3537 = vrcp.f32 %v1084_v39  ;;  %v4221_v49 = vadd.f32 1.0, %v3534_v45 }
 0x644   :  { %vm1148_vm11 = vweird.f32 %v4219_v47  ;;  %v1154_v30 = vand.u32 2147483648, %v4219_v47 }
 0x645   :  { %v1169_v39 = vand.u32 2147483648, %v4221_v49  ;;  %vm1163_vm13 = vweird.f32 %v4221_v49 }
 0x648   :  { %v3536_v46 = vpop.eup %3535 }
 0x649   :  { %v3538_v48 = vpop.eup %3537  ;;  %v1085_v40 = vadd.f32 2.0, %v3536_v46 }
 0x64a   :  { %v1088_v50 = vsel %vm97_vm0, 0.0, %v3538_v48  ;;  %v1152_v48 = vand.u32 2147483647, %v4219_v47 }
 0x64b   :  { %3539 = vrcp.f32 %v1085_v40  ;;  %v1090_v52 = vsub.f32 1.0, %v1088_v50  ;;  %v1102_v61 = vrot.slane %v1088_v50, 7  ;;  %v1167_v40 = vand.u32 2147483647, %v4221_v49 }
 0x64c   :  { %3541 = vrcp.f32 %v4219_v47  ;;  %vm1153_vm15 = vcmp.eq.f32.partialorder %v1152_v48, 8.507059e+37 }
 0x64d   :  { %3543 = vrcp.f32 %v4221_v49  ;;  %v1092_v35 = vmul.f32 %v1090_v52, %v4187_v14 }
 0x64f   :  { %v1094_v22 = vrot.slane %v1092_v35, 7 }
 0x651   :  { %v3540_v32 = vpop.eup %3539 }
 0x652   :  { %v4233_v53 = vpop.eup %3541  ;;  %v1089_v54 = vsel %vm4989_vm8, 0.0, %v3540_v32  ;;  %vm1168_vm8 = vcmp.eq.f32.partialorder %v1167_v40, 8.507059e+37 }
 0x653   :  { %v4237_v55 = vpop.eup %3543  ;;  %v1091_v36 = vsub.f32 1.0, %v1089_v54  ;;  %v1103_v56 = vrot.slane %v1089_v54, 7  ;;  %v1144_v58 = vmul.f32 %v4233_v53, %v4219_v47  ;;  %vm1149_vm12 = vweird.f32 %v4233_v53 }
 0x654   :  { %v1159_v59 = vmul.f32 %v4237_v55, %v4221_v49  ;;  %vm1164_vm10 = vweird.f32 %v4237_v55  ;;  %vm4272_vm1 = vmor %vm1148_vm11, %vm1149_vm12  ;;  %vm4994_vm11 = vcmp.lt.s32.totalorder %v3753_v3, 32 }
 0x655   :  { %v1093_v57 = vmul.f32 %v1091_v36, %v4185_v13  ;;  %v1104_v62 = vsel %vm361_vm4, %v1102_v61, %v1103_v56  ;;  %v1105_v0 = vsel %vm361_vm4, %v1103_v56, %v1102_v61  ;;  %v1145_v5 = vsub.f32 1.0, %v1144_v58  ;;  %vm4279_vm14 = vmor %vm1163_vm13, %vm1164_vm10 }
 0x656   :  { %v1160_v9 = vsub.f32 1.0, %v1159_v59  ;;  %v1106_v60 = vmul.f32 %v1105_v0, %v1088_v50  ;;  %v1107_v8 = vmul.f32 %v1104_v62, %v1089_v54  ;;  %v1170_v36 = vor.u32 1.1754944e-38, %v1169_v39  ;;  %vm4995_vm12 = vmmov %vm4994_vm11 }
 0x657   :  { %v1095_v37 = vrot.slane %v1093_v57, 7  ;;  %v1146_v24 = vmul.f32 %v4233_v53, %v1145_v5  ;;  %vm4996_vm10 = vmmov %vm4994_vm11 }
 0x658   :  { %v1161_v10 = vmul.f32 %v4237_v55, %v1160_v9  ;;  %v1117_v11 = vrot.slane %v1107_v8, 6  ;;  %v1116_v28 = vrot.slane %v1106_v60, 6 }
 0x659   :  { %v1096_v1 = vsel %vm361_vm4, %v1094_v22, %v1095_v37  ;;  %v1097_v4 = vsel %vm361_vm4, %v1095_v37, %v1094_v22  ;;  %v1147_v34 = vadd.f32 %v4233_v53, %v1146_v24 }
 0x65a   :  { %v1099_v12 = vmul.f32 %v1096_v1, %v1089_v54  ;;  %v1098_v15 = vmul.f32 %v1097_v4, %v1088_v50  ;;  %v1162_v38 = vadd.f32 %v4237_v55, %v1161_v10  ;;  %v1118_v44 = vsel %vm378_vm6, %v1116_v28, %v1117_v11 }
 0x65b   :  { %v1119_v45 = vsel %vm378_vm6, %v1117_v11, %v1116_v28  ;;  %v1151_v52 = vsel %vm4272_vm1, %v4233_v53, %v1147_v34  ;;  %v1121_v47 = vmul.f32 %v1118_v44, %v1107_v8  ;;  %vm4997_vm1 = vmmov %vm4996_vm10 }
 0x65c   :  { %v1101_v21 = vadd.f32 %v1099_v12, %v1093_v57  ;;  %v1100_v23 = vadd.f32 %v1098_v15, %v1092_v35  ;;  %v1166_v32 = vsel %vm4279_vm14, %v4237_v55, %v1162_v38  ;;  %v1120_v54 = vmul.f32 %v1119_v45, %v1106_v60  ;;  %v2946_v57 = vld [vmem:[%s4970_s15 + $0x13] ss:$0 sm:$0xff] }
 0x65d   :  { %v1155_v35 = vor.u32 1.1754944e-38, %v1154_v30  ;;  %v1171_v55 = vsel %vm1168_vm8, %v1170_v36, %v1166_v32  ;;  %v1131_v37 = vmul.f32 %v2946_v57, %v4187_v14  ;;  %v1132_v62 = vmul.f32 %v2946_v57, %v4185_v13  ;;  %v3380_v32 = vld [vmem:[%s4959_s4 + $0xb4] sm:$0xf]  ;;  %v3027_v36 = vld [vmem:[%s4959_s4 + $0xa0] sm:$0xf] }
 0x65e   :  { %v1109_v25 = vrot.slane %v1101_v21, 6  ;;  %v1108_v27 = vrot.slane %v1100_v23, 6  ;;  %v1174_v1 = vmul.f32 %v1171_v55, %v4203_v16 }
 0x65f   :  { %v1156_v59 = vsel %vm1153_vm15, %v1155_v35, %v1151_v52  ;;  %v3381_v52 = vld [vmem:[%s4959_s4 + $0xb4] sm:$0xf0] }
 0x660   :  { %v1110_v29 = vsel %vm378_vm6, %v1108_v27, %v1109_v25  ;;  %v1111_v20 = vsel %vm378_vm6, %v1109_v25, %v1108_v27  ;;  %v1173_v0 = vmul.f32 %v1156_v59, %v4198_v26 }
 0x661   :  { %v1112_v31 = vmul.f32 %v1111_v20, %v1106_v60  ;;  %v1113_v33 = vmul.f32 %v1110_v29, %v1107_v8  ;;  %v2965_v60 = vld [vmem:[%s4970_s15 + $0x14] ss:$0 sm:$0xff] }
 0x663   :  { %v1114_v42 = vadd.f32 %v1112_v31, %v1100_v23  ;;  %v1115_v43 = vadd.f32 %v1113_v33, %v1101_v21 }
 0x665   :  { %v1122_v50 = vrot.slane %v1114_v42, 4  ;;  %v1123_v51 = vrot.slane %v1115_v43, 4 }
 0x667   :  { %v1124_v49 = vsel %vm577_vm3, %v1122_v50, %v1123_v51  ;;  %v1125_v56 = vsel %vm577_vm3, %v1123_v51, %v1122_v50  ;;  %v3035_v51 = vld [vmem:[%s4959_s4 + $0xb0] sm:$0xf] }
 0x668   :  { %v1126_v53 = vmul.f32 %v1125_v56, %v1120_v54  ;;  %v1127_v58 = vmul.f32 %v1124_v49, %v1121_v47  ;;  %v3036_v54 = vor.u32 %v3381_v52, %v3035_v51  ;;  %v3037_v47 = vld [vmem:[%s4959_s4 + $0xb8] sm:$0xf0]  ;;  %v3379_v49 = vld [vmem:[%s4959_s4 + $0xa4] sm:$0xf0]  ;;  %v3378_v56 = vld [vmem:[%s4959_s4 + $0xa4] sm:$0xf] }
 0x669   :  { %v3040_v35 = vor.u32 %v3380_v32, %v3037_v47  ;;  %v3028_v57 = vor.u32 %v3379_v49, %v3027_v36 }
 0x66a   :  { %v1128_v61 = vadd.f32 %v1126_v53, %v1114_v42  ;;  %v1129_v22 = vadd.f32 %v1127_v58, %v1115_v43  ;;  %1398 = vmatpush.bf16.msrb.mxu3 %v3036_v54  ;;  %v3029_v53 = vld [vmem:[%s4959_s4 + $0xa8] sm:$0xf0] }
 0x66b   :  { %1412 = vmatpush.bf16.msra.mxu0 %v3040_v35  ;;  %v3032_v55 = vor.u32 %v3378_v56, %v3029_v53 }
 0x66c   :  { %v1133_v4 = vadd.f32 %v1131_v37, %v1128_v61  ;;  %v1134_v5 = vadd.f32 %v1132_v62, %v1129_v22  ;;  %v3019_v22 = vld [vmem:[%s4959_s4 + $0x90] sm:$0xf]  ;;  %v3377_v37 = vld [vmem:[%s4959_s4 + $0x94] sm:$0xf0]  ;;  %v3376_v62 = vld [vmem:[%s4959_s4 + $0x94] sm:$0xf] }
 0x66e   :  { %v1175_v9 = vmul.f32 %v1173_v0, %v1133_v4  ;;  %v1176_v12 = vmul.f32 %v1174_v1, %v1134_v5  ;;  %1399 = vmatpush.bf16.msrb.mxu3 %v3028_v57  ;;  %v3020_v1 = vor.u32 %v3377_v37, %v3019_v22  ;;  %v3021_v4 = vld [vmem:[%s4959_s4 + $0x98] sm:$0xf0]  ;;  %v3011_v5 = vld [vmem:[%s4959_s4 + $0x80] sm:$0xf] }
 0x66f   :  { %1413 = vmatpush.bf16.msra.mxu0 %v3032_v55 }
 0x670   :  { %v1194_v15 = vpack.c.bf16 %v1176_v12, %v1175_v9  ;;  %v3375_v9 = vld [vmem:[%s4959_s4 + $0x84] sm:$0xf0] }
 0x672   :  { %1252 = vmatmul.bf16.vlgmr.msra.gmra.mxu2 %v1194_v15  ;;  %v3024_v15 = vor.u32 %v3376_v62, %v3021_v4  ;;  %1400 = vmatpush.bf16.msrb.mxu3 %v3020_v1  ;;  %v3387_v62 = vld [vmem:[#allocation2 + $0xa8] sm:$0xff]  ;;  %v3386_v4 = vld [vmem:[#allocation2 + $0xa0] sm:$0xff] }
 0x674   :  { %1414 = vmatpush.bf16.msra.mxu0 %v3024_v15 }
 0x6f5   :  { %v1253_v8 = vpop.f32.mrf.mxu2 }
 0x6f6   :  { %v1254_v21 = vadd.f32 %v2965_v60, %v1253_v8  ;;  %v3013_v8 = vld [vmem:[%s4959_s4 + $0x88] sm:$0xf0] }
 0x6f8   :  { %v1258_v14 = vadd.f32 %v1254_v21, %v4132_v2  ;;  %v3012_v21 = vor.u32 %v3375_v9, %v3011_v5 }
 0x6fa   :  { %v1270_v13 = vsel %vm149_vm2, %v1258_v14, 0.0  ;;  %v1262_v26 = vmul.f32 %v3762_v7, %v1258_v14  ;;  %1401 = vmatpush.bf16.msrb.mxu3 %v3012_v21  ;;  %v3385_v21 = vld [vmem:[#allocation2 + $0x98] sm:$0xff] }
 0x6fb   :  { %1271 = vadd.xlane.f32.xlu0 %v1270_v13 }
 0x6fc   :  { %v1264_v16 = vsel %vm149_vm2, %v1262_v26, 0.0 }
 0x6fd   :  { %v1255_v23 = vpop.f32.mrf.mxu2  ;;  %1265 = vadd.xlane.f32.xlu1 %v1264_v16 }
 0x6fe   :  { %v1256_v24 = vadd.f32 %v2965_v60, %v1255_v23  ;;  %v3374_v60 = vld [vmem:[%s4959_s4 + $0x84] sm:$0xf] }
 0x6ff   :  { %v3016_v13 = vor.u32 %v3374_v60, %v3013_v8 }
 0x700   :  { %v1259_v10 = vadd.f32 %v1256_v24, %v4134_v18 }
 0x701   :  { %1415 = vmatpush.bf16.msra.mxu0 %v3016_v13 }
 0x702   :  { %v1263_v25 = vmul.f32 %v3762_v7, %v1259_v10  ;;  %v1273_v11 = vsel %vm149_vm2, %v1259_v10, 0.0 }
 0x704   :  { %v1267_v27 = vsel %vm149_vm2, %v1263_v25, 0.0 }
 0x705   :  { %1268 = vadd.xlane.f32.xlu2 %v1267_v27  ;;  %1274 = vadd.xlane.f32.xlu1 %v1273_v11 }
 0x76e   :  { %v1272_v2 = vpop.xlane.xlu0 %1271 }
 0x770   :  { %v1266_v28 = vpop.xlane.xlu1 %1265 }
 0x771   :  { %v1276_v29 = vsub.f32 %v1272_v2, %v1266_v28 }
 0x773   :  { %v1278_v20 = vsel %vm4994_vm11, %v1266_v28, %v1276_v29 }
 0x774   :  { %v1280_v30 = vmul.f32 0.03125, %v1278_v20 }
 0x776   :  { %v4313_v31 = vsub.f32 %v1258_v14, %v1280_v30 }
 0x778   :  { %v1269_v33 = vpop.xlane.xlu2 %1268  ;;  %v1275_v34 = vpop.xlane.xlu1 %1274  ;;  %v1284_v18 = vmul.f32 %v4313_v31, %v4313_v31 }
 0x779   :  { %v1277_v38 = vsub.f32 %v1275_v34, %v1269_v33 }
 0x77a   :  { %v1294_v39 = vsel %vm149_vm2, %v1284_v18, 0.0  ;;  %v1286_v42 = vmul.f32 %v3762_v7, %v1284_v18 }
 0x77b   :  { %v1279_v43 = vsel %vm4995_vm12, %v1269_v33, %v1277_v38  ;;  %1295 = vadd.xlane.f32.xlu1 %v1294_v39 }
 0x77c   :  { %v1281_v44 = vmul.f32 0.03125, %v1279_v43  ;;  %v1288_v45 = vsel %vm149_vm2, %v1286_v42, 0.0 }
 0x77d   :  { %1289 = vadd.xlane.f32.xlu2 %v1288_v45 }
 0x77e   :  { %v4322_v46 = vsub.f32 %v1259_v10, %v1281_v44  ;;  %v2998_v44 = vld [vmem:[%s4970_s15 + $0x15] ss:$0 sm:$0xff] }
 0x780   :  { %v1285_v48 = vmul.f32 %v4322_v46, %v4322_v46 }
 0x782   :  { %v1287_v40 = vmul.f32 %v3762_v7, %v1285_v48  ;;  %v1297_v41 = vsel %vm149_vm2, %v1285_v48, 0.0 }
 0x784   :  { %v1291_v50 = vsel %vm149_vm2, %v1287_v40, 0.0 }
 0x785   :  { %1298 = vadd.xlane.f32.xlu2 %v1297_v41  ;;  %1292 = vadd.xlane.f32.xlu0 %v1291_v50  ;;  %v2999_v41 = vld [vmem:[%s4970_s15 + $0x16] ss:$0 sm:$0xff] }
 0x7ee   :  { %v1296_v58 = vpop.xlane.xlu1 %1295 }
 0x7f0   :  { %v1290_v59 = vpop.xlane.xlu2 %1289 }
 0x7f1   :  { %v1300_v61 = vsub.f32 %v1296_v58, %v1290_v59  ;;  %v3389_v58 = vld [vmem:[#allocation2 + $0xb8] sm:$0xff] }
 0x7f2   :  { %1613 = vmatpush.bf16.msra.mxu3 %v3389_v58 }
 0x7f3   :  { %v1302_v0 = vsel %vm4996_vm10, %v1290_v59, %v1300_v61  ;;  %v3388_v59 = vld [vmem:[#allocation2 + $0xb0] sm:$0xff] }
 0x7f4   :  { %v1304_v12 = vmul.f32 0.03125, %v1302_v0 }
 0x7f6   :  { %v1306_v14 = vadd.f32 1e-05, %v1304_v12  ;;  %1614 = vmatpush.bf16.msra.mxu3 %v3388_v59  ;;  %v3455_v59 = vld [vmem:[%s4960_s5 + $0x8] ss:$0 sm:$0xff] }
 0x7f8   :  { %3545 = vrsqrt.f32 %v1306_v14  ;;  %v1299_v26 = vpop.xlane.xlu2 %1298  ;;  %v1293_v16 = vpop.xlane.xlu0 %1292  ;;  %vm1314_vm14 = vweird.f32 %v1306_v14 }
 0x7f9   :  { %v1301_v23 = vsub.f32 %v1299_v26, %v1293_v16 }
 0x7fa   :  { %1615 = vmatpush.bf16.msra.mxu3 %v3387_v62 }
 0x7fb   :  { %v1303_v24 = vsel %vm4997_vm1, %v1293_v16, %v1301_v23 }
 0x7fc   :  { %v1305_v10 = vmul.f32 0.03125, %v1303_v24 }
 0x7fe   :  { %v3546_v25 = vpop.eup %3545  ;;  %v1307_v27 = vadd.f32 1e-05, %v1305_v10  ;;  %1616 = vmatpush.bf16.msra.mxu3 %v3386_v4  ;;  %v3384_v10 = vld [vmem:[#allocation2 + $0x90] sm:$0xff] }
 0x7ff   :  { %v1309_v11 = vmul.f32 %v3546_v25, %v1306_v14  ;;  %vm1315_vm13 = vweird.f32 %v3546_v25 }
 0x800   :  { %3547 = vrsqrt.f32 %v1307_v27  ;;  %vm1316_vm15 = vmor %vm1314_vm14, %vm1315_vm13  ;;  %vm1324_vm11 = vweird.f32 %v1307_v27 }
 0x801   :  { %v1310_v2 = vmul.f32 %v3546_v25, %v1309_v11 }
 0x802   :  { %1617 = vmatpush.bf16.msra.mxu3 %v3385_v21 }
 0x803   :  { %v1311_v28 = vmul.f32 0.5, %v1310_v2 }
 0x805   :  { %v1312_v29 = vsub.f32 1.5, %v1311_v28 }
 0x806   :  { %v3548_v20 = vpop.eup %3547  ;;  %1618 = vmatpush.bf16.msra.mxu3 %v3384_v10 }
 0x807   :  { %v1313_v30 = vmul.f32 %v3546_v25, %v1312_v29  ;;  %v1319_v33 = vmul.f32 %v3548_v20, %v1307_v27  ;;  %vm1325_vm8 = vweird.f32 %v3548_v20  ;;  %v3452_v27 = vld [vmem:[%s4960_s5 + $0xb] ss:$0 sm:$0xff] }
 0x808   :  { %vm1326_vm12 = vmor %vm1324_vm11, %vm1325_vm8  ;;  %v3383_v29 = vld [vmem:[#allocation2 + $0x88] sm:$0xff] }
 0x809   :  { %v1320_v34 = vmul.f32 %v3548_v20, %v1319_v33  ;;  %v1317_v18 = vsel %vm1316_vm15, %v3546_v25, %v1313_v30 }
 0x80a   :  { %v1328_v42 = vmul.f32 %v1317_v18, %v4313_v31  ;;  %1619 = vmatpush.bf16.msra.mxu3 %v3383_v29 }
 0x80b   :  { %v1321_v38 = vmul.f32 0.5, %v1320_v34  ;;  %v3046_v34 = vld [vmem:[%s4970_s15 + $0x21] ss:$0 sm:$0xff] }
 0x80c   :  { %v1330_v40 = vmul.f32 %v2998_v44, %v1328_v42 }
 0x80d   :  { %v1322_v39 = vsub.f32 1.5, %v1321_v38 }
 0x80e   :  { %v4389_v51 = vadd.f32 %v2999_v41, %v1330_v40  ;;  %v3454_v40 = vld [vmem:[%s4960_s5 + $0x9] ss:$0 sm:$0xff] }
 0x80f   :  { %v1323_v43 = vmul.f32 %v3548_v20, %v1322_v39 }
 0x811   :  { %v1327_v45 = vsel %vm1326_vm12, %v3548_v20, %v1323_v43  ;;  %v3453_v43 = vld [vmem:[%s4960_s5 + $0xa] ss:$0 sm:$0xff] }
 0x812   :  { %v1329_v48 = vmul.f32 %v1327_v45, %v4322_v46  ;;  %v4400_v46 = vld [vmem:[%s4970_s15 + $0x20] ss:$8 sm:$0x3] }
 0x813   :  { %v1347_v32 = vperm.slane %v4400_v46, 0  ;;  %v3382_v45 = vld [vmem:[#allocation2 + $0x80] sm:$0xff] }
 0x814   :  { %v1331_v50 = vmul.f32 %v2998_v44, %v1329_v48  ;;  %1620 = vmatpush.bf16.msra.mxu3 %v3382_v45 }
 0x816   :  { %v4391_v52 = vadd.f32 %v2999_v41, %v1331_v50 }
 0x818   :  { %v1343_v31 = vpack.c.bf16 %v4391_v52, %v4389_v51 }
 0x81a   :  { %3041 = vmatmul.msk.bf16.vlgmr.msrb.gmra.mxu3 %vm149_vm2, %v1343_v31  ;;  %3042 = vmatmul.msk.bf16.vlgmr.msra.gmra.mxu0 %vm149_vm2, %v1343_v31 }
 0x89d   :  { %v1403_v54 = vpop.f32.mrf.mxu3 }
 0x89e   :  { %v1404_v47 = vadd.f32 %v1403_v54, %v1347_v32 }
 0x8a0   :  { %v3043_v35 = vmul.f32 -1.442695, %v1404_v47 }
 0x8a2   :  { %3549 = vpow2.f32 %v3043_v35 }
 0x8a5   :  { %v1405_v36 = vpop.f32.mrf.mxu3 }
 0x8a6   :  { %v1406_v49 = vadd.f32 %v1405_v36, %v1347_v32 }
 0x8a8   :  { %v3550_v56 = vpop.eup %3549  ;;  %v3044_v57 = vmul.f32 -1.442695, %v1406_v49 }
 0x8a9   :  { %v1428_v53 = vadd.f32 1.0, %v3550_v56 }
 0x8aa   :  { %3551 = vpow2.f32 %v3044_v57 }
 0x8ab   :  { %3553 = vrcp.f32 %v1428_v53  ;;  %v1441_v9 = vand.u32 2147483648, %v1428_v53  ;;  %vm1435_vm1 = vweird.f32 %v1428_v53  ;;  %v1439_v15 = vand.u32 2147483647, %v1428_v53 }
 0x8ad   :  { %v1442_v14 = vor.u32 1.1754944e-38, %v1441_v9  ;;  %vm1440_vm14 = vcmp.eq.f32.partialorder %v1439_v15, 8.507059e+37 }
 0x8b0   :  { %v3552_v55 = vpop.eup %3551 }
 0x8b1   :  { %v3554_v61 = vpop.eup %3553  ;;  %v1429_v22 = vadd.f32 1.0, %v3552_v55 }
 0x8b2   :  { %v1431_v37 = vmul.f32 %v3554_v61, %v1428_v53  ;;  %vm1436_vm10 = vweird.f32 %v3554_v61 }
 0x8b3   :  { %3555 = vrcp.f32 %v1429_v22  ;;  %vm1437_vm13 = vmor %vm1435_vm1, %vm1436_vm10  ;;  %v1456_v16 = vand.u32 2147483648, %v1429_v22  ;;  %v1454_v24 = vand.u32 2147483647, %v1429_v22  ;;  %vm1450_vm8 = vweird.f32 %v1429_v22 }
 0x8b4   :  { %v1432_v0 = vsub.f32 1.0, %v1431_v37  ;;  %vm4998_vm10 = vcmp.ge.s32.totalorder %v3874_v17, 2  ;;  %vm4999_vm1 = vcmp.lt.s32.totalorder %v3867_v63, 3 }
 0x8b5   :  { %v1457_v2 = vor.u32 1.1754944e-38, %v1456_v16  ;;  %vm1455_vm12 = vcmp.eq.f32.partialorder %v1454_v24, 8.507059e+37 }
 0x8b6   :  { %v1433_v1 = vmul.f32 %v3554_v61, %v1432_v0 }
 0x8b8   :  { %v1434_v5 = vadd.f32 %v3554_v61, %v1433_v1 }
 0x8b9   :  { %v3556_v12 = vpop.eup %3555 }
 0x8ba   :  { %v1446_v60 = vmul.f32 %v3556_v12, %v1429_v22  ;;  %v1438_v8 = vsel %vm1437_vm13, %v3554_v61, %v1434_v5  ;;  %vm1451_vm15 = vweird.f32 %v3556_v12  ;;  %vm5000_vm13 = vmmov %vm4999_vm1 }
 0x8bb   :  { %v1443_v26 = vsel %vm1440_vm14, %v1442_v14, %v1438_v8  ;;  %vm1452_vm11 = vmor %vm1450_vm8, %vm1451_vm15  ;;  %vm5001_vm14 = vcmp.ge.s32.totalorder %v3874_v17, 3  ;;  %vm5002_vm15 = vcmp.ge.s32.totalorder %v3876_v19, 3 }
 0x8bc   :  { %v1447_v13 = vsub.f32 1.0, %v1446_v60  ;;  %v1460_v25 = vmul.f32 %v1443_v26, %v1404_v47 }
 0x8be   :  { %v1448_v23 = vmul.f32 %v3556_v12, %v1447_v13  ;;  %v1465_v30 = vmul.f32 %v3452_v27, %v1460_v25  ;;  %v1471_v18 = vrot.slane %v1460_v25, 7  ;;  %v1483_v38 = vrot.slane %v1460_v25, 6 }
 0x8bf   :  { %v1495_v48 = vrot.slane %v1460_v25, 5 }
 0x8c0   :  { %v1449_v11 = vadd.f32 %v3556_v12, %v1448_v23  ;;  %v1468_v50 = vadd.f32 %v3046_v34, %v1465_v30 }
 0x8c2   :  { %v1453_v28 = vsel %vm1452_vm11, %v3556_v12, %v1449_v11 }
 0x8c3   :  { %v1458_v20 = vsel %vm1455_vm12, %v1457_v2, %v1453_v28 }
 0x8c4   :  { %v1461_v33 = vmul.f32 %v1458_v20, %v1406_v49 }
 0x8c6   :  { %v1466_v39 = vmul.f32 %v3452_v27, %v1461_v33  ;;  %v1472_v42 = vrot.slane %v1461_v33, 7  ;;  %v1484_v44 = vrot.slane %v1461_v33, 6  ;;  %v1496_v41 = vrot.slane %v1461_v33, 5 }
 0x8c8   :  { %v1473_v31 = vsel %vm361_vm4, %v1471_v18, %v1472_v42  ;;  %v1474_v32 = vsel %vm361_vm4, %v1472_v42, %v1471_v18  ;;  %v1485_v54 = vsel %vm378_vm6, %v1483_v38, %v1484_v44  ;;  %v1486_v36 = vsel %vm378_vm6, %v1484_v44, %v1483_v38 }
 0x8c9   :  { %v1475_v47 = vsel %vm99_vm5, %v1474_v32, 0.0  ;;  %v1476_v35 = vsel %vm100_vm7, %v1473_v31, 0.0  ;;  %v1488_v49 = vsel %vm102_vm9, %v1485_v54, 0.0  ;;  %v1469_v56 = vadd.f32 %v3046_v34, %v1466_v39  ;;  %v1417_v31 = vpop.f32.mrf.mxu0  ;;  %v3052_v54 = vld [vmem:[%s4970_s15 + $0x22] ss:$0 sm:$0xff] }
 0x8ca   :  { %v1478_v57 = vmul.f32 %v3453_v43, %v1475_v47  ;;  %v1479_v53 = vmul.f32 %v3453_v43, %v1476_v35  ;;  %v1487_v58 = vsel %vm4998_vm10, %v1486_v36, 0.0  ;;  %v1491_v61 = vmul.f32 %v3454_v40, %v1488_v49  ;;  %v3397_v47 = vld [vmem:[%s4962_s7 + $0xb8] sm:$0xff] }
 0x8cb   :  { %v1490_v55 = vmul.f32 %v3454_v40, %v1487_v58  ;;  %v1497_v22 = vsel %vm4999_vm1, %v1495_v48, %v1496_v41  ;;  %v1498_v37 = vsel %vm5000_vm13, %v1496_v41, %v1495_v48  ;;  %v1348_v32 = vperm.slane %v4400_v46, 1  ;;  %1791 = vmatpush.bf16.msrb.mxu0 %v3397_v47 }
 0x8cc   :  { %v1481_v62 = vadd.f32 %v1479_v53, %v1469_v56  ;;  %v1499_v0 = vsel %vm5001_vm14, %v1498_v37, 0.0  ;;  %v1500_v1 = vsel %vm5002_vm15, %v1497_v22, 0.0  ;;  %v1480_v4 = vadd.f32 %v1478_v57, %v1468_v50  ;;  %v3396_v57 = vld [vmem:[%s4962_s7 + $0xb0] sm:$0xff]  ;;  %v3394_v37 = vld [vmem:[%s4962_s7 + $0xa0] sm:$0xff] }
 0x8cd   :  { %v1502_v12 = vmul.f32 %v3455_v59, %v1499_v0  ;;  %v1503_v15 = vmul.f32 %v3455_v59, %v1500_v1  ;;  %v4455_v56 = vadd.f32 %v1417_v31, %v1348_v32  ;;  %v3395_v59 = vld [vmem:[%s4962_s7 + $0xa8] sm:$0xff] }
 0x8ce   :  { %v1492_v5 = vadd.f32 %v1490_v55, %v1480_v4  ;;  %v1493_v9 = vadd.f32 %v1491_v61, %v1481_v62  ;;  %v3393_v4 = vld [vmem:[%s4962_s7 + $0x98] sm:$0xff] }
 0x8cf   :  { %1792 = vmatpush.bf16.msrb.mxu0 %v3396_v57  ;;  %v3086_v58 = vmul.f32 -1.442695, %v4455_v56 }
 0x8d0   :  { %v1504_v60 = vadd.f32 %v1502_v12, %v1492_v5  ;;  %v1505_v8 = vadd.f32 %v1503_v15, %v1493_v9  ;;  %v3392_v9 = vld [vmem:[%s4962_s7 + $0x90] sm:$0xff] }
 0x8d1   :  { %v1419_v35 = vpop.f32.mrf.mxu0 }
 0x8d2   :  { %v3050_v21 = vmul.f32 -1.442695, %v1504_v60  ;;  %v3051_v14 = vmul.f32 -1.442695, %v1505_v8  ;;  %v4460_v53 = vadd.f32 %v1419_v35, %v1348_v32 }
 0x8d3   :  { %1793 = vmatpush.bf16.msrb.mxu0 %v3395_v59 }
 0x8d4   :  { %3557 = vpow2.f32 %v3050_v21  ;;  %v3087_v55 = vmul.f32 -1.442695, %v4460_v53 }
 0x8d5   :  { %3559 = vpow2.f32 %v3051_v14 }
 0x8d7   :  { %1794 = vmatpush.bf16.msrb.mxu0 %v3394_v37 }
 0x8da   :  { %v3558_v13 = vpop.eup %3557 }
 0x8db   :  { %v3560_v26 = vpop.eup %3559  ;;  %v1512_v16 = vadd.f32 1.0, %v3558_v13  ;;  %1795 = vmatpush.bf16.msrb.mxu0 %v3393_v4  ;;  %v3391_v13 = vld [vmem:[%s4962_s7 + $0x88] sm:$0xff] }
 0x8dc   :  { %v1513_v23 = vadd.f32 1.0, %v3560_v26 }
 0x8dd   :  { %3561 = vrcp.f32 %v1512_v16  ;;  %v1525_v2 = vand.u32 2147483648, %v1512_v16  ;;  %v1523_v20 = vand.u32 2147483647, %v1512_v16  ;;  %vm1519_vm12 = vweird.f32 %v1512_v16 }
 0x8de   :  { %3563 = vrcp.f32 %v1513_v23  ;;  %v1540_v30 = vand.u32 2147483648, %v1513_v23  ;;  %v1538_v34 = vand.u32 2147483647, %v1513_v23  ;;  %vm1534_vm1 = vweird.f32 %v1513_v23 }
 0x8df   :  { %v1526_v38 = vor.u32 1.1754944e-38, %v1525_v2  ;;  %vm1524_vm13 = vcmp.eq.f32.partialorder %v1523_v20, 8.507059e+37  ;;  %1796 = vmatpush.bf16.msrb.mxu0 %v3392_v9 }
 0x8e0   :  { %v1541_v43 = vor.u32 1.1754944e-38, %v1540_v30  ;;  %vm1539_vm15 = vcmp.eq.f32.partialorder %v1538_v34, 8.507059e+37 }
 0x8e3   :  { %v3562_v24 = vpop.eup %3561  ;;  %1797 = vmatpush.bf16.msrb.mxu0 %v3391_v13 }
 0x8e4   :  { %v3564_v10 = vpop.eup %3563  ;;  %v1515_v25 = vmul.f32 %v3562_v24, %v1512_v16  ;;  %vm1520_vm8 = vweird.f32 %v3562_v24  ;;  %v3390_v16 = vld [vmem:[%s4962_s7 + $0x80] sm:$0xff] }
 0x8e5   :  { %v1530_v27 = vmul.f32 %v3564_v10, %v1513_v23  ;;  %vm1535_vm11 = vweird.f32 %v3564_v10  ;;  %vm1521_vm10 = vmor %vm1519_vm12, %vm1520_vm8  ;;  %vm5003_vm8 = vcmp.eq.s32.totalorder %v3876_v19, 0 }
 0x8e6   :  { %v1516_v11 = vsub.f32 1.0, %v1515_v25  ;;  %vm1536_vm14 = vmor %vm1534_vm1, %vm1535_vm11 }
 0x8e7   :  { %v1531_v28 = vsub.f32 1.0, %v1530_v27  ;;  %1798 = vmatpush.bf16.msrb.mxu0 %v3390_v16 }
 0x8e8   :  { %v1517_v29 = vmul.f32 %v3562_v24, %v1516_v11 }
 0x8e9   :  { %v1532_v33 = vmul.f32 %v3564_v10, %v1531_v28 }
 0x8ea   :  { %v1518_v18 = vadd.f32 %v3562_v24, %v1517_v29 }
 0x8eb   :  { %v1533_v39 = vadd.f32 %v3564_v10, %v1532_v33 }
 0x8ec   :  { %v1522_v42 = vsel %vm1521_vm10, %v3562_v24, %v1518_v18 }
 0x8ed   :  { %v1527_v44 = vsel %vm1524_vm13, %v1526_v38, %v1522_v42  ;;  %v1537_v45 = vsel %vm1536_vm14, %v3564_v10, %v1533_v39 }
 0x8ee   :  { %v1542_v48 = vsel %vm1539_vm15, %v1541_v43, %v1537_v45  ;;  %v4442_v40 = vmul.f32 %v1527_v44, %v1504_v60 }
 0x8ef   :  { %v4444_v41 = vmul.f32 %v1542_v48, %v1505_v8 }
 0x8f1   :  { %v1563_v50 = vpack.c.bf16 %v4444_v41, %v4442_v40 }
 0x8f3   :  { %1621 = vmatmul.bf16.vlgmr.msra.gmra.mxu3 %v1563_v50 }
 0x976   :  { %v1622_v36 = vpop.f32.mrf.mxu3 }
 0x977   :  { %v1623_v49 = vadd.f32 %v3052_v54, %v1622_v36 }
 0x979   :  { %v1627_v46 = vmul.f32 1.442695, %v1623_v49 }
 0x97b   :  { %3565 = vpow2.f32 %v1627_v46 }
 0x97c   :  { %3567 = vpow2.f32 %v3086_v58 }
 0x97d   :  { %3569 = vpow2.f32 %v3087_v55 }
 0x97e   :  { %v1624_v61 = vpop.f32.mrf.mxu3 }
 0x97f   :  { %v1625_v22 = vadd.f32 %v3052_v54, %v1624_v61 }
 0x981   :  { %v3566_v62 = vpop.eup %3565  ;;  %v1629_v0 = vmul.f32 1.442695, %v1625_v22 }
 0x982   :  { %v1631_v1 = vadd.f32 2.0, %v3566_v62  ;;  %v3568_v5 = vpop.eup %3567 }
 0x983   :  { %3571 = vpow2.f32 %v1629_v0  ;;  %v3570_v12 = vpop.eup %3569  ;;  %v4476_v60 = vadd.f32 1.0, %v3568_v5 }
 0x984   :  { %3573 = vrcp.f32 %v1631_v1  ;;  %v4478_v21 = vadd.f32 1.0, %v3570_v12 }
 0x985   :  { %vm1695_vm11 = vweird.f32 %v4476_v60  ;;  %v1701_v61 = vand.u32 2147483648, %v4476_v60 }
 0x986   :  { %v1716_v1 = vand.u32 2147483648, %v4478_v21  ;;  %vm1710_vm13 = vweird.f32 %v4478_v21 }
 0x989   :  { %v3572_v15 = vpop.eup %3571 }
 0x98a   :  { %v3574_v8 = vpop.eup %3573  ;;  %v1632_v14 = vadd.f32 2.0, %v3572_v15 }
 0x98b   :  { %v1635_v26 = vsel %vm97_vm0, 0.0, %v3574_v8  ;;  %v1699_v8 = vand.u32 2147483647, %v4476_v60 }
 0x98c   :  { %3575 = vrcp.f32 %v1632_v14  ;;  %v1637_v23 = vsub.f32 1.0, %v1635_v26  ;;  %v1649_v33 = vrot.slane %v1635_v26, 7  ;;  %v1714_v14 = vand.u32 2147483647, %v4478_v21 }
 0x98d   :  { %3577 = vrcp.f32 %v4476_v60  ;;  %vm1700_vm15 = vcmp.eq.f32.partialorder %v1699_v8, 8.507059e+37 }
 0x98e   :  { %3579 = vrcp.f32 %v4478_v21  ;;  %v1639_v11 = vmul.f32 %v1637_v23, %v4442_v40 }
 0x990   :  { %v1641_v34 = vrot.slane %v1639_v11, 7 }
 0x992   :  { %v3576_v24 = vpop.eup %3575 }
 0x993   :  { %v4490_v10 = vpop.eup %3577  ;;  %v1636_v25 = vsel %vm5003_vm8, 0.0, %v3576_v24  ;;  %vm1715_vm8 = vcmp.eq.f32.partialorder %v1714_v14, 8.507059e+37 }
 0x994   :  { %v4494_v27 = vpop.eup %3579  ;;  %v1638_v2 = vsub.f32 1.0, %v1636_v25  ;;  %v1650_v28 = vrot.slane %v1636_v25, 7  ;;  %v1691_v20 = vmul.f32 %v4490_v10, %v4476_v60  ;;  %vm1696_vm12 = vweird.f32 %v4490_v10 }
 0x995   :  { %v1706_v30 = vmul.f32 %v4494_v27, %v4478_v21  ;;  %vm1711_vm10 = vweird.f32 %v4494_v27  ;;  %vm4529_vm1 = vmor %vm1695_vm11, %vm1696_vm12  ;;  %vm5008_vm11 = vcmp.lt.s32.totalorder %v3753_v3, 32 }
 0x996   :  { %v1640_v29 = vmul.f32 %v1638_v2, %v4444_v41  ;;  %v1651_v38 = vsel %vm361_vm4, %v1649_v33, %v1650_v28  ;;  %v1652_v39 = vsel %vm361_vm4, %v1650_v28, %v1649_v33  ;;  %v1692_v44 = vsub.f32 1.0, %v1691_v20  ;;  %vm4536_vm14 = vmor %vm1710_vm13, %vm1711_vm10 }
 0x997   :  { %v1707_v45 = vsub.f32 1.0, %v1706_v30  ;;  %v1653_v31 = vmul.f32 %v1652_v39, %v1635_v26  ;;  %v1654_v32 = vmul.f32 %v1651_v38, %v1636_v25  ;;  %v1717_v2 = vor.u32 1.1754944e-38, %v1716_v1  ;;  %vm5009_vm12 = vmmov %vm5008_vm11 }
 0x998   :  { %v1642_v18 = vrot.slane %v1640_v29, 7  ;;  %v1693_v35 = vmul.f32 %v4490_v10, %v1692_v44  ;;  %vm5010_vm10 = vmmov %vm5008_vm11 }
 0x999   :  { %v1708_v36 = vmul.f32 %v4494_v27, %v1707_v45  ;;  %v1664_v46 = vrot.slane %v1654_v32, 6  ;;  %v1663_v58 = vrot.slane %v1653_v31, 6 }
 0x99a   :  { %v1643_v42 = vsel %vm361_vm4, %v1641_v34, %v1642_v18  ;;  %v1644_v43 = vsel %vm361_vm4, %v1642_v18, %v1641_v34  ;;  %v1694_v62 = vadd.f32 %v4490_v10, %v1693_v35 }
 0x99b   :  { %v1646_v48 = vmul.f32 %v1643_v42, %v1636_v25  ;;  %v1645_v50 = vmul.f32 %v1644_v43, %v1635_v26  ;;  %v1709_v0 = vadd.f32 %v4494_v27, %v1708_v36  ;;  %v1665_v9 = vsel %vm378_vm6, %v1663_v58, %v1664_v46 }
 0x99c   :  { %v1666_v12 = vsel %vm378_vm6, %v1664_v46, %v1663_v58  ;;  %v1698_v23 = vsel %vm4529_vm1, %v4490_v10, %v1694_v62  ;;  %v1668_v60 = vmul.f32 %v1665_v9, %v1654_v32  ;;  %vm5011_vm1 = vmmov %vm5010_vm10 }
 0x99d   :  { %v1648_v54 = vadd.f32 %v1646_v48, %v1640_v29  ;;  %v1647_v47 = vadd.f32 %v1645_v50, %v1639_v11  ;;  %v1713_v24 = vsel %vm4536_vm14, %v4494_v27, %v1709_v0  ;;  %v1667_v25 = vmul.f32 %v1666_v12, %v1653_v31  ;;  %v3085_v29 = vld [vmem:[%s4970_s15 + $0x23] ss:$0 sm:$0xff] }
 0x99e   :  { %v1702_v11 = vor.u32 1.1754944e-38, %v1701_v61  ;;  %v1718_v27 = vsel %vm1715_vm8, %v1717_v2, %v1713_v24  ;;  %v1678_v18 = vmul.f32 %v3085_v29, %v4442_v40  ;;  %v1679_v38 = vmul.f32 %v3085_v29, %v4444_v41  ;;  %v3404_v24 = vld [vmem:[%s4959_s4 + $0xf4] sm:$0xf]  ;;  %v3166_v2 = vld [vmem:[%s4959_s4 + $0xe0] sm:$0xf] }
 0x99f   :  { %v1656_v49 = vrot.slane %v1648_v54, 6  ;;  %v1655_v57 = vrot.slane %v1647_v47, 6  ;;  %v1721_v42 = vmul.f32 %v1718_v27, %v4460_v53 }
 0x9a0   :  { %v1703_v30 = vsel %vm1700_vm15, %v1702_v11, %v1698_v23  ;;  %v3405_v23 = vld [vmem:[%s4959_s4 + $0xf4] sm:$0xf0] }
 0x9a1   :  { %v1657_v59 = vsel %vm378_vm6, %v1655_v57, %v1656_v49  ;;  %v1658_v55 = vsel %vm378_vm6, %v1656_v49, %v1655_v57  ;;  %v1720_v39 = vmul.f32 %v1703_v30, %v4455_v56 }
 0x9a2   :  { %v1659_v22 = vmul.f32 %v1658_v55, %v1653_v31  ;;  %v1660_v37 = vmul.f32 %v1657_v59, %v1654_v32  ;;  %v3104_v31 = vld [vmem:[%s4970_s15 + $0x24] ss:$0 sm:$0xff] }
 0x9a4   :  { %v1661_v4 = vadd.f32 %v1659_v22, %v1647_v47  ;;  %v1662_v5 = vadd.f32 %v1660_v37, %v1648_v54 }
 0x9a6   :  { %v1669_v26 = vrot.slane %v1661_v4, 4  ;;  %v1670_v16 = vrot.slane %v1662_v5, 4 }
 0x9a8   :  { %v1671_v21 = vsel %vm577_vm3, %v1669_v26, %v1670_v16  ;;  %v1672_v28 = vsel %vm577_vm3, %v1670_v16, %v1669_v26  ;;  %v3174_v16 = vld [vmem:[%s4959_s4 + $0xf0] sm:$0xf] }
 0x9a9   :  { %v1673_v10 = vmul.f32 %v1672_v28, %v1667_v25  ;;  %v1674_v20 = vmul.f32 %v1671_v21, %v1668_v60  ;;  %v3175_v25 = vor.u32 %v3405_v23, %v3174_v16  ;;  %v3176_v60 = vld [vmem:[%s4959_s4 + $0xf8] sm:$0xf0]  ;;  %v3403_v21 = vld [vmem:[%s4959_s4 + $0xe4] sm:$0xf0]  ;;  %v3402_v28 = vld [vmem:[%s4959_s4 + $0xe4] sm:$0xf] }
 0x9aa   :  { %v3179_v11 = vor.u32 %v3404_v24, %v3176_v60  ;;  %v3167_v29 = vor.u32 %v3403_v21, %v3166_v2 }
 0x9ab   :  { %v1675_v33 = vadd.f32 %v1673_v10, %v1661_v4  ;;  %v1676_v34 = vadd.f32 %v1674_v20, %v1662_v5  ;;  %1945 = vmatpush.bf16.msrb.mxu1 %v3175_v25  ;;  %v3168_v10 = vld [vmem:[%s4959_s4 + $0xe8] sm:$0xf0] }
 0x9ac   :  { %1959 = vmatpush.bf16.msrb.mxu2 %v3179_v11  ;;  %v3171_v27 = vor.u32 %v3402_v28, %v3168_v10 }
 0x9ad   :  { %v1680_v43 = vadd.f32 %v1678_v18, %v1675_v33  ;;  %v1681_v44 = vadd.f32 %v1679_v38, %v1676_v34  ;;  %v3158_v34 = vld [vmem:[%s4959_s4 + $0xd0] sm:$0xf]  ;;  %v3401_v18 = vld [vmem:[%s4959_s4 + $0xd4] sm:$0xf0]  ;;  %v3400_v38 = vld [vmem:[%s4959_s4 + $0xd4] sm:$0xf] }
 0x9af   :  { %v1722_v45 = vmul.f32 %v1720_v39, %v1680_v43  ;;  %v1723_v48 = vmul.f32 %v1721_v42, %v1681_v44  ;;  %1946 = vmatpush.bf16.msrb.mxu1 %v3167_v29  ;;  %v3159_v42 = vor.u32 %v3401_v18, %v3158_v34  ;;  %v3160_v43 = vld [vmem:[%s4959_s4 + $0xd8] sm:$0xf0] }
 0x9b0   :  { %1960 = vmatpush.bf16.msrb.mxu2 %v3171_v27 }
 0x9b1   :  { %v1741_v50 = vpack.c.bf16 %v1723_v48, %v1722_v45  ;;  %v3163_v45 = vor.u32 %v3400_v38, %v3160_v43  ;;  %v3150_v48 = vld [vmem:[%s4959_s4 + $0xc0] sm:$0xf]  ;;  %v3411_v38 = vld [vmem:[#allocation2 + $0xe8] sm:$0xff] }
 0x9b2   :  { %v3410_v43 = vld [vmem:[#allocation2 + $0xe0] sm:$0xff] }
 0x9b3   :  { %1799 = vmatmul.bf16.vlgmr.msrb.gmra.mxu0 %v1741_v50  ;;  %v3399_v50 = vld [vmem:[%s4959_s4 + $0xc4] sm:$0xf0]  ;;  %1947 = vmatpush.bf16.msrb.mxu1 %v3159_v42 }
 0x9b4   :  { %1961 = vmatpush.bf16.msrb.mxu2 %v3163_v45 }
 0xa30   :  { %v1800_v32 = vpop.f32.mrf.mxu0 }
 0xa31   :  { %v1801_v54 = vadd.f32 %v3104_v31, %v1800_v32  ;;  %v3398_v32 = vld [vmem:[%s4959_s4 + $0xc4] sm:$0xf] }
 0xa33   :  { %v1805_v40 = vadd.f32 %v1801_v54, %v4389_v51  ;;  %v3152_v54 = vld [vmem:[%s4959_s4 + $0xc8] sm:$0xf0] }
 0xa35   :  { %v1817_v41 = vsel %vm149_vm2, %v1805_v40, 0.0  ;;  %v1809_v56 = vmul.f32 %v3762_v7, %v1805_v40 }
 0xa36   :  { %1818 = vadd.xlane.f32.xlu2 %v1817_v41  ;;  %v3155_v41 = vor.u32 %v3398_v32, %v3152_v54  ;;  %v3409_v32 = vld [vmem:[#allocation2 + $0xd8] sm:$0xff] }
 0xa37   :  { %v1811_v53 = vsel %vm149_vm2, %v1809_v56, 0.0 }
 0xa38   :  { %v1802_v47 = vpop.f32.mrf.mxu0  ;;  %1812 = vadd.xlane.f32.xlu0 %v1811_v53  ;;  %1962 = vmatpush.bf16.msrb.mxu2 %v3155_v41 }
 0xa39   :  { %v1803_v35 = vadd.f32 %v3104_v31, %v1802_v47  ;;  %v3151_v31 = vor.u32 %v3399_v50, %v3150_v48 }
 0xa3b   :  { %v1806_v36 = vadd.f32 %v1803_v35, %v4391_v52  ;;  %1948 = vmatpush.bf16.msrb.mxu1 %v3151_v31 }
 0xa3d   :  { %v1810_v49 = vmul.f32 %v3762_v7, %v1806_v36  ;;  %v1820_v46 = vsel %vm149_vm2, %v1806_v36, 0.0 }
 0xa3f   :  { %v1814_v57 = vsel %vm149_vm2, %v1810_v49, 0.0 }
 0xa40   :  { %1815 = vadd.xlane.f32.xlu1 %v1814_v57  ;;  %1821 = vadd.xlane.f32.xlu0 %v1820_v46 }
 0xaa9   :  { %v1819_v51 = vpop.xlane.xlu2 %1818 }
 0xaab   :  { %v1813_v58 = vpop.xlane.xlu0 %1812 }
 0xaac   :  { %v1823_v59 = vsub.f32 %v1819_v51, %v1813_v58 }
 0xaae   :  { %v1825_v55 = vsel %vm5008_vm11, %v1813_v58, %v1823_v59 }
 0xaaf   :  { %v1827_v61 = vmul.f32 0.03125, %v1825_v55 }
 0xab1   :  { %v4570_v22 = vsub.f32 %v1805_v40, %v1827_v61 }
 0xab3   :  { %v1816_v37 = vpop.xlane.xlu1 %1815  ;;  %v1822_v62 = vpop.xlane.xlu0 %1821  ;;  %v1831_v52 = vmul.f32 %v4570_v22, %v4570_v22 }
 0xab4   :  { %v1824_v0 = vsub.f32 %v1822_v62, %v1816_v37 }
 0xab5   :  { %v1841_v1 = vsel %vm149_vm2, %v1831_v52, 0.0  ;;  %v1833_v4 = vmul.f32 %v3762_v7, %v1831_v52 }
 0xab6   :  { %v1826_v5 = vsel %vm5009_vm12, %v1816_v37, %v1824_v0  ;;  %1842 = vadd.xlane.f32.xlu0 %v1841_v1 }
 0xab7   :  { %v1828_v9 = vmul.f32 0.03125, %v1826_v5  ;;  %v1835_v12 = vsel %vm149_vm2, %v1833_v4, 0.0  ;;  %v3137_v5 = vld [vmem:[%s4970_s15 + $0x25] ss:$0 sm:$0xff] }
 0xab8   :  { %1836 = vadd.xlane.f32.xlu1 %v1835_v12 }
 0xab9   :  { %v4579_v15 = vsub.f32 %v1806_v36, %v1828_v9 }
 0xabb   :  { %v1832_v8 = vmul.f32 %v4579_v15, %v4579_v15 }
 0xabd   :  { %v1834_v14 = vmul.f32 %v3762_v7, %v1832_v8  ;;  %v1844_v13 = vsel %vm149_vm2, %v1832_v8, 0.0 }
 0xabf   :  { %v1838_v26 = vsel %vm149_vm2, %v1834_v14, 0.0 }
 0xac0   :  { %1845 = vadd.xlane.f32.xlu1 %v1844_v13  ;;  %1839 = vadd.xlane.f32.xlu2 %v1838_v26  ;;  %v3138_v13 = vld [vmem:[%s4970_s15 + $0x26] ss:$0 sm:$0xff] }
 0xb29   :  { %v1843_v20 = vpop.xlane.xlu0 %1842 }
 0xb2b   :  { %v1837_v30 = vpop.xlane.xlu1 %1836 }
 0xb2c   :  { %v1847_v33 = vsub.f32 %v1843_v20, %v1837_v30  ;;  %v3413_v20 = vld [vmem:[#allocation2 + $0xf8] sm:$0xff] }
 0xb2d   :  { %2160 = vmatpush.bf16.msra.mxu1 %v3413_v20  ;;  %v3459_v20 = vld [vmem:[%s4960_s5 + $0xc] ss:$0 sm:$0xff] }
 0xb2e   :  { %v1849_v39 = vsel %vm5010_vm10, %v1837_v30, %v1847_v33  ;;  %v3412_v30 = vld [vmem:[#allocation2 + $0xf0] sm:$0xff] }
 0xb2f   :  { %v1851_v44 = vmul.f32 0.03125, %v1849_v39 }
 0xb31   :  { %v1853_v40 = vadd.f32 1e-05, %v1851_v44  ;;  %2161 = vmatpush.bf16.msra.mxu1 %v3412_v30 }
 0xb33   :  { %3581 = vrsqrt.f32 %v1853_v40  ;;  %v1846_v56 = vpop.xlane.xlu1 %1845  ;;  %v1840_v53 = vpop.xlane.xlu2 %1839  ;;  %vm1861_vm14 = vweird.f32 %v1853_v40 }
 0xb34   :  { %v1848_v47 = vsub.f32 %v1846_v56, %v1840_v53 }
 0xb35   :  { %2162 = vmatpush.bf16.msra.mxu1 %v3411_v38 }
 0xb36   :  { %v1850_v35 = vsel %vm5011_vm1, %v1840_v53, %v1848_v47 }
 0xb37   :  { %v1852_v36 = vmul.f32 0.03125, %v1850_v35 }
 0xb39   :  { %v3582_v49 = vpop.eup %3581  ;;  %v1854_v57 = vadd.f32 1e-05, %v1852_v36  ;;  %2163 = vmatpush.bf16.msra.mxu1 %v3410_v43  ;;  %v3408_v36 = vld [vmem:[#allocation2 + $0xd0] sm:$0xff] }
 0xb3a   :  { %v1856_v46 = vmul.f32 %v3582_v49, %v1853_v40  ;;  %vm1862_vm13 = vweird.f32 %v3582_v49 }
 0xb3b   :  { %3583 = vrsqrt.f32 %v1854_v57  ;;  %vm1863_vm15 = vmor %vm1861_vm14, %vm1862_vm13  ;;  %vm1871_vm11 = vweird.f32 %v1854_v57 }
 0xb3c   :  { %v1857_v51 = vmul.f32 %v3582_v49, %v1856_v46 }
 0xb3d   :  { %2164 = vmatpush.bf16.msra.mxu1 %v3409_v32 }
 0xb3e   :  { %v1858_v58 = vmul.f32 0.5, %v1857_v51 }
 0xb40   :  { %v1859_v59 = vsub.f32 1.5, %v1858_v58  ;;  %v3407_v58 = vld [vmem:[#allocation2 + $0xc8] sm:$0xff] }
 0xb41   :  { %v3584_v55 = vpop.eup %3583  ;;  %2165 = vmatpush.bf16.msra.mxu1 %v3408_v36 }
 0xb42   :  { %v1860_v61 = vmul.f32 %v3582_v49, %v1859_v59  ;;  %v1866_v37 = vmul.f32 %v3584_v55, %v1854_v57  ;;  %vm1872_vm8 = vweird.f32 %v3584_v55  ;;  %v3456_v59 = vld [vmem:[%s4960_s5 + $0xf] ss:$0 sm:$0xff] }
 0xb43   :  { %vm1873_vm12 = vmor %vm1871_vm11, %vm1872_vm8 }
 0xb44   :  { %v1867_v62 = vmul.f32 %v3584_v55, %v1866_v37  ;;  %v1864_v52 = vsel %vm1863_vm15, %v3582_v49, %v1860_v61 }
 0xb45   :  { %v1875_v4 = vmul.f32 %v1864_v52, %v4570_v22  ;;  %2166 = vmatpush.bf16.msra.mxu1 %v3407_v58 }
 0xb46   :  { %v1868_v0 = vmul.f32 0.5, %v1867_v62 }
 0xb47   :  { %v1877_v8 = vmul.f32 %v3137_v5, %v1875_v4 }
 0xb48   :  { %v1869_v1 = vsub.f32 1.5, %v1868_v0 }
 0xb49   :  { %v4646_v16 = vadd.f32 %v3138_v13, %v1877_v8  ;;  %v3185_v8 = vld [vmem:[%s4970_s15 + $0x31] ss:$0 sm:$0xff] }
 0xb4a   :  { %v1870_v9 = vmul.f32 %v3584_v55, %v1869_v1  ;;  %v3457_v1 = vld [vmem:[%s4960_s5 + $0xe] ss:$0 sm:$0xff] }
 0xb4c   :  { %v1874_v12 = vsel %vm1873_vm12, %v3584_v55, %v1870_v9 }
 0xb4d   :  { %v1876_v14 = vmul.f32 %v1874_v12, %v4579_v15  ;;  %v4657_v15 = vld [vmem:[%s4970_s15 + $0x30] ss:$8 sm:$0x3] }
 0xb4e   :  { %v1894_v24 = vperm.slane %v4657_v15, 0 }
 0xb4f   :  { %v1878_v26 = vmul.f32 %v3137_v5, %v1876_v14  ;;  %v3406_v5 = vld [vmem:[#allocation2 + $0xc0] sm:$0xff] }
 0xb50   :  { %2167 = vmatpush.bf16.msra.mxu1 %v3406_v5 }
 0xb51   :  { %v4648_v23 = vadd.f32 %v3138_v13, %v1878_v26 }
 0xb53   :  { %v1890_v22 = vpack.c.bf16 %v4648_v23, %v4646_v16 }
 0xb55   :  { %3180 = vmatmul.msk.bf16.vlgmr.msrb.gmra.mxu1 %vm149_vm2, %v1890_v22  ;;  %3181 = vmatmul.msk.bf16.vlgmr.msrb.gmra.mxu2 %vm149_vm2, %v1890_v22 }
 0xbd2   :  { %v1950_v25 = vpop.f32.mrf.mxu1 }
 0xbd3   :  { %v1951_v60 = vadd.f32 %v1950_v25, %v1894_v24 }
 0xbd5   :  { %v3182_v11 = vmul.f32 -1.442695, %v1951_v60 }
 0xbd7   :  { %3585 = vpow2.f32 %v3182_v11 }
 0xbda   :  { %v1952_v2 = vpop.f32.mrf.mxu1 }
 0xbdb   :  { %v1953_v21 = vadd.f32 %v1952_v2, %v1894_v24  ;;  %v3458_v24 = vld [vmem:[%s4960_s5 + $0xd] ss:$0 sm:$0xff] }
 0xbdd   :  { %v3586_v28 = vpop.eup %3585  ;;  %v3183_v29 = vmul.f32 -1.442695, %v1953_v21 }
 0xbde   :  { %v1975_v10 = vadd.f32 1.0, %v3586_v28 }
 0xbdf   :  { %3587 = vpow2.f32 %v3183_v29 }
 0xbe0   :  { %3589 = vrcp.f32 %v1975_v10  ;;  %v1988_v45 = vand.u32 2147483648, %v1975_v10  ;;  %vm1982_vm1 = vweird.f32 %v1975_v10  ;;  %v1986_v50 = vand.u32 2147483647, %v1975_v10 }
 0xbe2   :  { %v1989_v40 = vor.u32 1.1754944e-38, %v1988_v45  ;;  %vm1987_vm14 = vcmp.eq.f32.partialorder %v1986_v50, 8.507059e+37 }
 0xbe5   :  { %v3588_v27 = vpop.eup %3587 }
 0xbe6   :  { %v3590_v33 = vpop.eup %3589  ;;  %v1976_v18 = vadd.f32 1.0, %v3588_v27 }
 0xbe7   :  { %v1978_v34 = vmul.f32 %v3590_v33, %v1975_v10  ;;  %vm1983_vm10 = vweird.f32 %v3590_v33 }
 0xbe8   :  { %3591 = vrcp.f32 %v1976_v18  ;;  %vm1984_vm13 = vmor %vm1982_vm1, %vm1983_vm10  ;;  %v2003_v56 = vand.u32 2147483648, %v1976_v18  ;;  %v2001_v35 = vand.u32 2147483647, %v1976_v18  ;;  %vm1997_vm8 = vweird.f32 %v1976_v18 }
 0xbe9   :  { %v1979_v39 = vsub.f32 1.0, %v1978_v34  ;;  %vm5012_vm10 = vcmp.ge.s32.totalorder %v3874_v17, 2  ;;  %vm5016_vm1 = vcmp.ge.s32.totalorder %v3876_v19, 3 }
 0xbea   :  { %v2004_v46 = vor.u32 1.1754944e-38, %v2003_v56  ;;  %vm2002_vm12 = vcmp.eq.f32.partialorder %v2001_v35, 8.507059e+37 }
 0xbeb   :  { %v1980_v42 = vmul.f32 %v3590_v33, %v1979_v39 }
 0xbed   :  { %v1981_v44 = vadd.f32 %v3590_v33, %v1980_v42 }
 0xbee   :  { %v3592_v48 = vpop.eup %3591 }
 0xbef   :  { %v1993_v31 = vmul.f32 %v3592_v48, %v1976_v18  ;;  %v1985_v54 = vsel %vm1984_vm13, %v3590_v33, %v1981_v44  ;;  %vm1998_vm15 = vweird.f32 %v3592_v48 }
 0xbf0   :  { %v1990_v53 = vsel %vm1987_vm14, %v1989_v40, %v1985_v54  ;;  %vm1999_vm11 = vmor %vm1997_vm8, %vm1998_vm15 }
 0xbf1   :  { %v1994_v41 = vsub.f32 1.0, %v1993_v31  ;;  %v2007_v57 = vmul.f32 %v1990_v53, %v1951_v60 }
 0xbf3   :  { %v1995_v47 = vmul.f32 %v3592_v48, %v1994_v41  ;;  %v2018_v37 = vrot.slane %v2007_v57, 7  ;;  %v2030_v62 = vrot.slane %v2007_v57, 6  ;;  %v2012_v9 = vmul.f32 %v3456_v59, %v2007_v57 }
 0xbf4   :  { %v2042_v14 = vrot.slane %v2007_v57, 5 }
 0xbf5   :  { %v1996_v49 = vadd.f32 %v3592_v48, %v1995_v47  ;;  %v2015_v30 = vadd.f32 %v3185_v8, %v2012_v9 }
 0xbf7   :  { %v2000_v51 = vsel %vm1999_vm11, %v3592_v48, %v1996_v49 }
 0xbf8   :  { %v2005_v55 = vsel %vm2002_vm12, %v2004_v46, %v2000_v51 }
 0xbf9   :  { %v2008_v61 = vmul.f32 %v2005_v55, %v1953_v21 }
 0xbfb   :  { %v2013_v52 = vmul.f32 %v3456_v59, %v2008_v61  ;;  %v2019_v0 = vrot.slane %v2008_v61, 7  ;;  %v2031_v4 = vrot.slane %v2008_v61, 6  ;;  %v2043_v12 = vrot.slane %v2008_v61, 5 }
 0xbfd   :  { %v2020_v13 = vsel %vm361_vm4, %v2018_v37, %v2019_v0  ;;  %v2021_v26 = vsel %vm361_vm4, %v2019_v0, %v2018_v37  ;;  %v2032_v22 = vsel %vm378_vm6, %v2030_v62, %v2031_v4  ;;  %v2033_v11 = vsel %vm378_vm6, %v2031_v4, %v2030_v62 }
 0xbfe   :  { %v2022_v25 = vsel %vm99_vm5, %v2021_v26, 0.0  ;;  %v2023_v60 = vsel %vm100_vm7, %v2020_v13, 0.0  ;;  %v2035_v2 = vsel %vm102_vm9, %v2032_v22, 0.0  ;;  %v2016_v21 = vadd.f32 %v3185_v8, %v2013_v52  ;;  %v1964_v22 = vpop.f32.mrf.mxu2 }
 0xbff   :  { %v2025_v28 = vmul.f32 %v3457_v1, %v2022_v25  ;;  %v2026_v29 = vmul.f32 %v3457_v1, %v2023_v60  ;;  %v2034_v10 = vsel %vm5012_vm10, %v2033_v11, 0.0  ;;  %vm5013_vm5 = vcmp.lt.s32.totalorder %v3867_v63, 3  ;;  %v3191_v25 = vld [vmem:[%s4970_s15 + $0x32] ss:$0 sm:$0xff]  ;;  %v3421_v60 = vld [vmem:[%s4962_s7 + $0xf8] sm:$0xff] }
 0xc00   :  { %v2044_v27 = vsel %vm5013_vm5, %v2042_v14, %v2043_v12  ;;  %vm5014_vm7 = vmmov %vm5013_vm5  ;;  %v2038_v18 = vmul.f32 %v3458_v24, %v2035_v2  ;;  %vm5015_vm9 = vcmp.ge.s32.totalorder %v3874_v17, 3  ;;  %v2037_v42 = vmul.f32 %v3458_v24, %v2034_v10  ;;  %2338 = vmatpush.bf16.msra.mxu2 %v3421_v60 }
 0xc01   :  { %v2045_v33 = vsel %vm5014_vm7, %v2043_v12, %v2042_v14  ;;  %v2028_v34 = vadd.f32 %v2026_v29, %v2016_v21  ;;  %v2047_v39 = vsel %vm5016_vm1, %v2044_v27, 0.0  ;;  %v2027_v43 = vadd.f32 %v2025_v28, %v2015_v30  ;;  %v3420_v29 = vld [vmem:[%s4962_s7 + $0xf0] sm:$0xff]  ;;  %v3419_v30 = vld [vmem:[%s4962_s7 + $0xe8] sm:$0xff] }
 0xc02   :  { %v2046_v38 = vsel %vm5015_vm9, %v2045_v33, 0.0  ;;  %v2050_v45 = vmul.f32 %v3459_v20, %v2047_v39  ;;  %v1895_v24 = vperm.slane %v4657_v15, 1  ;;  %vm5017_vm7 = vcmp.eq.s32.totalorder %v3876_v19, 0 }
 0xc03   :  { %v2040_v44 = vadd.f32 %v2038_v18, %v2028_v34  ;;  %v2039_v48 = vadd.f32 %v2037_v42, %v2027_v43  ;;  %v2049_v50 = vmul.f32 %v3459_v20, %v2046_v38  ;;  %v3418_v18 = vld [vmem:[%s4962_s7 + $0xe0] sm:$0xff]  ;;  %v3417_v43 = vld [vmem:[%s4962_s7 + $0xd8] sm:$0xff] }
 0xc04   :  { %v4712_v28 = vadd.f32 %v1964_v22, %v1895_v24  ;;  %2339 = vmatpush.bf16.msra.mxu2 %v3420_v29 }
 0xc05   :  { %v2052_v31 = vadd.f32 %v2050_v45, %v2040_v44  ;;  %v2051_v32 = vadd.f32 %v2049_v50, %v2039_v48  ;;  %v3416_v45 = vld [vmem:[%s4962_s7 + $0xd0] sm:$0xff] }
 0xc06   :  { %v1966_v11 = vpop.f32.mrf.mxu2  ;;  %v3225_v20 = vmul.f32 -1.442695, %v4712_v28 }
 0xc07   :  { %v3190_v54 = vmul.f32 -1.442695, %v2052_v31  ;;  %v3189_v40 = vmul.f32 -1.442695, %v2051_v32  ;;  %v4717_v10 = vadd.f32 %v1966_v11, %v1895_v24 }
 0xc08   :  { %2340 = vmatpush.bf16.msra.mxu2 %v3419_v30 }
 0xc09   :  { %3593 = vpow2.f32 %v3190_v54  ;;  %v3226_v27 = vmul.f32 -1.442695, %v4717_v10 }
 0xc0a   :  { %3595 = vpow2.f32 %v3189_v40 }
 0xc0c   :  { %2341 = vmatpush.bf16.msra.mxu2 %v3418_v18 }
 0xc0f   :  { %v3594_v41 = vpop.eup %3593 }
 0xc10   :  { %v3596_v56 = vpop.eup %3595  ;;  %v2060_v53 = vadd.f32 1.0, %v3594_v41  ;;  %2342 = vmatpush.bf16.msra.mxu2 %v3417_v43  ;;  %v3415_v41 = vld [vmem:[%s4962_s7 + $0xc8] sm:$0xff] }
 0xc11   :  { %v2059_v47 = vadd.f32 1.0, %v3596_v56 }
 0xc12   :  { %3597 = vrcp.f32 %v2060_v53  ;;  %v2087_v58 = vand.u32 2147483648, %v2060_v53  ;;  %v2085_v61 = vand.u32 2147483647, %v2060_v53  ;;  %vm2081_vm15 = vweird.f32 %v2060_v53 }
 0xc13   :  { %3599 = vrcp.f32 %v2059_v47  ;;  %v2072_v59 = vand.u32 2147483648, %v2059_v47  ;;  %v2070_v62 = vand.u32 2147483647, %v2059_v47  ;;  %vm2066_vm8 = vweird.f32 %v2059_v47 }
 0xc14   :  { %v2088_v1 = vor.u32 1.1754944e-38, %v2087_v58  ;;  %vm2086_vm10 = vcmp.eq.f32.partialorder %v2085_v61, 8.507059e+37  ;;  %2343 = vmatpush.bf16.msra.mxu2 %v3416_v45 }
 0xc15   :  { %v2073_v4 = vor.u32 1.1754944e-38, %v2072_v59  ;;  %vm2071_vm5 = vcmp.eq.f32.partialorder %v2070_v62, 8.507059e+37 }
 0xc18   :  { %v3598_v35 = vpop.eup %3597  ;;  %2344 = vmatpush.bf16.msra.mxu2 %v3415_v41 }
 0xc19   :  { %v3600_v36 = vpop.eup %3599  ;;  %v2077_v49 = vmul.f32 %v3598_v35, %v2060_v53  ;;  %vm2082_vm13 = vweird.f32 %v3598_v35  ;;  %v3414_v53 = vld [vmem:[%s4962_s7 + $0xc0] sm:$0xff] }
 0xc1a   :  { %v2062_v57 = vmul.f32 %v3600_v36, %v2059_v47  ;;  %vm2067_vm14 = vweird.f32 %v3600_v36  ;;  %vm2083_vm11 = vmor %vm2081_vm15, %vm2082_vm13 }
 0xc1b   :  { %v2078_v46 = vsub.f32 1.0, %v2077_v49  ;;  %vm2068_vm12 = vmor %vm2066_vm8, %vm2067_vm14 }
 0xc1c   :  { %v2063_v51 = vsub.f32 1.0, %v2062_v57  ;;  %2345 = vmatpush.bf16.msra.mxu2 %v3414_v53 }
 0xc1d   :  { %v2079_v55 = vmul.f32 %v3598_v35, %v2078_v46 }
 0xc1e   :  { %v2064_v37 = vmul.f32 %v3600_v36, %v2063_v51 }
 0xc1f   :  { %v2080_v52 = vadd.f32 %v3598_v35, %v2079_v55 }
 0xc20   :  { %v2065_v0 = vadd.f32 %v3600_v36, %v2064_v37 }
 0xc21   :  { %v2084_v5 = vsel %vm2083_vm11, %v3598_v35, %v2080_v52 }
 0xc22   :  { %v2069_v9 = vsel %vm2068_vm12, %v3600_v36, %v2065_v0  ;;  %v2089_v12 = vsel %vm2086_vm10, %v2088_v1, %v2084_v5 }
 0xc23   :  { %v2074_v8 = vsel %vm2071_vm5, %v2073_v4, %v2069_v9  ;;  %v4699_v14 = vmul.f32 %v2089_v12, %v2052_v31 }
 0xc24   :  { %v4701_v13 = vmul.f32 %v2074_v8, %v2051_v32 }
 0xc26   :  { %v2110_v26 = vpack.c.bf16 %v4699_v14, %v4701_v13 }
 0xc28   :  { %2168 = vmatmul.bf16.vlgmr.msra.gmra.mxu1 %v2110_v26 }
 0xca5   :  { %v2169_v2 = vpop.f32.mrf.mxu1 }
 0xca6   :  { %v2170_v21 = vadd.f32 %v3191_v25, %v2169_v2 }
 0xca8   :  { %v2174_v15 = vmul.f32 1.442695, %v2170_v21 }
 0xcaa   :  { %3601 = vpow2.f32 %v2174_v15 }
 0xcab   :  { %3603 = vpow2.f32 %v3225_v20 }
 0xcac   :  { %3605 = vpow2.f32 %v3226_v27 }
 0xcad   :  { %v2171_v33 = vpop.f32.mrf.mxu1 }
 0xcae   :  { %v2172_v34 = vadd.f32 %v3191_v25, %v2171_v33 }
 0xcb0   :  { %v3602_v38 = vpop.eup %3601  ;;  %v2176_v39 = vmul.f32 1.442695, %v2172_v34 }
 0xcb1   :  { %v2178_v42 = vadd.f32 2.0, %v3602_v38  ;;  %v3604_v44 = vpop.eup %3603 }
 0xcb2   :  { %3607 = vpow2.f32 %v2176_v39  ;;  %v3606_v48 = vpop.eup %3605  ;;  %v4733_v31 = vadd.f32 1.0, %v3604_v44 }
 0xcb3   :  { %3609 = vrcp.f32 %v2178_v42  ;;  %v4735_v54 = vadd.f32 1.0, %v3606_v48 }
 0xcb4   :  { %v2248_v30 = vand.u32 2147483648, %v4733_v31  ;;  %v2246_v48 = vand.u32 2147483647, %v4733_v31 }
 0xcb5   :  { %v2263_v38 = vand.u32 2147483648, %v4735_v54  ;;  %vm2257_vm13 = vweird.f32 %v4735_v54 }
 0xcb8   :  { %v3608_v50 = vpop.eup %3607 }
 0xcb9   :  { %v3610_v32 = vpop.eup %3609  ;;  %v2179_v40 = vadd.f32 2.0, %v3608_v50  ;;  %v2261_v50 = vand.u32 2147483647, %v4735_v54 }
 0xcba   :  { %v2182_v56 = vsel %vm97_vm0, 0.0, %v3610_v32  ;;  %vm2242_vm0 = vweird.f32 %v4733_v31 }
 0xcbb   :  { %3611 = vrcp.f32 %v2179_v40  ;;  %v2184_v47 = vsub.f32 1.0, %v2182_v56  ;;  %v2196_v61 = vrot.slane %v2182_v56, 7  ;;  %vm2262_vm15 = vcmp.eq.f32.partialorder %v2261_v50, 8.507059e+37 }
 0xcbc   :  { %3613 = vrcp.f32 %v4733_v31 }
 0xcbd   :  { %3615 = vrcp.f32 %v4735_v54  ;;  %v2186_v17 = vmul.f32 %v2184_v47, %v4701_v13 }
 0xcbf   :  { %v2188_v37 = vrot.slane %v2186_v17, 7 }
 0xcc1   :  { %v3612_v35 = vpop.eup %3611 }
 0xcc2   :  { %v4747_v36 = vpop.eup %3613  ;;  %v2183_v49 = vsel %vm5017_vm7, 0.0, %v3612_v35  ;;  %v2249_v35 = vor.u32 1.1754944e-38, %v2248_v30 }
 0xcc3   :  { %v4751_v57 = vpop.eup %3615  ;;  %v2185_v46 = vsub.f32 1.0, %v2183_v49  ;;  %v2197_v51 = vrot.slane %v2183_v49, 7  ;;  %v2238_v59 = vmul.f32 %v4747_v36, %v4733_v31 }
 0xcc4   :  { %v2253_v55 = vmul.f32 %v4751_v57, %v4735_v54  ;;  %vm2258_vm9 = vweird.f32 %v4751_v57 }
 0xcc5   :  { %v2187_v58 = vmul.f32 %v2185_v46, %v4699_v14  ;;  %v2198_v19 = vsel %vm361_vm4, %v2196_v61, %v2197_v51  ;;  %v2199_v52 = vsel %vm361_vm4, %v2197_v51, %v2196_v61  ;;  %v2239_v4 = vsub.f32 1.0, %v2238_v59  ;;  %vm4793_vm14 = vmor %vm2257_vm13, %vm2258_vm9  ;;  %v3224_v46 = vld [vmem:[%s4970_s15 + $0x33] ss:$0 sm:$0xff] }
 0xcc6   :  { %v2254_v5 = vsub.f32 1.0, %v2253_v55  ;;  %v2200_v8 = vmul.f32 %v2199_v52, %v2182_v56  ;;  %v2201_v26 = vmul.f32 %v2198_v19, %v2183_v49  ;;  %v2225_v61 = vmul.f32 %v3224_v46, %v4701_v13 }
 0xcc7   :  { %v2189_v62 = vrot.slane %v2187_v58, 7  ;;  %v2240_v25 = vmul.f32 %v4747_v36, %v2239_v4  ;;  %vm5026_vm13 = vcmask 130048  }
 0xcc8   :  { %v2255_v60 = vmul.f32 %v4751_v57, %v2254_v5  ;;  %v2211_v21 = vrot.slane %v2201_v26, 6  ;;  %v2210_v29 = vrot.slane %v2200_v8, 6 }
 0xcc9   :  { %v2190_v0 = vsel %vm361_vm4, %v2188_v37, %v2189_v62  ;;  %v2191_v1 = vsel %vm361_vm4, %v2189_v62, %v2188_v37  ;;  %vm2243_vm4 = vweird.f32 %v4747_v36  ;;  %v2241_v34 = vadd.f32 %v4747_v36, %v2240_v25 }
 0xcca   :  { %v2193_v9 = vmul.f32 %v2190_v0, %v2183_v49  ;;  %v2192_v12 = vmul.f32 %v2191_v1, %v2182_v56  ;;  %v2256_v18 = vadd.f32 %v4751_v57, %v2255_v60  ;;  %v2212_v43 = vsel %vm378_vm6, %v2210_v29, %v2211_v21  ;;  %vm4786_vm1 = vmor %vm2242_vm0, %vm2243_vm4 }
 0xccb   :  { %v2213_v44 = vsel %vm378_vm6, %v2211_v21, %v2210_v29  ;;  %v2245_v56 = vsel %vm4786_vm1, %v4747_v36, %v2241_v34  ;;  %v2215_v31 = vmul.f32 %v2212_v43, %v2201_v26  ;;  %v2264_v49 = vor.u32 1.1754944e-38, %v2263_v38 }
 0xccc   :  { %v2195_v22 = vadd.f32 %v2193_v9, %v2187_v58  ;;  %v2194_v24 = vadd.f32 %v2192_v12, %v2186_v17  ;;  %v2260_v53 = vsel %vm4793_vm14, %v4751_v57, %v2256_v18  ;;  %v2214_v47 = vmul.f32 %v2213_v44, %v2200_v8  ;;  %v3243_v9 = vld [vmem:[%s4970_s15 + $0x34] ss:$0 sm:$0xff]  ;;  %vm5027_vm14 = vmmov %vm5026_vm13 }
 0xccd   :  { %v2265_v57 = vsel %vm2262_vm15, %v2264_v49, %v2260_v53  ;;  %v2226_v37 = vmul.f32 %v3224_v46, %v4699_v14  ;;  %vm2593_vm15 = vcmask 517120  }
 0xcce   :  { %v2203_v11 = vrot.slane %v2195_v22, 6  ;;  %v2202_v2 = vrot.slane %v2194_v24, 6  ;;  %v2268_v19 = vmul.f32 %v2265_v57, %v4717_v10 }
 0xcd0   :  { %v2204_v15 = vsel %vm378_vm6, %v2202_v2, %v2203_v11  ;;  %v2205_v20 = vsel %vm378_vm6, %v2203_v11, %v2202_v2  ;;  %vm2247_vm6 = vcmp.eq.f32.partialorder %v2246_v48, 8.507059e+37 }
 0xcd1   :  { %v2206_v27 = vmul.f32 %v2205_v20, %v2200_v8  ;;  %v2207_v33 = vmul.f32 %v2204_v15, %v2201_v26  ;;  %v2250_v58 = vsel %vm2247_vm6, %v2249_v35, %v2245_v56  ;;  %v2452_v35 = vld [vmem:[%s4956_s1] sm:$0x3]  ;;  %vm5028_vm6 = vmmov %vm5026_vm13 }
 0xcd2   :  { %v2267_v62 = vmul.f32 %v2250_v58, %v4712_v28 }
 0xcd3   :  { %v2208_v39 = vadd.f32 %v2206_v27, %v2194_v24  ;;  %v2209_v42 = vadd.f32 %v2207_v33, %v2195_v22 }
 0xcd5   :  { %v2216_v40 = vrot.slane %v2208_v39, 4  ;;  %v2217_v41 = vrot.slane %v2209_v42, 4 }
 0xcd7   :  { %v2218_v54 = vsel %vm577_vm3, %v2216_v40, %v2217_v41  ;;  %v2219_v17 = vsel %vm577_vm3, %v2217_v41, %v2216_v40  ;;  %vm5022_vm3 = vcmp.lt.s32.totalorder %v3753_v3, 32 }
 0xcd8   :  { %v2220_v36 = vmul.f32 %v2219_v17, %v2214_v47  ;;  %v2221_v51 = vmul.f32 %v2218_v54, %v2215_v31  ;;  %vm5023_vm8 = vmmov %vm5022_vm3  ;;  %v3655_v31 = vmov 0  }
 0xcd9   :  { %vm5024_vm11 = vmmov %vm5022_vm3  ;;  %3438 = vset.pattern.permute.xlu1 %v3655_v31  ;;  %3440 = vset.pattern.permute.xlu0 %v3655_v31 }
 0xcda   :  { %v2222_v59 = vadd.f32 %v2220_v36, %v2208_v39  ;;  %v2223_v55 = vadd.f32 %v2221_v51, %v2209_v42  ;;  %vm5025_vm12 = vmmov %vm5022_vm3  ;;  %v2472_v51 = vld [vmem:[%s4957_s2] sm:$0x3] }
 0xcdc   :  { %v2227_v52 = vadd.f32 %v2225_v61, %v2222_v59  ;;  %v2228_v0 = vadd.f32 %v2226_v37, %v2223_v55  ;;  %v3656_v59 = vmov 1  }
 0xcdd   :  { %3439 = vset.pattern.permute.xlu2 %v3656_v59 }
 0xcde   :  { %v2269_v1 = vmul.f32 %v2267_v62, %v2227_v52  ;;  %v2270_v4 = vmul.f32 %v2268_v19, %v2228_v0 }
 0xce0   :  { %v2288_v5 = vpack.c.bf16 %v2270_v4, %v2269_v1 }
 0xce2   :  { %2346 = vmatmul.bf16.vlgmr.msra.gmra.mxu2 %v2288_v5 }
 0xd65   :  { %v2347_v12 = vpop.f32.mrf.mxu2 }
 0xd66   :  { %v2348_v8 = vadd.f32 %v3243_v9, %v2347_v12 }
 0xd68   :  { %v2352_v13 = vadd.f32 %v2348_v8, %v4646_v16 }
 0xd6a   :  { %v2364_v14 = vsel %vm149_vm2, %v2352_v13, 0.0  ;;  %v2356_v28 = vmul.f32 %v3762_v7, %v2352_v13 }
 0xd6b   :  { %2365 = vadd.xlane.f32.xlu1 %v2364_v14  ;;  %v3276_v14 = vld [vmem:[%s4970_s15 + $0x35] ss:$0 sm:$0xff] }
 0xd6c   :  { %v2358_v10 = vsel %vm149_vm2, %v2356_v28, 0.0 }
 0xd6d   :  { %v2349_v26 = vpop.f32.mrf.mxu2  ;;  %2359 = vadd.xlane.f32.xlu2 %v2358_v10 }
 0xd6e   :  { %v2350_v22 = vadd.f32 %v3243_v9, %v2349_v26  ;;  %v2428_v9 = vmul.u32 8, %v3867_v63 }
 0xd70   :  { %v2353_v24 = vadd.f32 %v2350_v22, %v4648_v23  ;;  %v2429_v28 = vadd.s32 7, %v2428_v9 }
 0xd72   :  { %v2357_v25 = vmul.f32 %v3762_v7, %v2353_v24  ;;  %v2367_v11 = vsel %vm149_vm2, %v2353_v24, 0.0  ;;  %vm2430_vm1 = vcmp.eq.s32.totalorder %v3753_v3, %v2429_v28  ;;  %v3430_v28 = vld [vmem:[%s4968_s13 + $0x10] sm:$0xff] }
 0xd74   :  { %v2361_v60 = vsel %vm149_vm2, %v2357_v25, 0.0 }
 0xd75   :  { %2362 = vadd.xlane.f32.xlu0 %v2361_v60  ;;  %2368 = vadd.xlane.f32.xlu2 %v2367_v11  ;;  %v3278_v11 = vsel %vm2430_vm1, 1.0, %v3654_v6  ;;  %v3423_v6 = vld [vmem:[%s4965_s10 + $0x8] sm:$0xff]  ;;  %vm2740_vm1 = vcmask 9216  }
 0xdde   :  { %v2366_v16 = vpop.xlane.xlu1 %2365 }
 0xde0   :  { %v2360_v2 = vpop.xlane.xlu2 %2359 }
 0xde1   :  { %v2370_v21 = vsub.f32 %v2366_v16, %v2360_v2 }
 0xde3   :  { %v2372_v29 = vsel %vm5022_vm3, %v2360_v2, %v2370_v21  ;;  %v2434_v2 = vpack.c.bf16 %v3278_v11, %v3278_v11  ;;  %v3425_v21 = vld [vmem:[%s4965_s10 + $0x18] sm:$0xff] }
 0xde4   :  { %v2374_v15 = vmul.f32 0.03125, %v2372_v29  ;;  %v3426_v29 = vld [vmem:[%s4966_s11] sm:$0xff] }
 0xde5   :  { %2515 = vmatpush.bf16.msra.mxu0 %v3426_v29 }
 0xde6   :  { %v2376_v20 = vsub.f32 %v2352_v13, %v2374_v15  ;;  %v3424_v15 = vld [vmem:[%s4965_s10 + $0x10] sm:$0xff] }
 0xde8   :  { %v2363_v30 = vpop.xlane.xlu0 %2362  ;;  %v2369_v27 = vpop.xlane.xlu2 %2368  ;;  %v2378_v33 = vmul.f32 %v2376_v20, %v2376_v20 }
 0xde9   :  { %v2371_v23 = vsub.f32 %v2369_v27, %v2363_v30 }
 0xdea   :  { %v2388_v34 = vsel %vm149_vm2, %v2378_v33, 0.0  ;;  %v2380_v18 = vmul.f32 %v3762_v7, %v2378_v33  ;;  %v3461_v33 = vld [vmem:[%s4969_s14 + $0x3] ss:$0 sm:$0xff] }
 0xdeb   :  { %v2373_v38 = vsel %vm5023_vm8, %v2363_v30, %v2371_v23  ;;  %2389 = vadd.xlane.f32.xlu2 %v2388_v34  ;;  %v3462_v30 = vld [vmem:[%s4963_s8 + $0x1] ss:$0 sm:$0xff]  ;;  %vm5029_vm8 = vmmov %vm5022_vm3 }
 0xdec   :  { %v2375_v39 = vmul.f32 0.03125, %v2373_v38  ;;  %v2382_v42 = vsel %vm149_vm2, %v2380_v18, 0.0 }
 0xded   :  { %2383 = vadd.xlane.f32.xlu0 %v2382_v42 }
 0xdee   :  { %v2377_v43 = vsub.f32 %v2353_v24, %v2375_v39  ;;  %v3277_v24 = vld [vmem:[%s4970_s15 + $0x36] ss:$0 sm:$0xff] }
 0xdf0   :  { %v2379_v44 = vmul.f32 %v2377_v43, %v2377_v43 }
 0xdf2   :  { %v2381_v45 = vmul.f32 %v3762_v7, %v2379_v44  ;;  %v2391_v48 = vsel %vm149_vm2, %v2379_v44, 0.0  ;;  %v3463_v44 = vld [vmem:[%s4964_s9] ss:$0 sm:$0xff] }
 0xdf4   :  { %v2385_v50 = vsel %vm149_vm2, %v2381_v45, 0.0 }
 0xdf5   :  { %2392 = vadd.xlane.f32.xlu0 %v2391_v48  ;;  %2386 = vadd.xlane.f32.xlu1 %v2385_v50  ;;  %v3464_v48 = vld [vmem:[%s4969_s14 + $0x4] ss:$0 sm:$0xff] }
 0xe03   :  { %2465 = vperm.xlu2 %3439, %v2452_v35  }
 0xe09   :  { %2476 = vperm.xlu0 %3440, %v2472_v51  }
 0xe0e   :  { %2456 = vperm.xlu1 %3438, %v2452_v35  }
 0xe5e   :  { %v2390_v32 = vpop.xlane.xlu2 %2389 }
 0xe60   :  { %v2384_v40 = vpop.xlane.xlu0 %2383 }
 0xe61   :  { %v2394_v41 = vsub.f32 %v2390_v32, %v2384_v40 }
 0xe63   :  { %v2396_v56 = vsel %vm5024_vm11, %v2384_v40, %v2394_v41  ;;  %v3422_v40 = vld [vmem:[%s4965_s10] sm:$0xff] }
 0xe64   :  { %v2398_v53 = vmul.f32 0.03125, %v2396_v56  ;;  %v3427_v41 = vld [vmem:[%s4967_s12] sm:$0xff] }
 0xe65   :  { %2580 = vmatpush.bf16.msrb.mxu0 %v3427_v41 }
 0xe66   :  { %v2400_v47 = vadd.f32 1e-05, %v2398_v53  ;;  %v2466_v27 = vpop.permute.xlu2 %2465 }
 0xe67   :  { %v2469_v18 = vmul.f32 %v3462_v30, %v2466_v27 }
 0xe68   :  { %3617 = vrsqrt.f32 %v2400_v47  ;;  %v2393_v49 = vpop.xlane.xlu0 %2392  ;;  %v2387_v54 = vpop.xlane.xlu1 %2386  ;;  %vm2408_vm5 = vweird.f32 %v2400_v47 }
 0xe69   :  { %v2395_v17 = vsub.f32 %v2393_v49, %v2387_v54 }
 0xe6b   :  { %v2397_v46 = vsel %vm5025_vm12, %v2387_v54, %v2395_v17 }
 0xe6c   :  { %v2399_v36 = vmul.f32 0.03125, %v2397_v46 }
 0xe6e   :  { %v3618_v58 = vpop.eup %3617  ;;  %v2401_v57 = vadd.f32 1e-05, %v2399_v36 }
 0xe6f   :  { %v2403_v55 = vmul.f32 %v3618_v58, %v2400_v47  ;;  %vm2409_vm10 = vweird.f32 %v3618_v58 }
 0xe70   :  { %3619 = vrsqrt.f32 %v2401_v57  ;;  %vm2410_vm7 = vmor %vm2408_vm5, %vm2409_vm10  ;;  %vm2418_vm4 = vweird.f32 %v2401_v57 }
 0xe71   :  { %v2404_v61 = vmul.f32 %v3618_v58, %v2403_v55 }
 0xe73   :  { %v2405_v37 = vmul.f32 0.5, %v2404_v61 }
 0xe75   :  { %v2406_v62 = vsub.f32 1.5, %v2405_v37 }
 0xe76   :  { %v3620_v19 = vpop.eup %3619 }
 0xe77   :  { %v2407_v52 = vmul.f32 %v3618_v58, %v2406_v62  ;;  %v2413_v0 = vmul.f32 %v3620_v19, %v2401_v57  ;;  %vm2419_vm0 = vweird.f32 %v3620_v19 }
 0xe78   :  { %vm2420_vm9 = vmor %vm2418_vm4, %vm2419_vm0 }
 0xe79   :  { %v2414_v1 = vmul.f32 %v3620_v19, %v2413_v0  ;;  %v2411_v4 = vsel %vm2410_vm7, %v3618_v58, %v2407_v52  ;;  %v3465_v58 = vld [vmem:[%s4969_s14 + $0x5] ss:$0 sm:$0xff] }
 0xe7a   :  { %v2422_v8 = vmul.f32 %v2411_v4, %v2376_v20  ;;  %v3460_v20 = vld [vmem:[%s4963_s8] ss:$0 sm:$0xff] }
 0xe7b   :  { %v2415_v5 = vmul.f32 0.5, %v2414_v1  ;;  %v2477_v45 = vpop.permute.xlu0 %2476 }
 0xe7c   :  { %v2424_v22 = vmul.f32 %v3276_v14, %v2422_v8  ;;  %v2482_v50 = vmul.f32 %v3463_v44, %v2477_v45 }
 0xe7d   :  { %v2416_v12 = vsub.f32 1.5, %v2415_v5 }
 0xe7e   :  { %v2426_v25 = vadd.f32 %v3277_v24, %v2424_v22  ;;  %v2484_v32 = vadd.f32 %v3464_v48, %v2482_v50 }
 0xe7f   :  { %v2417_v13 = vmul.f32 %v3620_v19, %v2416_v12 }
 0xe80   :  { %v2457_v23 = vpop.permute.xlu1 %2456  ;;  %v2486_v56 = vmax.f32 %v2484_v32, 0.0 }
 0xe81   :  { %v2421_v10 = vsel %vm2420_vm9, %v3620_v19, %v2417_v13  ;;  %v2460_v34 = vmul.f32 %v3460_v20, %v2457_v23  ;;  %v3466_v20 = vld [vmem:[%s4969_s14 + $0x6] ss:$0 sm:$0xff]  ;;  %vm2735_vm9 = vcmp.eq.s32.totalorder %v3753_v3, 0 }
 0xe82   :  { %v2423_v26 = vmul.f32 %v2421_v10, %v2377_v43  ;;  %v2563_v53 = vpack.c.bf16 %v2486_v56, %v2486_v56  ;;  %v3429_v10 = vld [vmem:[%s4968_s13 + $0x8] sm:$0xff] }
 0xe83   :  { %v2462_v38 = vadd.f32 %v3461_v33, %v2460_v34  ;;  %v3467_v33 = vld [vmem:[%s4969_s14 + $0x7] ss:$0 sm:$0xff] }
 0xe84   :  { %v2425_v63 = vmul.f32 %v3276_v14, %v2423_v26  ;;  %v3431_v14 = vld [vmem:[%s4968_s13 + $0x18] sm:$0xff]  ;;  %v3428_v26 = vld [vmem:[%s4968_s13] sm:$0xff] }
 0xe85   :  { %v2470_v39 = vadd.f32 %v2469_v18, %v2462_v38  ;;  %2674 = vmatpush.bf16.msrb.mxu1 %v3431_v14 }
 0xe86   :  { %v2427_v60 = vadd.f32 %v3277_v24, %v2425_v63 }
 0xe87   :  { %v2485_v42 = vmax.f32 %v2470_v39, 0.0  ;;  %v3468_v39 = vld [vmem:[%s4969_s14 + $0x8] ss:$0 sm:$0xff] }
 0xe88   :  { %v2431_v16 = vpack.c.bf16 %v2427_v60, %v2426_v25 }
 0xe89   :  { %v2498_v43 = vpack.c.bf16 %v2485_v42, %v2485_v42  ;;  %2675 = vmatpush.bf16.msrb.mxu1 %v3430_v28 }
 0xe8a   :  { %2445 = vmatpush.bf16.msrb.mxu3 %v2431_v16 }
 0xe8b   :  { %3284 = vmatmul.msk.bf16.vlgmr.msra.gmra.mxu0 %vm5027_vm14, %v2498_v43 }
 0xe8d   :  { %3279 = vmatmul.msk.bf16.vlgmr.msrb.gmra.mxu3 %vm5026_vm13, %v2434_v2  ;;  %2676 = vmatpush.bf16.msrb.mxu1 %v3429_v10 }
 0xe8e   :  { %2552 = vmatpush.bf16.msra.mxu3 %v3425_v21 }
 0xe91   :  { %2677 = vmatpush.bf16.msrb.mxu1 %v3428_v26 }
 0xe92   :  { %2553 = vmatpush.bf16.msra.mxu3 %v3424_v15 }
 0xe96   :  { %2554 = vmatpush.bf16.msra.mxu3 %v3423_v6 }
 0xe9a   :  { %2555 = vmatpush.bf16.msra.mxu3 %v3422_v40 }
 0xe9b   :  { %3306 = vmatmul.msk.bf16.vlgmr.msrb.gmra.mxu0 %vm5028_vm6, %v2563_v53 }
 0xf08   :  { %v2517_v49 = vpop.f32.mrf.mxu0 }
 0xf10   :  { %v2447_v47 = vpop.f32.mrf.mxu3  ;;  %v2519_v54 = vpop.f32.mrf.mxu0 }
 0xf11   :  { %v2495_v31 = vpack.c.bf16 %v2447_v47, %v2447_v47 }
 0xf13   :  { %3301 = vmatmul.msk.bf16.vlgmr.msra.gmra.mxu3 %vm149_vm2, %v2495_v31 }
 0xf18   :  { %v2449_v35 = vpop.f32.mrf.mxu3  ;;  %v2582_v17 = vpop.f32.mrf.mxu0 }
 0xf20   :  { %v2584_v46 = vpop.f32.mrf.mxu0 }
 0xf96   :  { %v2557_v36 = vpop.f32.mrf.mxu3 }
 0xf97   :  { %v2558_v51 = vadd.f32 %v2557_v36, %v2517_v49 }
 0xf99   :  { %v2586_v57 = vadd.f32 %v2582_v17, %v2558_v51 }
 0xf9b   :  { %v2589_v59 = vadd.f32 %v3465_v58, %v2586_v57 }
 0xf9d   :  { %v2597_v55 = vsel %vm2593_vm15, %v2589_v59, 0.0  ;;  %v2592_v61 = vmul.f32 %v3762_v7, %v2589_v59 }
 0xf9e   :  { %2598 = vadd.xlane.f32.xlu1 %v2597_v55  ;;  %v2559_v37 = vpop.f32.mrf.mxu3 }
 0xf9f   :  { %v2594_v62 = vsel %vm2593_vm15, %v2592_v61, 0.0 }
 0xfa0   :  { %2595 = vadd.xlane.f32.xlu2 %v2594_v62 }
0x1011   :  { %v2599_v19 = vpop.xlane.xlu1 %2598 }
0x1013   :  { %v2596_v52 = vpop.xlane.xlu2 %2595 }
0x1014   :  { %v2600_v0 = vsub.f32 %v2599_v19, %v2596_v52 }
0x1016   :  { %v2601_v1 = vsel %vm5022_vm3, %v2596_v52, %v2600_v0  ;;  %v3469_v52 = vld [vmem:[%s4969_s14 + $0x9] ss:$0 sm:$0xff] }
0x1017   :  { %v2602_v4 = vmul.f32 0.03125, %v2601_v1 }
0x1019   :  { %v2603_v5 = vsub.f32 %v2589_v59, %v2602_v4  ;;  %v3470_v4 = vld [vmem:[%s4969_s14 + $0xa] ss:$0 sm:$0xff] }
0x101b   :  { %v2604_v9 = vmul.f32 %v2603_v5, %v2603_v5 }
0x101d   :  { %v2609_v12 = vsel %vm2593_vm15, %v2604_v9, 0.0  ;;  %v2605_v8 = vmul.f32 %v3762_v7, %v2604_v9 }
0x101e   :  { %2610 = vadd.xlane.f32.xlu2 %v2609_v12  ;;  %v3471_v12 = vld [vmem:[%s4969_s14 + $0xb] ss:$0 sm:$0xff] }
0x101f   :  { %v2606_v13 = vsel %vm2593_vm15, %v2605_v8, 0.0 }
0x1020   :  { %2607 = vadd.xlane.f32.xlu0 %v2606_v13 }
0x1091   :  { %v2611_v22 = vpop.xlane.xlu2 %2610 }
0x1093   :  { %v2608_v24 = vpop.xlane.xlu0 %2607 }
0x1094   :  { %v2612_v63 = vsub.f32 %v2611_v22, %v2608_v24  ;;  %v3472_v22 = vld [vmem:[%s4969_s14 + $0xc] ss:$0 sm:$0xff] }
0x1096   :  { %v2613_v25 = vsel %vm5029_vm8, %v2608_v24, %v2612_v63 }
0x1097   :  { %v2614_v60 = vmul.f32 0.03125, %v2613_v25 }
0x1099   :  { %v2615_v11 = vadd.f32 1e-05, %v2614_v60 }
0x109b   :  { %3621 = vrsqrt.f32 %v2615_v11  ;;  %vm2622_vm12 = vweird.f32 %v2615_v11 }
0x10a1   :  { %v3622_v16 = vpop.eup %3621 }
0x10a2   :  { %v2617_v2 = vmul.f32 %v3622_v16, %v2615_v11  ;;  %vm2623_vm11 = vweird.f32 %v3622_v16 }
0x10a3   :  { %vm2624_vm10 = vmor %vm2622_vm12, %vm2623_vm11 }
0x10a4   :  { %v2618_v21 = vmul.f32 %v3622_v16, %v2617_v2 }
0x10a6   :  { %v2619_v29 = vmul.f32 0.5, %v2618_v21 }
0x10a8   :  { %v2620_v15 = vsub.f32 1.5, %v2619_v29 }
0x10aa   :  { %v2621_v6 = vmul.f32 %v3622_v16, %v2620_v15 }
0x10ac   :  { %v2625_v30 = vsel %vm2624_vm10, %v3622_v16, %v2621_v6 }
0x10ad   :  { %v2626_v27 = vmul.f32 %v2625_v30, %v2603_v5 }
0x10af   :  { %v2628_v23 = vmul.f32 %v3466_v20, %v2626_v27 }
0x10b1   :  { %v2630_v34 = vadd.f32 %v3467_v33, %v2628_v23 }
0x10b3   :  { %v2631_v18 = vmax.f32 %v2630_v34, 0.0 }
0x10b5   :  { %v2640_v38 = vpack.c.bf16 %v2631_v18, %v2631_v18 }
0x10b7   :  { %3323 = vmatmul.msk.bf16.vlgmr.msrb.gmra.mxu1 %vm149_vm2, %v2640_v38  ;;  %vm5030_vm2 = vmmov %vm5022_vm3 }
0x10b8   :  { %vm5031_vm5 = vmmov %vm5030_vm2 }
0x1134   :  { %v2679_v42 = vpop.f32.mrf.mxu1 }
0x1135   :  { %v2680_v43 = vadd.f32 %v3468_v39, %v2679_v42 }
0x1137   :  { %v2689_v44 = vsel %vm2593_vm15, %v2680_v43, 0.0  ;;  %v2685_v45 = vmul.f32 %v3762_v7, %v2680_v43 }
0x1138   :  { %2690 = vadd.xlane.f32.xlu2 %v2689_v44 }
0x1139   :  { %v2686_v48 = vsel %vm2593_vm15, %v2685_v45, 0.0 }
0x113a   :  { %2687 = vadd.xlane.f32.xlu1 %v2686_v48 }
0x113c   :  { %v2681_v50 = vpop.f32.mrf.mxu1 }
0x11ab   :  { %v2691_v32 = vpop.xlane.xlu2 %2690 }
0x11ad   :  { %v2688_v40 = vpop.xlane.xlu1 %2687 }
0x11ae   :  { %v2692_v41 = vsub.f32 %v2691_v32, %v2688_v40 }
0x11b0   :  { %v2693_v56 = vsel %vm5030_vm2, %v2688_v40, %v2692_v41 }
0x11b1   :  { %v2694_v53 = vmul.f32 0.03125, %v2693_v56 }
0x11b3   :  { %v2695_v47 = vsub.f32 %v2680_v43, %v2694_v53 }
0x11b5   :  { %v2696_v31 = vmul.f32 %v2695_v47, %v2695_v47 }
0x11b7   :  { %v2701_v35 = vsel %vm2593_vm15, %v2696_v31, 0.0  ;;  %v2697_v49 = vmul.f32 %v3762_v7, %v2696_v31 }
0x11b8   :  { %2702 = vadd.xlane.f32.xlu2 %v2701_v35 }
0x11b9   :  { %v2698_v54 = vsel %vm2593_vm15, %v2697_v49, 0.0 }
0x11ba   :  { %2699 = vadd.xlane.f32.xlu1 %v2698_v54 }
0x122b   :  { %v2703_v17 = vpop.xlane.xlu2 %2702 }
0x122d   :  { %v2700_v46 = vpop.xlane.xlu1 %2699 }
0x122e   :  { %v2704_v36 = vsub.f32 %v2703_v17, %v2700_v46 }
0x1230   :  { %v2705_v51 = vsel %vm5031_vm5, %v2700_v46, %v2704_v36 }
0x1231   :  { %v2706_v58 = vmul.f32 0.03125, %v2705_v51 }
0x1233   :  { %v2707_v57 = vadd.f32 1e-05, %v2706_v58 }
0x1235   :  { %3623 = vrsqrt.f32 %v2707_v57  ;;  %vm2714_vm0 = vweird.f32 %v2707_v57 }
0x123b   :  { %v3624_v59 = vpop.eup %3623 }
0x123c   :  { %v2709_v55 = vmul.f32 %v3624_v59, %v2707_v57  ;;  %vm2715_vm7 = vweird.f32 %v3624_v59 }
0x123d   :  { %vm2716_vm4 = vmor %vm2714_vm0, %vm2715_vm7 }
0x123e   :  { %v2710_v61 = vmul.f32 %v3624_v59, %v2709_v55 }
0x1240   :  { %v2711_v37 = vmul.f32 0.5, %v2710_v61 }
0x1242   :  { %v2712_v62 = vsub.f32 1.5, %v2711_v37 }
0x1244   :  { %v2713_v19 = vmul.f32 %v3624_v59, %v2712_v62 }
0x1246   :  { %v2717_v0 = vsel %vm2716_vm4, %v3624_v59, %v2713_v19 }
0x1247   :  { %v2718_v1 = vmul.f32 %v2717_v0, %v2695_v47 }
0x1249   :  { %v2720_v5 = vmul.f32 %v3469_v52, %v2718_v1 }
0x124b   :  { %v2722_v9 = vadd.f32 %v3470_v4, %v2720_v5 }
0x124d   :  { %v2723_v8 = vmax.f32 %v2722_v9, 0.0 }
0x124f   :  { %v2726_v13 = vmul.f32 %v3471_v12, %v2723_v8 }
0x1251   :  { %v2731_v14 = vsel %vm2593_vm15, %v2726_v13, 0.0  ;;  %v2727_v28 = vmul.f32 %v3762_v7, %v2726_v13 }
0x1252   :  { %2732 = vadd.xlane.f32.xlu2 %v2731_v14 }
0x1253   :  { %v2728_v10 = vsel %vm2593_vm15, %v2727_v28, 0.0 }
0x1254   :  { %2729 = vadd.xlane.f32.xlu1 %v2728_v10 }
0x12c5   :  { %v2733_v26 = vpop.xlane.xlu2 %2732 }
0x12c7   :  { %v2730_v24 = vpop.xlane.xlu1 %2729 }
0x12c8   :  { %v2734_v63 = vsub.f32 %v2733_v26, %v2730_v24 }
0x12ca   :  { %v2736_v25 = vsel %vm2735_vm9, %v2730_v24, %v2734_v63 }
0x12cb   :  { %v2739_v60 = vadd.f32 %v3472_v22, %v2736_v25 }
0x12cd   :  { %2741 = vst.msk [vmem:[%s4971_s16] sm:$0x3] %vm2740_vm1, %v2739_v60 }
0x12ce   :  { %2746 = vsyncpa [#allocation3], 1 }

</bundles_post_ra>
